<compile_context>
chip_gen: v7x
topology: tpu7x:2x2x1
jax: 0.10.0
libtpu: 0.0.40
codegen_flags: <defaults>
</compile_context>

<pallas_src>
import functools
import math

import jax
import jax.numpy as jnp
from jax.experimental import pallas as pl
from jax.experimental.pallas import tpu as pltpu


def _round_up(x, m):
    return ((x + m - 1) // m) * m


def _attn_kernel(q_ref, k_ref, v_ref, o_ref, *, scale, len2, d_k, approx_recip):
    """softmax(Q K^T / sqrt(d_k)) V per slab, on lane-dense (Gb, len2*d_k) blocks.

    All math is f32 on the VPU/EUP.  The kernel is written as static lane
    slices of the flat block (no in-kernel reshape, no batched dot_general),
    which keeps Mosaic lowering on well-trodden paths and leaves HBM DMA as
    the binding resource.
    """
    for i in range(len2):
        # Query row i of every slab in the block: (Gb, d_k), f32, pre-scaled.
        q_i = q_ref[:, i * d_k:(i + 1) * d_k].astype(jnp.float32) * scale

        # scores[:, j] for all key rows j: len2 lane reductions -> (Gb, 1) each.
        s = []
        for j in range(len2):
            k_j = k_ref[:, j * d_k:(j + 1) * d_k].astype(jnp.float32)
            s.append(jnp.sum(q_i * k_j, axis=-1, keepdims=True))

        # TODO(synk): optional n_mask (masked_fill_ with -1e9) not wired
        # through; the module's default forward (n_mask=None) is implemented.
        # If added, apply it to s[j] (in f32) before the max-subtraction below.

        # Numerically stable softmax over the key axis, kept in f32.
        m = s[0]
        for j in range(1, len2):
            m = jnp.maximum(m, s[j])
        p = [jnp.exp(s[j] - m) for j in range(len2)]
        denom = p[0]
        for j in range(1, len2):
            denom = denom + p[j]

        # Un-normalized context row: sum_j p_j * V_j, f32 accumulation.
        ctx = p[0] * v_ref[:, 0:d_k].astype(jnp.float32)
        for j in range(1, len2):
            v_j = v_ref[:, j * d_k:(j + 1) * d_k].astype(jnp.float32)
            ctx = ctx + p[j] * v_j

        # Normalize the (Gb, d_k) context (not the probabilities).  Approx EUP
        # reciprocal only on the low-precision path; exact divide for f32.
        inv = pl.reciprocal(denom, approx=approx_recip)
        o_ref[:, i * d_k:(i + 1) * d_k] = (ctx * inv).astype(o_ref.dtype)


def _vmem_budget_and_limit():
    """Per-generation VMEM budget for block sizing + explicit scoped limit.

    v5e's default scoped VMEM is 16 MiB, v6e/v7x 32 MiB; v7x physical VMEM per
    TensorCore is only 64 MiB.  Budgets stay safely below those, and the limit
    is still passed explicitly so the choice does not depend on per-generation
    defaults.  Unknown chips get the conservative v5e numbers.
    """
    kind = ""
    try:
        kind = jax.devices()[0].device_kind.lower()
    except Exception:
        pass
    if "v6" in kind:
        return 24 << 20, 30 << 20          # v6e: 128 MiB physical VMEM
    if "v7" in kind or "7x" in kind:
        return 20 << 20, 28 << 20          # v7x: 64 MiB physical, 2 TCs
    return 12 << 20, 16 << 20              # v5e / unknown: conservative


def _choose_block_g(G, F, itemsize, sublane, vmem_budget_bytes,
                    min_steps=2, max_block_g=256):
    """Number of slabs (rows of the flattened (G, F) arrays) per grid step.

    Sized from the *padded* VMEM tile footprint (last dim rounded up to 128
    lanes; Q/K/V/O double-buffered by the pipeline plus an f32 working-set
    allowance), rounded down to a sublane multiple, capped so the single
    "parallel" grid axis still splits >= min_steps ways (megacore) and so the
    fully-unrolled per-slab loop does not blow up code size.  The wrapper pads
    G up to a multiple of Gb, so no exact-divisor search is needed.
    """
    lane_f = _round_up(F, 128)
    per_row = 4 * 2 * lane_f * itemsize + 2 * lane_f * 4
    cap = int(vmem_budget_bytes // per_row) // sublane * sublane
    cap = max(sublane, min(cap, max_block_g))
    if G > min_steps * sublane:
        cap = min(cap, _round_up(-(-G // min_steps), sublane))
    return max(sublane, min(cap, _round_up(G, sublane)))


def scaled_dot_product_attention(Q, K, V, n_mask=None):
    """Pallas equivalent of ScaledDotProductAttention.forward (n_mask=None)."""
    assert n_mask is None, "mask path not implemented"  # TODO(synk): n_mask
    B, n_heads, len1, len2, d_k = Q.shape
    G = B * n_heads * len1
    F = len2 * d_k
    itemsize = Q.dtype.itemsize
    sublane = {4: 8, 2: 16, 1: 32}.get(itemsize, 8)

    # Lane-dense layout: (G, len2*d_k) — free (contiguous) reshapes in HBM.
    qf = Q.reshape(G, F)
    kf = K.reshape(G, F)
    vf = V.reshape(G, F)

    budget, vmem_limit = _vmem_budget_and_limit()
    Gb = _choose_block_g(G, F, itemsize, sublane, budget)
    G_pad = _round_up(G, Gb)
    if G_pad != G:
        pad = ((0, G_pad - G), (0, 0))
        qf = jnp.pad(qf, pad)
        kf = jnp.pad(kf, pad)
        vf = jnp.pad(vf, pad)
    grid = (G_pad // Gb,)

    kernel = functools.partial(
        _attn_kernel, scale=1.0 / math.sqrt(d_k), len2=len2, d_k=d_k,
        approx_recip=(itemsize < 4))

    spec = pl.BlockSpec((Gb, F), lambda g: (g, 0))
    # TODO(synk): if xprof shows exposed DMA at step boundaries, switch the
    # three input specs to pipeline_mode=pl.Buffered(3) (already budgeted for
    # in _choose_block_g) instead of shrinking the block.
    cost = pl.CostEstimate(
        flops=4 * G * len2 * len2 * d_k,
        transcendentals=G * len2 * len2,
        bytes_accessed=4 * G * F * itemsize)

    out = pl.pallas_call(
        kernel,
        out_shape=jax.ShapeDtypeStruct((G_pad, F), Q.dtype),
        grid_spec=pltpu.PrefetchScalarGridSpec(
            num_scalar_prefetch=0,
            grid=grid,
            in_specs=[spec, spec, spec],
            out_specs=spec),
        compiler_params=pltpu.CompilerParams(
            dimension_semantics=("parallel",),
            vmem_limit_bytes=vmem_limit),
        cost_estimate=cost,
    )(qf, kf, vf)

    if G_pad != G:
        out = out[:G]
    return out.reshape(B, n_heads, len1, len2, d_k)


def _reference(Q, K, V):
    d_k = Q.shape[-1]
    scores = jnp.einsum("bhlqd,bhlkd->bhlqk", Q, K) / jnp.sqrt(jnp.float32(d_k))
    attn = jax.nn.softmax(scores, axis=-1)
    return jnp.einsum("bhlqk,bhlkd->bhlqd", attn, V)


if __name__ == "__main__":
    # Small shapes consistent with the module: (B, n_heads, len1, len2, d_k)
    B, n_heads, len1, len2, d_k = 2, 4, 3, 8, 32
    shape = (B, n_heads, len1, len2, d_k)
    key = jax.random.PRNGKey(0)
    kq, kk, kv = jax.random.split(key, 3)
    Q = jax.random.normal(kq, shape, dtype=jnp.float32)
    K = jax.random.normal(kk, shape, dtype=jnp.float32)
    V = jax.random.normal(kv, shape, dtype=jnp.float32)

    # float32 path (exact reciprocal, f32 softmax).
    out = jax.block_until_ready(scaled_dot_product_attention(Q, K, V))
    ref = _reference(Q, K, V)
    assert out.shape == shape
    assert jnp.allclose(out, ref, atol=2e-3, rtol=2e-3), "f32 mismatch vs reference"

    # bf16 path (halved HBM traffic; f32 compute inside the kernel).
    Qb, Kb, Vb = (x.astype(jnp.bfloat16) for x in (Q, K, V))
    out_bf16 = jax.block_until_ready(scaled_dot_product_attention(Qb, Kb, Vb))
    ref_bf16 = _reference(Qb.astype(jnp.float32), Kb.astype(jnp.float32),
                          Vb.astype(jnp.float32))
    assert out_bf16.shape == shape
    assert jnp.allclose(out_bf16.astype(jnp.float32), ref_bf16,
                        atol=5e-2, rtol=5e-2), "bf16 mismatch vs reference"

    print("KERNEL_OK")
</pallas_src>

<mosaic_0001>
module attributes {stable_mosaic.version = 11 : i64} {
  func.func @_attn_kernel(%arg0: i32, %arg1: memref<16x256xf32, #tpu.memory_space<vmem>>, %arg2: memref<16x256xf32, #tpu.memory_space<vmem>>, %arg3: memref<16x256xf32, #tpu.memory_space<vmem>>, %arg4: memref<16x256xf32, #tpu.memory_space<vmem>>) attributes {dimension_semantics = [#tpu.dimension_semantics<parallel>], iteration_bounds = array<i64: 2>, scalar_prefetch = 0 : i64, scratch_operands = 0 : i64, tpu.core_type = #tpu.core_type<tc>, window_params = [{transform_indices = @transform_0, window_bounds = array<i64: 16, 256>}, {transform_indices = @transform_1, window_bounds = array<i64: 16, 256>}, {transform_indices = @transform_2, window_bounds = array<i64: 16, 256>}, {transform_indices = @transform_3, window_bounds = array<i64: 16, 256>}]} {
    %c0 = arith.constant 0 : index
    %c0_0 = arith.constant 0 : index
    %0 = vector.load %arg1[%c0, %c0_0] : memref<16x256xf32, #tpu.memory_space<vmem>>, vector<16x32xf32>
    %cst = arith.constant 0.176776692 : f32
    %1 = vector.broadcast %cst : f32 to vector<16x32xf32>
    %2 = arith.mulf %0, %1 : vector<16x32xf32>
    %c0_1 = arith.constant 0 : index
    %c0_2 = arith.constant 0 : index
    %3 = vector.load %arg2[%c0_1, %c0_2] : memref<16x256xf32, #tpu.memory_space<vmem>>, vector<16x32xf32>
    %4 = arith.mulf %2, %3 : vector<16x32xf32>
    %cst_3 = arith.constant dense<0.000000e+00> : vector<16xf32>
    %5 = vector.multi_reduction <add>, %4, %cst_3 [1] : vector<16x32xf32> to vector<16xf32>
    %6 = vector.shape_cast %5 : vector<16xf32> to vector<16x1xf32>
    %c0_4 = arith.constant 0 : index
    %c32 = arith.constant 32 : index
    %7 = vector.load %arg2[%c0_4, %c32] : memref<16x256xf32, #tpu.memory_space<vmem>>, vector<16x32xf32>
    %8 = arith.mulf %2, %7 : vector<16x32xf32>
    %cst_5 = arith.constant dense<0.000000e+00> : vector<16xf32>
    %9 = vector.multi_reduction <add>, %8, %cst_5 [1] : vector<16x32xf32> to vector<16xf32>
    %10 = vector.shape_cast %9 : vector<16xf32> to vector<16x1xf32>
    %c0_6 = arith.constant 0 : index
    %c64 = arith.constant 64 : index
    %11 = vector.load %arg2[%c0_6, %c64] : memref<16x256xf32, #tpu.memory_space<vmem>>, vector<16x32xf32>
    %12 = arith.mulf %2, %11 : vector<16x32xf32>
    %cst_7 = arith.constant dense<0.000000e+00> : vector<16xf32>
    %13 = vector.multi_reduction <add>, %12, %cst_7 [1] : vector<16x32xf32> to vector<16xf32>
    %14 = vector.shape_cast %13 : vector<16xf32> to vector<16x1xf32>
    %c0_8 = arith.constant 0 : index
    %c96 = arith.constant 96 : index
    %15 = vector.load %arg2[%c0_8, %c96] : memref<16x256xf32, #tpu.memory_space<vmem>>, vector<16x32xf32>
    %16 = arith.mulf %2, %15 : vector<16x32xf32>
    %cst_9 = arith.constant dense<0.000000e+00> : vector<16xf32>
    %17 = vector.multi_reduction <add>, %16, %cst_9 [1] : vector<16x32xf32> to vector<16xf32>
    %18 = vector.shape_cast %17 : vector<16xf32> to vector<16x1xf32>
    %c0_10 = arith.constant 0 : index
    %c128 = arith.constant 128 : index
    %19 = vector.load %arg2[%c0_10, %c128] : memref<16x256xf32, #tpu.memory_space<vmem>>, vector<16x32xf32>
    %20 = arith.mulf %2, %19 : vector<16x32xf32>
    %cst_11 = arith.constant dense<0.000000e+00> : vector<16xf32>
    %21 = vector.multi_reduction <add>, %20, %cst_11 [1] : vector<16x32xf32> to vector<16xf32>
    %22 = vector.shape_cast %21 : vector<16xf32> to vector<16x1xf32>
    %c0_12 = arith.constant 0 : index
    %c160 = arith.constant 160 : index
    %23 = vector.load %arg2[%c0_12, %c160] : memref<16x256xf32, #tpu.memory_space<vmem>>, vector<16x32xf32>
    %24 = arith.mulf %2, %23 : vector<16x32xf32>
    %cst_13 = arith.constant dense<0.000000e+00> : vector<16xf32>
    %25 = vector.multi_reduction <add>, %24, %cst_13 [1] : vector<16x32xf32> to vector<16xf32>
    %26 = vector.shape_cast %25 : vector<16xf32> to vector<16x1xf32>
    %c0_14 = arith.constant 0 : index
    %c192 = arith.constant 192 : index
    %27 = vector.load %arg2[%c0_14, %c192] : memref<16x256xf32, #tpu.memory_space<vmem>>, vector<16x32xf32>
    %28 = arith.mulf %2, %27 : vector<16x32xf32>
    %cst_15 = arith.constant dense<0.000000e+00> : vector<16xf32>
    %29 = vector.multi_reduction <add>, %28, %cst_15 [1] : vector<16x32xf32> to vector<16xf32>
    %30 = vector.shape_cast %29 : vector<16xf32> to vector<16x1xf32>
    %c0_16 = arith.constant 0 : index
    %c224 = arith.constant 224 : index
    %31 = vector.load %arg2[%c0_16, %c224] : memref<16x256xf32, #tpu.memory_space<vmem>>, vector<16x32xf32>
    %32 = arith.mulf %2, %31 : vector<16x32xf32>
    %cst_17 = arith.constant dense<0.000000e+00> : vector<16xf32>
    %33 = vector.multi_reduction <add>, %32, %cst_17 [1] : vector<16x32xf32> to vector<16xf32>
    %34 = vector.shape_cast %33 : vector<16xf32> to vector<16x1xf32>
    %35 = arith.maximumf %6, %10 : vector<16x1xf32>
    %36 = arith.maximumf %35, %14 : vector<16x1xf32>
    %37 = arith.maximumf %36, %18 : vector<16x1xf32>
    %38 = arith.maximumf %37, %22 : vector<16x1xf32>
    %39 = arith.maximumf %38, %26 : vector<16x1xf32>
    %40 = arith.maximumf %39, %30 : vector<16x1xf32>
    %41 = arith.maximumf %40, %34 : vector<16x1xf32>
    %42 = arith.subf %6, %41 : vector<16x1xf32>
    %43 = math.exp %42 : vector<16x1xf32>
    %44 = arith.subf %10, %41 : vector<16x1xf32>
    %45 = math.exp %44 : vector<16x1xf32>
    %46 = arith.subf %14, %41 : vector<16x1xf32>
    %47 = math.exp %46 : vector<16x1xf32>
    %48 = arith.subf %18, %41 : vector<16x1xf32>
    %49 = math.exp %48 : vector<16x1xf32>
    %50 = arith.subf %22, %41 : vector<16x1xf32>
    %51 = math.exp %50 : vector<16x1xf32>
    %52 = arith.subf %26, %41 : vector<16x1xf32>
    %53 = math.exp %52 : vector<16x1xf32>
    %54 = arith.subf %30, %41 : vector<16x1xf32>
    %55 = math.exp %54 : vector<16x1xf32>
    %56 = arith.subf %34, %41 : vector<16x1xf32>
    %57 = math.exp %56 : vector<16x1xf32>
    %58 = arith.addf %43, %45 : vector<16x1xf32>
    %59 = arith.addf %58, %47 : vector<16x1xf32>
    %60 = arith.addf %59, %49 : vector<16x1xf32>
    %61 = arith.addf %60, %51 : vector<16x1xf32>
    %62 = arith.addf %61, %53 : vector<16x1xf32>
    %63 = arith.addf %62, %55 : vector<16x1xf32>
    %64 = arith.addf %63, %57 : vector<16x1xf32>
    %c0_18 = arith.constant 0 : index
    %c0_19 = arith.constant 0 : index
    %65 = vector.load %arg3[%c0_18, %c0_19] : memref<16x256xf32, #tpu.memory_space<vmem>>, vector<16x32xf32>
    %66 = vector.broadcast %43 : vector<16x1xf32> to vector<16x32xf32>
    %67 = arith.mulf %66, %65 : vector<16x32xf32>
    %c0_20 = arith.constant 0 : index
    %c32_21 = arith.constant 32 : index
    %68 = vector.load %arg3[%c0_20, %c32_21] : memref<16x256xf32, #tpu.memory_space<vmem>>, vector<16x32xf32>
    %69 = vector.broadcast %45 : vector<16x1xf32> to vector<16x32xf32>
    %70 = arith.mulf %69, %68 : vector<16x32xf32>
    %71 = arith.addf %67, %70 : vector<16x32xf32>
    %c0_22 = arith.constant 0 : index
    %c64_23 = arith.constant 64 : index
    %72 = vector.load %arg3[%c0_22, %c64_23] : memref<16x256xf32, #tpu.memory_space<vmem>>, vector<16x32xf32>
    %73 = vector.broadcast %47 : vector<16x1xf32> to vector<16x32xf32>
    %74 = arith.mulf %73, %72 : vector<16x32xf32>
    %75 = arith.addf %71, %74 : vector<16x32xf32>
    %c0_24 = arith.constant 0 : index
    %c96_25 = arith.constant 96 : index
    %76 = vector.load %arg3[%c0_24, %c96_25] : memref<16x256xf32, #tpu.memory_space<vmem>>, vector<16x32xf32>
    %77 = vector.broadcast %49 : vector<16x1xf32> to vector<16x32xf32>
    %78 = arith.mulf %77, %76 : vector<16x32xf32>
    %79 = arith.addf %75, %78 : vector<16x32xf32>
    %c0_26 = arith.constant 0 : index
    %c128_27 = arith.constant 128 : index
    %80 = vector.load %arg3[%c0_26, %c128_27] : memref<16x256xf32, #tpu.memory_space<vmem>>, vector<16x32xf32>
    %81 = vector.broadcast %51 : vector<16x1xf32> to vector<16x32xf32>
    %82 = arith.mulf %81, %80 : vector<16x32xf32>
    %83 = arith.addf %79, %82 : vector<16x32xf32>
    %c0_28 = arith.constant 0 : index
    %c160_29 = arith.constant 160 : index
    %84 = vector.load %arg3[%c0_28, %c160_29] : memref<16x256xf32, #tpu.memory_space<vmem>>, vector<16x32xf32>
    %85 = vector.broadcast %53 : vector<16x1xf32> to vector<16x32xf32>
    %86 = arith.mulf %85, %84 : vector<16x32xf32>
    %87 = arith.addf %83, %86 : vector<16x32xf32>
    %c0_30 = arith.constant 0 : index
    %c192_31 = arith.constant 192 : index
    %88 = vector.load %arg3[%c0_30, %c192_31] : memref<16x256xf32, #tpu.memory_space<vmem>>, vector<16x32xf32>
    %89 = vector.broadcast %55 : vector<16x1xf32> to vector<16x32xf32>
    %90 = arith.mulf %89, %88 : vector<16x32xf32>
    %91 = arith.addf %87, %90 : vector<16x32xf32>
    %c0_32 = arith.constant 0 : index
    %c224_33 = arith.constant 224 : index
    %92 = vector.load %arg3[%c0_32, %c224_33] : memref<16x256xf32, #tpu.memory_space<vmem>>, vector<16x32xf32>
    %93 = vector.broadcast %57 : vector<16x1xf32> to vector<16x32xf32>
    %94 = arith.mulf %93, %92 : vector<16x32xf32>
    %95 = arith.addf %91, %94 : vector<16x32xf32>
    %96 = tpu.reciprocal %64 : vector<16x1xf32> -> vector<16x1xf32>
    %97 = vector.broadcast %96 : vector<16x1xf32> to vector<16x32xf32>
    %98 = arith.mulf %95, %97 : vector<16x32xf32>
    %c0_34 = arith.constant 0 : index
    %c0_35 = arith.constant 0 : index
    %99 = vector.load %arg4[%c0_34, %c0_35] : memref<16x256xf32, #tpu.memory_space<vmem>>, vector<16x32xf32>
    tpu.vector_store %arg4[%c0_34, %c0_35], %98 {strides = array<i32>} : memref<16x256xf32, #tpu.memory_space<vmem>>, vector<16x32xf32>,
    %c0_36 = arith.constant 0 : index
    %c32_37 = arith.constant 32 : index
    %100 = vector.load %arg1[%c0_36, %c32_37] : memref<16x256xf32, #tpu.memory_space<vmem>>, vector<16x32xf32>
    %cst_38 = arith.constant 0.176776692 : f32
    %101 = vector.broadcast %cst_38 : f32 to vector<16x32xf32>
    %102 = arith.mulf %100, %101 : vector<16x32xf32>
    %c0_39 = arith.constant 0 : index
    %c0_40 = arith.constant 0 : index
    %103 = vector.load %arg2[%c0_39, %c0_40] : memref<16x256xf32, #tpu.memory_space<vmem>>, vector<16x32xf32>
    %104 = arith.mulf %102, %103 : vector<16x32xf32>
    %cst_41 = arith.constant dense<0.000000e+00> : vector<16xf32>
    %105 = vector.multi_reduction <add>, %104, %cst_41 [1] : vector<16x32xf32> to vector<16xf32>
    %106 = vector.shape_cast %105 : vector<16xf32> to vector<16x1xf32>
    %c0_42 = arith.constant 0 : index
    %c32_43 = arith.constant 32 : index
    %107 = vector.load %arg2[%c0_42, %c32_43] : memref<16x256xf32, #tpu.memory_space<vmem>>, vector<16x32xf32>
    %108 = arith.mulf %102, %107 : vector<16x32xf32>
    %cst_44 = arith.constant dense<0.000000e+00> : vector<16xf32>
    %109 = vector.multi_reduction <add>, %108, %cst_44 [1] : vector<16x32xf32> to vector<16xf32>
    %110 = vector.shape_cast %109 : vector<16xf32> to vector<16x1xf32>
    %c0_45 = arith.constant 0 : index
    %c64_46 = arith.constant 64 : index
    %111 = vector.load %arg2[%c0_45, %c64_46] : memref<16x256xf32, #tpu.memory_space<vmem>>, vector<16x32xf32>
    %112 = arith.mulf %102, %111 : vector<16x32xf32>
    %cst_47 = arith.constant dense<0.000000e+00> : vector<16xf32>
    %113 = vector.multi_reduction <add>, %112, %cst_47 [1] : vector<16x32xf32> to vector<16xf32>
    %114 = vector.shape_cast %113 : vector<16xf32> to vector<16x1xf32>
    %c0_48 = arith.constant 0 : index
    %c96_49 = arith.constant 96 : index
    %115 = vector.load %arg2[%c0_48, %c96_49] : memref<16x256xf32, #tpu.memory_space<vmem>>, vector<16x32xf32>
    %116 = arith.mulf %102, %115 : vector<16x32xf32>
    %cst_50 = arith.constant dense<0.000000e+00> : vector<16xf32>
    %117 = vector.multi_reduction <add>, %116, %cst_50 [1] : vector<16x32xf32> to vector<16xf32>
    %118 = vector.shape_cast %117 : vector<16xf32> to vector<16x1xf32>
    %c0_51 = arith.constant 0 : index
    %c128_52 = arith.constant 128 : index
    %119 = vector.load %arg2[%c0_51, %c128_52] : memref<16x256xf32, #tpu.memory_space<vmem>>, vector<16x32xf32>
    %120 = arith.mulf %102, %119 : vector<16x32xf32>
    %cst_53 = arith.constant dense<0.000000e+00> : vector<16xf32>
    %121 = vector.multi_reduction <add>, %120, %cst_53 [1] : vector<16x32xf32> to vector<16xf32>
    %122 = vector.shape_cast %121 : vector<16xf32> to vector<16x1xf32>
    %c0_54 = arith.constant 0 : index
    %c160_55 = arith.constant 160 : index
    %123 = vector.load %arg2[%c0_54, %c160_55] : memref<16x256xf32, #tpu.memory_space<vmem>>, vector<16x32xf32>
    %124 = arith.mulf %102, %123 : vector<16x32xf32>
    %cst_56 = arith.constant dense<0.000000e+00> : vector<16xf32>
    %125 = vector.multi_reduction <add>, %124, %cst_56 [1] : vector<16x32xf32> to vector<16xf32>
    %126 = vector.shape_cast %125 : vector<16xf32> to vector<16x1xf32>
    %c0_57 = arith.constant 0 : index
    %c192_58 = arith.constant 192 : index
    %127 = vector.load %arg2[%c0_57, %c192_58] : memref<16x256xf32, #tpu.memory_space<vmem>>, vector<16x32xf32>
    %128 = arith.mulf %102, %127 : vector<16x32xf32>
    %cst_59 = arith.constant dense<0.000000e+00> : vector<16xf32>
    %129 = vector.multi_reduction <add>, %128, %cst_59 [1] : vector<16x32xf32> to vector<16xf32>
    %130 = vector.shape_cast %129 : vector<16xf32> to vector<16x1xf32>
    %c0_60 = arith.constant 0 : index
    %c224_61 = arith.constant 224 : index
    %131 = vector.load %arg2[%c0_60, %c224_61] : memref<16x256xf32, #tpu.memory_space<vmem>>, vector<16x32xf32>
    %132 = arith.mulf %102, %131 : vector<16x32xf32>
    %cst_62 = arith.constant dense<0.000000e+00> : vector<16xf32>
    %133 = vector.multi_reduction <add>, %132, %cst_62 [1] : vector<16x32xf32> to vector<16xf32>
    %134 = vector.shape_cast %133 : vector<16xf32> to vector<16x1xf32>
    %135 = arith.maximumf %106, %110 : vector<16x1xf32>
    %136 = arith.maximumf %135, %114 : vector<16x1xf32>
    %137 = arith.maximumf %136, %118 : vector<16x1xf32>
    %138 = arith.maximumf %137, %122 : vector<16x1xf32>
    %139 = arith.maximumf %138, %126 : vector<16x1xf32>
    %140 = arith.maximumf %139, %130 : vector<16x1xf32>
    %141 = arith.maximumf %140, %134 : vector<16x1xf32>
    %142 = arith.subf %106, %141 : vector<16x1xf32>
    %143 = math.exp %142 : vector<16x1xf32>
    %144 = arith.subf %110, %141 : vector<16x1xf32>
    %145 = math.exp %144 : vector<16x1xf32>
    %146 = arith.subf %114, %141 : vector<16x1xf32>
    %147 = math.exp %146 : vector<16x1xf32>
    %148 = arith.subf %118, %141 : vector<16x1xf32>
    %149 = math.exp %148 : vector<16x1xf32>
    %150 = arith.subf %122, %141 : vector<16x1xf32>
    %151 = math.exp %150 : vector<16x1xf32>
    %152 = arith.subf %126, %141 : vector<16x1xf32>
    %153 = math.exp %152 : vector<16x1xf32>
    %154 = arith.subf %130, %141 : vector<16x1xf32>
    %155 = math.exp %154 : vector<16x1xf32>
    %156 = arith.subf %134, %141 : vector<16x1xf32>
    %157 = math.exp %156 : vector<16x1xf32>
    %158 = arith.addf %143, %145 : vector<16x1xf32>
    %159 = arith.addf %158, %147 : vector<16x1xf32>
    %160 = arith.addf %159, %149 : vector<16x1xf32>
    %161 = arith.addf %160, %151 : vector<16x1xf32>
    %162 = arith.addf %161, %153 : vector<16x1xf32>
    %163 = arith.addf %162, %155 : vector<16x1xf32>
    %164 = arith.addf %163, %157 : vector<16x1xf32>
    %c0_63 = arith.constant 0 : index
    %c0_64 = arith.constant 0 : index
    %165 = vector.load %arg3[%c0_63, %c0_64] : memref<16x256xf32, #tpu.memory_space<vmem>>, vector<16x32xf32>
    %166 = vector.broadcast %143 : vector<16x1xf32> to vector<16x32xf32>
    %167 = arith.mulf %166, %165 : vector<16x32xf32>
    %c0_65 = arith.constant 0 : index
    %c32_66 = arith.constant 32 : index
    %168 = vector.load %arg3[%c0_65, %c32_66] : memref<16x256xf32, #tpu.memory_space<vmem>>, vector<16x32xf32>
    %169 = vector.broadcast %145 : vector<16x1xf32> to vector<16x32xf32>
    %170 = arith.mulf %169, %168 : vector<16x32xf32>
    %171 = arith.addf %167, %170 : vector<16x32xf32>
    %c0_67 = arith.constant 0 : index
    %c64_68 = arith.constant 64 : index
    %172 = vector.load %arg3[%c0_67, %c64_68] : memref<16x256xf32, #tpu.memory_space<vmem>>, vector<16x32xf32>
    %173 = vector.broadcast %147 : vector<16x1xf32> to vector<16x32xf32>
    %174 = arith.mulf %173, %172 : vector<16x32xf32>
    %175 = arith.addf %171, %174 : vector<16x32xf32>
    %c0_69 = arith.constant 0 : index
    %c96_70 = arith.constant 96 : index
    %176 = vector.load %arg3[%c0_69, %c96_70] : memref<16x256xf32, #tpu.memory_space<vmem>>, vector<16x32xf32>
    %177 = vector.broadcast %149 : vector<16x1xf32> to vector<16x32xf32>
    %178 = arith.mulf %177, %176 : vector<16x32xf32>
    %179 = arith.addf %175, %178 : vector<16x32xf32>
    %c0_71 = arith.constant 0 : index
    %c128_72 = arith.constant 128 : index
    %180 = vector.load %arg3[%c0_71, %c128_72] : memref<16x256xf32, #tpu.memory_space<vmem>>, vector<16x32xf32>
    %181 = vector.broadcast %151 : vector<16x1xf32> to vector<16x32xf32>
    %182 = arith.mulf %181, %180 : vector<16x32xf32>
    %183 = arith.addf %179, %182 : vector<16x32xf32>
    %c0_73 = arith.constant 0 : index
    %c160_74 = arith.constant 160 : index
    %184 = vector.load %arg3[%c0_73, %c160_74] : memref<16x256xf32, #tpu.memory_space<vmem>>, vector<16x32xf32>
    %185 = vector.broadcast %153 : vector<16x1xf32> to vector<16x32xf32>
    %186 = arith.mulf %185, %184 : vector<16x32xf32>
    %187 = arith.addf %183, %186 : vector<16x32xf32>
    %c0_75 = arith.constant 0 : index
    %c192_76 = arith.constant 192 : index
    %188 = vector.load %arg3[%c0_75, %c192_76] : memref<16x256xf32, #tpu.memory_space<vmem>>, vector<16x32xf32>
    %189 = vector.broadcast %155 : vector<16x1xf32> to vector<16x32xf32>
    %190 = arith.mulf %189, %188 : vector<16x32xf32>
    %191 = arith.addf %187, %190 : vector<16x32xf32>
    %c0_77 = arith.constant 0 : index
    %c224_78 = arith.constant 224 : index
    %192 = vector.load %arg3[%c0_77, %c224_78] : memref<16x256xf32, #tpu.memory_space<vmem>>, vector<16x32xf32>
    %193 = vector.broadcast %157 : vector<16x1xf32> to vector<16x32xf32>
    %194 = arith.mulf %193, %192 : vector<16x32xf32>
    %195 = arith.addf %191, %194 : vector<16x32xf32>
    %196 = tpu.reciprocal %164 : vector<16x1xf32> -> vector<16x1xf32>
    %197 = vector.broadcast %196 : vector<16x1xf32> to vector<16x32xf32>
    %198 = arith.mulf %195, %197 : vector<16x32xf32>
    %c0_79 = arith.constant 0 : index
    %c32_80 = arith.constant 32 : index
    %199 = vector.load %arg4[%c0_79, %c32_80] : memref<16x256xf32, #tpu.memory_space<vmem>>, vector<16x32xf32>
    tpu.vector_store %arg4[%c0_79, %c32_80], %198 {strides = array<i32>} : memref<16x256xf32, #tpu.memory_space<vmem>>, vector<16x32xf32>,
    %c0_81 = arith.constant 0 : index
    %c64_82 = arith.constant 64 : index
    %200 = vector.load %arg1[%c0_81, %c64_82] : memref<16x256xf32, #tpu.memory_space<vmem>>, vector<16x32xf32>
    %cst_83 = arith.constant 0.176776692 : f32
    %201 = vector.broadcast %cst_83 : f32 to vector<16x32xf32>
    %202 = arith.mulf %200, %201 : vector<16x32xf32>
    %c0_84 = arith.constant 0 : index
    %c0_85 = arith.constant 0 : index
    %203 = vector.load %arg2[%c0_84, %c0_85] : memref<16x256xf32, #tpu.memory_space<vmem>>, vector<16x32xf32>
    %204 = arith.mulf %202, %203 : vector<16x32xf32>
    %cst_86 = arith.constant dense<0.000000e+00> : vector<16xf32>
    %205 = vector.multi_reduction <add>, %204, %cst_86 [1] : vector<16x32xf32> to vector<16xf32>
    %206 = vector.shape_cast %205 : vector<16xf32> to vector<16x1xf32>
    %c0_87 = arith.constant 0 : index
    %c32_88 = arith.constant 32 : index
    %207 = vector.load %arg2[%c0_87, %c32_88] : memref<16x256xf32, #tpu.memory_space<vmem>>, vector<16x32xf32>
    %208 = arith.mulf %202, %207 : vector<16x32xf32>
    %cst_89 = arith.constant dense<0.000000e+00> : vector<16xf32>
    %209 = vector.multi_reduction <add>, %208, %cst_89 [1] : vector<16x32xf32> to vector<16xf32>
    %210 = vector.shape_cast %209 : vector<16xf32> to vector<16x1xf32>
    %c0_90 = arith.constant 0 : index
    %c64_91 = arith.constant 64 : index
    %211 = vector.load %arg2[%c0_90, %c64_91] : memref<16x256xf32, #tpu.memory_space<vmem>>, vector<16x32xf32>
    %212 = arith.mulf %202, %211 : vector<16x32xf32>
    %cst_92 = arith.constant dense<0.000000e+00> : vector<16xf32>
    %213 = vector.multi_reduction <add>, %212, %cst_92 [1] : vector<16x32xf32> to vector<16xf32>
    %214 = vector.shape_cast %213 : vector<16xf32> to vector<16x1xf32>
    %c0_93 = arith.constant 0 : index
    %c96_94 = arith.constant 96 : index
    %215 = vector.load %arg2[%c0_93, %c96_94] : memref<16x256xf32, #tpu.memory_space<vmem>>, vector<16x32xf32>
    %216 = arith.mulf %202, %215 : vector<16x32xf32>
    %cst_95 = arith.constant dense<0.000000e+00> : vector<16xf32>
    %217 = vector.multi_reduction <add>, %216, %cst_95 [1] : vector<16x32xf32> to vector<16xf32>
    %218 = vector.shape_cast %217 : vector<16xf32> to vector<16x1xf32>
    %c0_96 = arith.constant 0 : index
    %c128_97 = arith.constant 128 : index
    %219 = vector.load %arg2[%c0_96, %c128_97] : memref<16x256xf32, #tpu.memory_space<vmem>>, vector<16x32xf32>
    %220 = arith.mulf %202, %219 : vector<16x32xf32>
    %cst_98 = arith.constant dense<0.000000e+00> : vector<16xf32>
    %221 = vector.multi_reduction <add>, %220, %cst_98 [1] : vector<16x32xf32> to vector<16xf32>
    %222 = vector.shape_cast %221 : vector<16xf32> to vector<16x1xf32>
    %c0_99 = arith.constant 0 : index
    %c160_100 = arith.constant 160 : index
    %223 = vector.load %arg2[%c0_99, %c160_100] : memref<16x256xf32, #tpu.memory_space<vmem>>, vector<16x32xf32>
    %224 = arith.mulf %202, %223 : vector<16x32xf32>
    %cst_101 = arith.constant dense<0.000000e+00> : vector<16xf32>
    %225 = vector.multi_reduction <add>, %224, %cst_101 [1] : vector<16x32xf32> to vector<16xf32>
    %226 = vector.shape_cast %225 : vector<16xf32> to vector<16x1xf32>
    %c0_102 = arith.constant 0 : index
    %c192_103 = arith.constant 192 : index
    %227 = vector.load %arg2[%c0_102, %c192_103] : memref<16x256xf32, #tpu.memory_space<vmem>>, vector<16x32xf32>
    %228 = arith.mulf %202, %227 : vector<16x32xf32>
    %cst_104 = arith.constant dense<0.000000e+00> : vector<16xf32>
    %229 = vector.multi_reduction <add>, %228, %cst_104 [1] : vector<16x32xf32> to vector<16xf32>
    %230 = vector.shape_cast %229 : vector<16xf32> to vector<16x1xf32>
    %c0_105 = arith.constant 0 : index
    %c224_106 = arith.constant 224 : index
    %231 = vector.load %arg2[%c0_105, %c224_106] : memref<16x256xf32, #tpu.memory_space<vmem>>, vector<16x32xf32>
    %232 = arith.mulf %202, %231 : vector<16x32xf32>
    %cst_107 = arith.constant dense<0.000000e+00> : vector<16xf32>
    %233 = vector.multi_reduction <add>, %232, %cst_107 [1] : vector<16x32xf32> to vector<16xf32>
    %234 = vector.shape_cast %233 : vector<16xf32> to vector<16x1xf32>
    %235 = arith.maximumf %206, %210 : vector<16x1xf32>
    %236 = arith.maximumf %235, %214 : vector<16x1xf32>
    %237 = arith.maximumf %236, %218 : vector<16x1xf32>
    %238 = arith.maximumf %237, %222 : vector<16x1xf32>
    %239 = arith.maximumf %238, %226 : vector<16x1xf32>
    %240 = arith.maximumf %239, %230 : vector<16x1xf32>
    %241 = arith.maximumf %240, %234 : vector<16x1xf32>
    %242 = arith.subf %206, %241 : vector<16x1xf32>
    %243 = math.exp %242 : vector<16x1xf32>
    %244 = arith.subf %210, %241 : vector<16x1xf32>
    %245 = math.exp %244 : vector<16x1xf32>
    %246 = arith.subf %214, %241 : vector<16x1xf32>
    %247 = math.exp %246 : vector<16x1xf32>
    %248 = arith.subf %218, %241 : vector<16x1xf32>
    %249 = math.exp %248 : vector<16x1xf32>
    %250 = arith.subf %222, %241 : vector<16x1xf32>
    %251 = math.exp %250 : vector<16x1xf32>
    %252 = arith.subf %226, %241 : vector<16x1xf32>
    %253 = math.exp %252 : vector<16x1xf32>
    %254 = arith.subf %230, %241 : vector<16x1xf32>
    %255 = math.exp %254 : vector<16x1xf32>
    %256 = arith.subf %234, %241 : vector<16x1xf32>
    %257 = math.exp %256 : vector<16x1xf32>
    %258 = arith.addf %243, %245 : vector<16x1xf32>
    %259 = arith.addf %258, %247 : vector<16x1xf32>
    %260 = arith.addf %259, %249 : vector<16x1xf32>
    %261 = arith.addf %260, %251 : vector<16x1xf32>
    %262 = arith.addf %261, %253 : vector<16x1xf32>
    %263 = arith.addf %262, %255 : vector<16x1xf32>
    %264 = arith.addf %263, %257 : vector<16x1xf32>
    %c0_108 = arith.constant 0 : index
    %c0_109 = arith.constant 0 : index
    %265 = vector.load %arg3[%c0_108, %c0_109] : memref<16x256xf32, #tpu.memory_space<vmem>>, vector<16x32xf32>
    %266 = vector.broadcast %243 : vector<16x1xf32> to vector<16x32xf32>
    %267 = arith.mulf %266, %265 : vector<16x32xf32>
    %c0_110 = arith.constant 0 : index
    %c32_111 = arith.constant 32 : index
    %268 = vector.load %arg3[%c0_110, %c32_111] : memref<16x256xf32, #tpu.memory_space<vmem>>, vector<16x32xf32>
    %269 = vector.broadcast %245 : vector<16x1xf32> to vector<16x32xf32>
    %270 = arith.mulf %269, %268 : vector<16x32xf32>
    %271 = arith.addf %267, %270 : vector<16x32xf32>
    %c0_112 = arith.constant 0 : index
    %c64_113 = arith.constant 64 : index
    %272 = vector.load %arg3[%c0_112, %c64_113] : memref<16x256xf32, #tpu.memory_space<vmem>>, vector<16x32xf32>
    %273 = vector.broadcast %247 : vector<16x1xf32> to vector<16x32xf32>
    %274 = arith.mulf %273, %272 : vector<16x32xf32>
    %275 = arith.addf %271, %274 : vector<16x32xf32>
    %c0_114 = arith.constant 0 : index
    %c96_115 = arith.constant 96 : index
    %276 = vector.load %arg3[%c0_114, %c96_115] : memref<16x256xf32, #tpu.memory_space<vmem>>, vector<16x32xf32>
    %277 = vector.broadcast %249 : vector<16x1xf32> to vector<16x32xf32>
    %278 = arith.mulf %277, %276 : vector<16x32xf32>
    %279 = arith.addf %275, %278 : vector<16x32xf32>
    %c0_116 = arith.constant 0 : index
    %c128_117 = arith.constant 128 : index
    %280 = vector.load %arg3[%c0_116, %c128_117] : memref<16x256xf32, #tpu.memory_space<vmem>>, vector<16x32xf32>
    %281 = vector.broadcast %251 : vector<16x1xf32> to vector<16x32xf32>
    %282 = arith.mulf %281, %280 : vector<16x32xf32>
    %283 = arith.addf %279, %282 : vector<16x32xf32>
    %c0_118 = arith.constant 0 : index
    %c160_119 = arith.constant 160 : index
    %284 = vector.load %arg3[%c0_118, %c160_119] : memref<16x256xf32, #tpu.memory_space<vmem>>, vector<16x32xf32>
    %285 = vector.broadcast %253 : vector<16x1xf32> to vector<16x32xf32>
    %286 = arith.mulf %285, %284 : vector<16x32xf32>
    %287 = arith.addf %283, %286 : vector<16x32xf32>
    %c0_120 = arith.constant 0 : index
    %c192_121 = arith.constant 192 : index
    %288 = vector.load %arg3[%c0_120, %c192_121] : memref<16x256xf32, #tpu.memory_space<vmem>>, vector<16x32xf32>
    %289 = vector.broadcast %255 : vector<16x1xf32> to vector<16x32xf32>
    %290 = arith.mulf %289, %288 : vector<16x32xf32>
    %291 = arith.addf %287, %290 : vector<16x32xf32>
    %c0_122 = arith.constant 0 : index
    %c224_123 = arith.constant 224 : index
    %292 = vector.load %arg3[%c0_122, %c224_123] : memref<16x256xf32, #tpu.memory_space<vmem>>, vector<16x32xf32>
    %293 = vector.broadcast %257 : vector<16x1xf32> to vector<16x32xf32>
    %294 = arith.mulf %293, %292 : vector<16x32xf32>
    %295 = arith.addf %291, %294 : vector<16x32xf32>
    %296 = tpu.reciprocal %264 : vector<16x1xf32> -> vector<16x1xf32>
    %297 = vector.broadcast %296 : vector<16x1xf32> to vector<16x32xf32>
    %298 = arith.mulf %295, %297 : vector<16x32xf32>
    %c0_124 = arith.constant 0 : index
    %c64_125 = arith.constant 64 : index
    %299 = vector.load %arg4[%c0_124, %c64_125] : memref<16x256xf32, #tpu.memory_space<vmem>>, vector<16x32xf32>
    tpu.vector_store %arg4[%c0_124, %c64_125], %298 {strides = array<i32>} : memref<16x256xf32, #tpu.memory_space<vmem>>, vector<16x32xf32>,
    %c0_126 = arith.constant 0 : index
    %c96_127 = arith.constant 96 : index
    %300 = vector.load %arg1[%c0_126, %c96_127] : memref<16x256xf32, #tpu.memory_space<vmem>>, vector<16x32xf32>
    %cst_128 = arith.constant 0.176776692 : f32
    %301 = vector.broadcast %cst_128 : f32 to vector<16x32xf32>
    %302 = arith.mulf %300, %301 : vector<16x32xf32>
    %c0_129 = arith.constant 0 : index
    %c0_130 = arith.constant 0 : index
    %303 = vector.load %arg2[%c0_129, %c0_130] : memref<16x256xf32, #tpu.memory_space<vmem>>, vector<16x32xf32>
    %304 = arith.mulf %302, %303 : vector<16x32xf32>
    %cst_131 = arith.constant dense<0.000000e+00> : vector<16xf32>
    %305 = vector.multi_reduction <add>, %304, %cst_131 [1] : vector<16x32xf32> to vector<16xf32>
    %306 = vector.shape_cast %305 : vector<16xf32> to vector<16x1xf32>
    %c0_132 = arith.constant 0 : index
    %c32_133 = arith.constant 32 : index
    %307 = vector.load %arg2[%c0_132, %c32_133] : memref<16x256xf32, #tpu.memory_space<vmem>>, vector<16x32xf32>
    %308 = arith.mulf %302, %307 : vector<16x32xf32>
    %cst_134 = arith.constant dense<0.000000e+00> : vector<16xf32>
    %309 = vector.multi_reduction <add>, %308, %cst_134 [1] : vector<16x32xf32> to vector<16xf32>
    %310 = vector.shape_cast %309 : vector<16xf32> to vector<16x1xf32>
    %c0_135 = arith.constant 0 : index
    %c64_136 = arith.constant 64 : index
    %311 = vector.load %arg2[%c0_135, %c64_136] : memref<16x256xf32, #tpu.memory_space<vmem>>, vector<16x32xf32>
    %312 = arith.mulf %302, %311 : vector<16x32xf32>
    %cst_137 = arith.constant dense<0.000000e+00> : vector<16xf32>
    %313 = vector.multi_reduction <add>, %312, %cst_137 [1] : vector<16x32xf32> to vector<16xf32>
    %314 = vector.shape_cast %313 : vector<16xf32> to vector<16x1xf32>
    %c0_138 = arith.constant 0 : index
    %c96_139 = arith.constant 96 : index
    %315 = vector.load %arg2[%c0_138, %c96_139] : memref<16x256xf32, #tpu.memory_space<vmem>>, vector<16x32xf32>
    %316 = arith.mulf %302, %315 : vector<16x32xf32>
    %cst_140 = arith.constant dense<0.000000e+00> : vector<16xf32>
    %317 = vector.multi_reduction <add>, %316, %cst_140 [1] : vector<16x32xf32> to vector<16xf32>
    %318 = vector.shape_cast %317 : vector<16xf32> to vector<16x1xf32>
    %c0_141 = arith.constant 0 : index
    %c128_142 = arith.constant 128 : index
    %319 = vector.load %arg2[%c0_141, %c128_142] : memref<16x256xf32, #tpu.memory_space<vmem>>, vector<16x32xf32>
    %320 = arith.mulf %302, %319 : vector<16x32xf32>
    %cst_143 = arith.constant dense<0.000000e+00> : vector<16xf32>
    %321 = vector.multi_reduction <add>, %320, %cst_143 [1] : vector<16x32xf32> to vector<16xf32>
    %322 = vector.shape_cast %321 : vector<16xf32> to vector<16x1xf32>
    %c0_144 = arith.constant 0 : index
    %c160_145 = arith.constant 160 : index
    %323 = vector.load %arg2[%c0_144, %c160_145] : memref<16x256xf32, #tpu.memory_space<vmem>>, vector<16x32xf32>
    %324 = arith.mulf %302, %323 : vector<16x32xf32>
    %cst_146 = arith.constant dense<0.000000e+00> : vector<16xf32>
    %325 = vector.multi_reduction <add>, %324, %cst_146 [1] : vector<16x32xf32> to vector<16xf32>
    %326 = vector.shape_cast %325 : vector<16xf32> to vector<16x1xf32>
    %c0_147 = arith.constant 0 : index
    %c192_148 = arith.constant 192 : index
    %327 = vector.load %arg2[%c0_147, %c192_148] : memref<16x256xf32, #tpu.memory_space<vmem>>, vector<16x32xf32>
    %328 = arith.mulf %302, %327 : vector<16x32xf32>
    %cst_149 = arith.constant dense<0.000000e+00> : vector<16xf32>
    %329 = vector.multi_reduction <add>, %328, %cst_149 [1] : vector<16x32xf32> to vector<16xf32>
    %330 = vector.shape_cast %329 : vector<16xf32> to vector<16x1xf32>
    %c0_150 = arith.constant 0 : index
    %c224_151 = arith.constant 224 : index
    %331 = vector.load %arg2[%c0_150, %c224_151] : memref<16x256xf32, #tpu.memory_space<vmem>>, vector<16x32xf32>
    %332 = arith.mulf %302, %331 : vector<16x32xf32>
    %cst_152 = arith.constant dense<0.000000e+00> : vector<16xf32>
    %333 = vector.multi_reduction <add>, %332, %cst_152 [1] : vector<16x32xf32> to vector<16xf32>
    %334 = vector.shape_cast %333 : vector<16xf32> to vector<16x1xf32>
    %335 = arith.maximumf %306, %310 : vector<16x1xf32>
    %336 = arith.maximumf %335, %314 : vector<16x1xf32>
    %337 = arith.maximumf %336, %318 : vector<16x1xf32>
    %338 = arith.maximumf %337, %322 : vector<16x1xf32>
    %339 = arith.maximumf %338, %326 : vector<16x1xf32>
    %340 = arith.maximumf %339, %330 : vector<16x1xf32>
    %341 = arith.maximumf %340, %334 : vector<16x1xf32>
    %342 = arith.subf %306, %341 : vector<16x1xf32>
    %343 = math.exp %342 : vector<16x1xf32>
    %344 = arith.subf %310, %341 : vector<16x1xf32>
    %345 = math.exp %344 : vector<16x1xf32>
    %346 = arith.subf %314, %341 : vector<16x1xf32>
    %347 = math.exp %346 : vector<16x1xf32>
    %348 = arith.subf %318, %341 : vector<16x1xf32>
    %349 = math.exp %348 : vector<16x1xf32>
    %350 = arith.subf %322, %341 : vector<16x1xf32>
    %351 = math.exp %350 : vector<16x1xf32>
    %352 = arith.subf %326, %341 : vector<16x1xf32>
    %353 = math.exp %352 : vector<16x1xf32>
    %354 = arith.subf %330, %341 : vector<16x1xf32>
    %355 = math.exp %354 : vector<16x1xf32>
    %356 = arith.subf %334, %341 : vector<16x1xf32>
    %357 = math.exp %356 : vector<16x1xf32>
    %358 = arith.addf %343, %345 : vector<16x1xf32>
    %359 = arith.addf %358, %347 : vector<16x1xf32>
    %360 = arith.addf %359, %349 : vector<16x1xf32>
    %361 = arith.addf %360, %351 : vector<16x1xf32>
    %362 = arith.addf %361, %353 : vector<16x1xf32>
    %363 = arith.addf %362, %355 : vector<16x1xf32>
    %364 = arith.addf %363, %357 : vector<16x1xf32>
    %c0_153 = arith.constant 0 : index
    %c0_154 = arith.constant 0 : index
    %365 = vector.load %arg3[%c0_153, %c0_154] : memref<16x256xf32, #tpu.memory_space<vmem>>, vector<16x32xf32>
    %366 = vector.broadcast %343 : vector<16x1xf32> to vector<16x32xf32>
    %367 = arith.mulf %366, %365 : vector<16x32xf32>
    %c0_155 = arith.constant 0 : index
    %c32_156 = arith.constant 32 : index
    %368 = vector.load %arg3[%c0_155, %c32_156] : memref<16x256xf32, #tpu.memory_space<vmem>>, vector<16x32xf32>
    %369 = vector.broadcast %345 : vector<16x1xf32> to vector<16x32xf32>
    %370 = arith.mulf %369, %368 : vector<16x32xf32>
    %371 = arith.addf %367, %370 : vector<16x32xf32>
    %c0_157 = arith.constant 0 : index
    %c64_158 = arith.constant 64 : index
    %372 = vector.load %arg3[%c0_157, %c64_158] : memref<16x256xf32, #tpu.memory_space<vmem>>, vector<16x32xf32>
    %373 = vector.broadcast %347 : vector<16x1xf32> to vector<16x32xf32>
    %374 = arith.mulf %373, %372 : vector<16x32xf32>
    %375 = arith.addf %371, %374 : vector<16x32xf32>
    %c0_159 = arith.constant 0 : index
    %c96_160 = arith.constant 96 : index
    %376 = vector.load %arg3[%c0_159, %c96_160] : memref<16x256xf32, #tpu.memory_space<vmem>>, vector<16x32xf32>
    %377 = vector.broadcast %349 : vector<16x1xf32> to vector<16x32xf32>
    %378 = arith.mulf %377, %376 : vector<16x32xf32>
    %379 = arith.addf %375, %378 : vector<16x32xf32>
    %c0_161 = arith.constant 0 : index
    %c128_162 = arith.constant 128 : index
    %380 = vector.load %arg3[%c0_161, %c128_162] : memref<16x256xf32, #tpu.memory_space<vmem>>, vector<16x32xf32>
    %381 = vector.broadcast %351 : vector<16x1xf32> to vector<16x32xf32>
    %382 = arith.mulf %381, %380 : vector<16x32xf32>
    %383 = arith.addf %379, %382 : vector<16x32xf32>
    %c0_163 = arith.constant 0 : index
    %c160_164 = arith.constant 160 : index
    %384 = vector.load %arg3[%c0_163, %c160_164] : memref<16x256xf32, #tpu.memory_space<vmem>>, vector<16x32xf32>
    %385 = vector.broadcast %353 : vector<16x1xf32> to vector<16x32xf32>
    %386 = arith.mulf %385, %384 : vector<16x32xf32>
    %387 = arith.addf %383, %386 : vector<16x32xf32>
    %c0_165 = arith.constant 0 : index
    %c192_166 = arith.constant 192 : index
    %388 = vector.load %arg3[%c0_165, %c192_166] : memref<16x256xf32, #tpu.memory_space<vmem>>, vector<16x32xf32>
    %389 = vector.broadcast %355 : vector<16x1xf32> to vector<16x32xf32>
    %390 = arith.mulf %389, %388 : vector<16x32xf32>
    %391 = arith.addf %387, %390 : vector<16x32xf32>
    %c0_167 = arith.constant 0 : index
    %c224_168 = arith.constant 224 : index
    %392 = vector.load %arg3[%c0_167, %c224_168] : memref<16x256xf32, #tpu.memory_space<vmem>>, vector<16x32xf32>
    %393 = vector.broadcast %357 : vector<16x1xf32> to vector<16x32xf32>
    %394 = arith.mulf %393, %392 : vector<16x32xf32>
    %395 = arith.addf %391, %394 : vector<16x32xf32>
    %396 = tpu.reciprocal %364 : vector<16x1xf32> -> vector<16x1xf32>
    %397 = vector.broadcast %396 : vector<16x1xf32> to vector<16x32xf32>
    %398 = arith.mulf %395, %397 : vector<16x32xf32>
    %c0_169 = arith.constant 0 : index
    %c96_170 = arith.constant 96 : index
    %399 = vector.load %arg4[%c0_169, %c96_170] : memref<16x256xf32, #tpu.memory_space<vmem>>, vector<16x32xf32>
    tpu.vector_store %arg4[%c0_169, %c96_170], %398 {strides = array<i32>} : memref<16x256xf32, #tpu.memory_space<vmem>>, vector<16x32xf32>,
    %c0_171 = arith.constant 0 : index
    %c128_172 = arith.constant 128 : index
    %400 = vector.load %arg1[%c0_171, %c128_172] : memref<16x256xf32, #tpu.memory_space<vmem>>, vector<16x32xf32>
    %cst_173 = arith.constant 0.176776692 : f32
    %401 = vector.broadcast %cst_173 : f32 to vector<16x32xf32>
    %402 = arith.mulf %400, %401 : vector<16x32xf32>
    %c0_174 = arith.constant 0 : index
    %c0_175 = arith.constant 0 : index
    %403 = vector.load %arg2[%c0_174, %c0_175] : memref<16x256xf32, #tpu.memory_space<vmem>>, vector<16x32xf32>
    %404 = arith.mulf %402, %403 : vector<16x32xf32>
    %cst_176 = arith.constant dense<0.000000e+00> : vector<16xf32>
    %405 = vector.multi_reduction <add>, %404, %cst_176 [1] : vector<16x32xf32> to vector<16xf32>
    %406 = vector.shape_cast %405 : vector<16xf32> to vector<16x1xf32>
    %c0_177 = arith.constant 0 : index
    %c32_178 = arith.constant 32 : index
    %407 = vector.load %arg2[%c0_177, %c32_178] : memref<16x256xf32, #tpu.memory_space<vmem>>, vector<16x32xf32>
    %408 = arith.mulf %402, %407 : vector<16x32xf32>
    %cst_179 = arith.constant dense<0.000000e+00> : vector<16xf32>
    %409 = vector.multi_reduction <add>, %408, %cst_179 [1] : vector<16x32xf32> to vector<16xf32>
    %410 = vector.shape_cast %409 : vector<16xf32> to vector<16x1xf32>
    %c0_180 = arith.constant 0 : index
    %c64_181 = arith.constant 64 : index
    %411 = vector.load %arg2[%c0_180, %c64_181] : memref<16x256xf32, #tpu.memory_space<vmem>>, vector<16x32xf32>
    %412 = arith.mulf %402, %411 : vector<16x32xf32>
    %cst_182 = arith.constant dense<0.000000e+00> : vector<16xf32>
    %413 = vector.multi_reduction <add>, %412, %cst_182 [1] : vector<16x32xf32> to vector<16xf32>
    %414 = vector.shape_cast %413 : vector<16xf32> to vector<16x1xf32>
    %c0_183 = arith.constant 0 : index
    %c96_184 = arith.constant 96 : index
    %415 = vector.load %arg2[%c0_183, %c96_184] : memref<16x256xf32, #tpu.memory_space<vmem>>, vector<16x32xf32>
    %416 = arith.mulf %402, %415 : vector<16x32xf32>
    %cst_185 = arith.constant dense<0.000000e+00> : vector<16xf32>
    %417 = vector.multi_reduction <add>, %416, %cst_185 [1] : vector<16x32xf32> to vector<16xf32>
    %418 = vector.shape_cast %417 : vector<16xf32> to vector<16x1xf32>
    %c0_186 = arith.constant 0 : index
    %c128_187 = arith.constant 128 : index
    %419 = vector.load %arg2[%c0_186, %c128_187] : memref<16x256xf32, #tpu.memory_space<vmem>>, vector<16x32xf32>
    %420 = arith.mulf %402, %419 : vector<16x32xf32>
    %cst_188 = arith.constant dense<0.000000e+00> : vector<16xf32>
    %421 = vector.multi_reduction <add>, %420, %cst_188 [1] : vector<16x32xf32> to vector<16xf32>
    %422 = vector.shape_cast %421 : vector<16xf32> to vector<16x1xf32>
    %c0_189 = arith.constant 0 : index
    %c160_190 = arith.constant 160 : index
    %423 = vector.load %arg2[%c0_189, %c160_190] : memref<16x256xf32, #tpu.memory_space<vmem>>, vector<16x32xf32>
    %424 = arith.mulf %402, %423 : vector<16x32xf32>
    %cst_191 = arith.constant dense<0.000000e+00> : vector<16xf32>
    %425 = vector.multi_reduction <add>, %424, %cst_191 [1] : vector<16x32xf32> to vector<16xf32>
    %426 = vector.shape_cast %425 : vector<16xf32> to vector<16x1xf32>
    %c0_192 = arith.constant 0 : index
    %c192_193 = arith.constant 192 : index
    %427 = vector.load %arg2[%c0_192, %c192_193] : memref<16x256xf32, #tpu.memory_space<vmem>>, vector<16x32xf32>
    %428 = arith.mulf %402, %427 : vector<16x32xf32>
    %cst_194 = arith.constant dense<0.000000e+00> : vector<16xf32>
    %429 = vector.multi_reduction <add>, %428, %cst_194 [1] : vector<16x32xf32> to vector<16xf32>
    %430 = vector.shape_cast %429 : vector<16xf32> to vector<16x1xf32>
    %c0_195 = arith.constant 0 : index
    %c224_196 = arith.constant 224 : index
    %431 = vector.load %arg2[%c0_195, %c224_196] : memref<16x256xf32, #tpu.memory_space<vmem>>, vector<16x32xf32>
    %432 = arith.mulf %402, %431 : vector<16x32xf32>
    %cst_197 = arith.constant dense<0.000000e+00> : vector<16xf32>
    %433 = vector.multi_reduction <add>, %432, %cst_197 [1] : vector<16x32xf32> to vector<16xf32>
    %434 = vector.shape_cast %433 : vector<16xf32> to vector<16x1xf32>
    %435 = arith.maximumf %406, %410 : vector<16x1xf32>
    %436 = arith.maximumf %435, %414 : vector<16x1xf32>
    %437 = arith.maximumf %436, %418 : vector<16x1xf32>
    %438 = arith.maximumf %437, %422 : vector<16x1xf32>
    %439 = arith.maximumf %438, %426 : vector<16x1xf32>
    %440 = arith.maximumf %439, %430 : vector<16x1xf32>
    %441 = arith.maximumf %440, %434 : vector<16x1xf32>
    %442 = arith.subf %406, %441 : vector<16x1xf32>
    %443 = math.exp %442 : vector<16x1xf32>
    %444 = arith.subf %410, %441 : vector<16x1xf32>
    %445 = math.exp %444 : vector<16x1xf32>
    %446 = arith.subf %414, %441 : vector<16x1xf32>
    %447 = math.exp %446 : vector<16x1xf32>
    %448 = arith.subf %418, %441 : vector<16x1xf32>
    %449 = math.exp %448 : vector<16x1xf32>
    %450 = arith.subf %422, %441 : vector<16x1xf32>
    %451 = math.exp %450 : vector<16x1xf32>
    %452 = arith.subf %426, %441 : vector<16x1xf32>
    %453 = math.exp %452 : vector<16x1xf32>
    %454 = arith.subf %430, %441 : vector<16x1xf32>
    %455 = math.exp %454 : vector<16x1xf32>
    %456 = arith.subf %434, %441 : vector<16x1xf32>
    %457 = math.exp %456 : vector<16x1xf32>
    %458 = arith.addf %443, %445 : vector<16x1xf32>
    %459 = arith.addf %458, %447 : vector<16x1xf32>
    %460 = arith.addf %459, %449 : vector<16x1xf32>
    %461 = arith.addf %460, %451 : vector<16x1xf32>
    %462 = arith.addf %461, %453 : vector<16x1xf32>
    %463 = arith.addf %462, %455 : vector<16x1xf32>
    %464 = arith.addf %463, %457 : vector<16x1xf32>
    %c0_198 = arith.constant 0 : index
    %c0_199 = arith.constant 0 : index
    %465 = vector.load %arg3[%c0_198, %c0_199] : memref<16x256xf32, #tpu.memory_space<vmem>>, vector<16x32xf32>
    %466 = vector.broadcast %443 : vector<16x1xf32> to vector<16x32xf32>
    %467 = arith.mulf %466, %465 : vector<16x32xf32>
    %c0_200 = arith.constant 0 : index
    %c32_201 = arith.constant 32 : index
    %468 = vector.load %arg3[%c0_200, %c32_201] : memref<16x256xf32, #tpu.memory_space<vmem>>, vector<16x32xf32>
    %469 = vector.broadcast %445 : vector<16x1xf32> to vector<16x32xf32>
    %470 = arith.mulf %469, %468 : vector<16x32xf32>
    %471 = arith.addf %467, %470 : vector<16x32xf32>
    %c0_202 = arith.constant 0 : index
    %c64_203 = arith.constant 64 : index
    %472 = vector.load %arg3[%c0_202, %c64_203] : memref<16x256xf32, #tpu.memory_space<vmem>>, vector<16x32xf32>
    %473 = vector.broadcast %447 : vector<16x1xf32> to vector<16x32xf32>
    %474 = arith.mulf %473, %472 : vector<16x32xf32>
    %475 = arith.addf %471, %474 : vector<16x32xf32>
    %c0_204 = arith.constant 0 : index
    %c96_205 = arith.constant 96 : index
    %476 = vector.load %arg3[%c0_204, %c96_205] : memref<16x256xf32, #tpu.memory_space<vmem>>, vector<16x32xf32>
    %477 = vector.broadcast %449 : vector<16x1xf32> to vector<16x32xf32>
    %478 = arith.mulf %477, %476 : vector<16x32xf32>
    %479 = arith.addf %475, %478 : vector<16x32xf32>
    %c0_206 = arith.constant 0 : index
    %c128_207 = arith.constant 128 : index
    %480 = vector.load %arg3[%c0_206, %c128_207] : memref<16x256xf32, #tpu.memory_space<vmem>>, vector<16x32xf32>
    %481 = vector.broadcast %451 : vector<16x1xf32> to vector<16x32xf32>
    %482 = arith.mulf %481, %480 : vector<16x32xf32>
    %483 = arith.addf %479, %482 : vector<16x32xf32>
    %c0_208 = arith.constant 0 : index
    %c160_209 = arith.constant 160 : index
    %484 = vector.load %arg3[%c0_208, %c160_209] : memref<16x256xf32, #tpu.memory_space<vmem>>, vector<16x32xf32>
    %485 = vector.broadcast %453 : vector<16x1xf32> to vector<16x32xf32>
    %486 = arith.mulf %485, %484 : vector<16x32xf32>
    %487 = arith.addf %483, %486 : vector<16x32xf32>
    %c0_210 = arith.constant 0 : index
    %c192_211 = arith.constant 192 : index
    %488 = vector.load %arg3[%c0_210, %c192_211] : memref<16x256xf32, #tpu.memory_space<vmem>>, vector<16x32xf32>
    %489 = vector.broadcast %455 : vector<16x1xf32> to vector<16x32xf32>
    %490 = arith.mulf %489, %488 : vector<16x32xf32>
    %491 = arith.addf %487, %490 : vector<16x32xf32>
    %c0_212 = arith.constant 0 : index
    %c224_213 = arith.constant 224 : index
    %492 = vector.load %arg3[%c0_212, %c224_213] : memref<16x256xf32, #tpu.memory_space<vmem>>, vector<16x32xf32>
    %493 = vector.broadcast %457 : vector<16x1xf32> to vector<16x32xf32>
    %494 = arith.mulf %493, %492 : vector<16x32xf32>
    %495 = arith.addf %491, %494 : vector<16x32xf32>
    %496 = tpu.reciprocal %464 : vector<16x1xf32> -> vector<16x1xf32>
    %497 = vector.broadcast %496 : vector<16x1xf32> to vector<16x32xf32>
    %498 = arith.mulf %495, %497 : vector<16x32xf32>
    %c0_214 = arith.constant 0 : index
    %c128_215 = arith.constant 128 : index
    %499 = vector.load %arg4[%c0_214, %c128_215] : memref<16x256xf32, #tpu.memory_space<vmem>>, vector<16x32xf32>
    tpu.vector_store %arg4[%c0_214, %c128_215], %498 {strides = array<i32>} : memref<16x256xf32, #tpu.memory_space<vmem>>, vector<16x32xf32>,
    %c0_216 = arith.constant 0 : index
    %c160_217 = arith.constant 160 : index
    %500 = vector.load %arg1[%c0_216, %c160_217] : memref<16x256xf32, #tpu.memory_space<vmem>>, vector<16x32xf32>
    %cst_218 = arith.constant 0.176776692 : f32
    %501 = vector.broadcast %cst_218 : f32 to vector<16x32xf32>
    %502 = arith.mulf %500, %501 : vector<16x32xf32>
    %c0_219 = arith.constant 0 : index
    %c0_220 = arith.constant 0 : index
    %503 = vector.load %arg2[%c0_219, %c0_220] : memref<16x256xf32, #tpu.memory_space<vmem>>, vector<16x32xf32>
    %504 = arith.mulf %502, %503 : vector<16x32xf32>
    %cst_221 = arith.constant dense<0.000000e+00> : vector<16xf32>
    %505 = vector.multi_reduction <add>, %504, %cst_221 [1] : vector<16x32xf32> to vector<16xf32>
    %506 = vector.shape_cast %505 : vector<16xf32> to vector<16x1xf32>
    %c0_222 = arith.constant 0 : index
    %c32_223 = arith.constant 32 : index
    %507 = vector.load %arg2[%c0_222, %c32_223] : memref<16x256xf32, #tpu.memory_space<vmem>>, vector<16x32xf32>
    %508 = arith.mulf %502, %507 : vector<16x32xf32>
    %cst_224 = arith.constant dense<0.000000e+00> : vector<16xf32>
    %509 = vector.multi_reduction <add>, %508, %cst_224 [1] : vector<16x32xf32> to vector<16xf32>
    %510 = vector.shape_cast %509 : vector<16xf32> to vector<16x1xf32>
    %c0_225 = arith.constant 0 : index
    %c64_226 = arith.constant 64 : index
    %511 = vector.load %arg2[%c0_225, %c64_226] : memref<16x256xf32, #tpu.memory_space<vmem>>, vector<16x32xf32>
    %512 = arith.mulf %502, %511 : vector<16x32xf32>
    %cst_227 = arith.constant dense<0.000000e+00> : vector<16xf32>
    %513 = vector.multi_reduction <add>, %512, %cst_227 [1] : vector<16x32xf32> to vector<16xf32>
    %514 = vector.shape_cast %513 : vector<16xf32> to vector<16x1xf32>
    %c0_228 = arith.constant 0 : index
    %c96_229 = arith.constant 96 : index
    %515 = vector.load %arg2[%c0_228, %c96_229] : memref<16x256xf32, #tpu.memory_space<vmem>>, vector<16x32xf32>
    %516 = arith.mulf %502, %515 : vector<16x32xf32>
    %cst_230 = arith.constant dense<0.000000e+00> : vector<16xf32>
    %517 = vector.multi_reduction <add>, %516, %cst_230 [1] : vector<16x32xf32> to vector<16xf32>
    %518 = vector.shape_cast %517 : vector<16xf32> to vector<16x1xf32>
    %c0_231 = arith.constant 0 : index
    %c128_232 = arith.constant 128 : index
    %519 = vector.load %arg2[%c0_231, %c128_232] : memref<16x256xf32, #tpu.memory_space<vmem>>, vector<16x32xf32>
    %520 = arith.mulf %502, %519 : vector<16x32xf32>
    %cst_233 = arith.constant dense<0.000000e+00> : vector<16xf32>
    %521 = vector.multi_reduction <add>, %520, %cst_233 [1] : vector<16x32xf32> to vector<16xf32>
    %522 = vector.shape_cast %521 : vector<16xf32> to vector<16x1xf32>
    %c0_234 = arith.constant 0 : index
    %c160_235 = arith.constant 160 : index
    %523 = vector.load %arg2[%c0_234, %c160_235] : memref<16x256xf32, #tpu.memory_space<vmem>>, vector<16x32xf32>
    %524 = arith.mulf %502, %523 : vector<16x32xf32>
    %cst_236 = arith.constant dense<0.000000e+00> : vector<16xf32>
    %525 = vector.multi_reduction <add>, %524, %cst_236 [1] : vector<16x32xf32> to vector<16xf32>
    %526 = vector.shape_cast %525 : vector<16xf32> to vector<16x1xf32>
    %c0_237 = arith.constant 0 : index
    %c192_238 = arith.constant 192 : index
    %527 = vector.load %arg2[%c0_237, %c192_238] : memref<16x256xf32, #tpu.memory_space<vmem>>, vector<16x32xf32>
    %528 = arith.mulf %502, %527 : vector<16x32xf32>
    %cst_239 = arith.constant dense<0.000000e+00> : vector<16xf32>
    %529 = vector.multi_reduction <add>, %528, %cst_239 [1] : vector<16x32xf32> to vector<16xf32>
    %530 = vector.shape_cast %529 : vector<16xf32> to vector<16x1xf32>
    %c0_240 = arith.constant 0 : index
    %c224_241 = arith.constant 224 : index
    %531 = vector.load %arg2[%c0_240, %c224_241] : memref<16x256xf32, #tpu.memory_space<vmem>>, vector<16x32xf32>
    %532 = arith.mulf %502, %531 : vector<16x32xf32>
    %cst_242 = arith.constant dense<0.000000e+00> : vector<16xf32>
    %533 = vector.multi_reduction <add>, %532, %cst_242 [1] : vector<16x32xf32> to vector<16xf32>
    %534 = vector.shape_cast %533 : vector<16xf32> to vector<16x1xf32>
    %535 = arith.maximumf %506, %510 : vector<16x1xf32>
    %536 = arith.maximumf %535, %514 : vector<16x1xf32>
    %537 = arith.maximumf %536, %518 : vector<16x1xf32>
    %538 = arith.maximumf %537, %522 : vector<16x1xf32>
    %539 = arith.maximumf %538, %526 : vector<16x1xf32>
    %540 = arith.maximumf %539, %530 : vector<16x1xf32>
    %541 = arith.maximumf %540, %534 : vector<16x1xf32>
    %542 = arith.subf %506, %541 : vector<16x1xf32>
    %543 = math.exp %542 : vector<16x1xf32>
    %544 = arith.subf %510, %541 : vector<16x1xf32>
    %545 = math.exp %544 : vector<16x1xf32>
    %546 = arith.subf %514, %541 : vector<16x1xf32>
    %547 = math.exp %546 : vector<16x1xf32>
    %548 = arith.subf %518, %541 : vector<16x1xf32>
    %549 = math.exp %548 : vector<16x1xf32>
    %550 = arith.subf %522, %541 : vector<16x1xf32>
    %551 = math.exp %550 : vector<16x1xf32>
    %552 = arith.subf %526, %541 : vector<16x1xf32>
    %553 = math.exp %552 : vector<16x1xf32>
    %554 = arith.subf %530, %541 : vector<16x1xf32>
    %555 = math.exp %554 : vector<16x1xf32>
    %556 = arith.subf %534, %541 : vector<16x1xf32>
    %557 = math.exp %556 : vector<16x1xf32>
    %558 = arith.addf %543, %545 : vector<16x1xf32>
    %559 = arith.addf %558, %547 : vector<16x1xf32>
    %560 = arith.addf %559, %549 : vector<16x1xf32>
    %561 = arith.addf %560, %551 : vector<16x1xf32>
    %562 = arith.addf %561, %553 : vector<16x1xf32>
    %563 = arith.addf %562, %555 : vector<16x1xf32>
    %564 = arith.addf %563, %557 : vector<16x1xf32>
    %c0_243 = arith.constant 0 : index
    %c0_244 = arith.constant 0 : index
    %565 = vector.load %arg3[%c0_243, %c0_244] : memref<16x256xf32, #tpu.memory_space<vmem>>, vector<16x32xf32>
    %566 = vector.broadcast %543 : vector<16x1xf32> to vector<16x32xf32>
    %567 = arith.mulf %566, %565 : vector<16x32xf32>
    %c0_245 = arith.constant 0 : index
    %c32_246 = arith.constant 32 : index
    %568 = vector.load %arg3[%c0_245, %c32_246] : memref<16x256xf32, #tpu.memory_space<vmem>>, vector<16x32xf32>
    %569 = vector.broadcast %545 : vector<16x1xf32> to vector<16x32xf32>
    %570 = arith.mulf %569, %568 : vector<16x32xf32>
    %571 = arith.addf %567, %570 : vector<16x32xf32>
    %c0_247 = arith.constant 0 : index
    %c64_248 = arith.constant 64 : index
    %572 = vector.load %arg3[%c0_247, %c64_248] : memref<16x256xf32, #tpu.memory_space<vmem>>, vector<16x32xf32>
    %573 = vector.broadcast %547 : vector<16x1xf32> to vector<16x32xf32>
    %574 = arith.mulf %573, %572 : vector<16x32xf32>
    %575 = arith.addf %571, %574 : vector<16x32xf32>
    %c0_249 = arith.constant 0 : index
    %c96_250 = arith.constant 96 : index
    %576 = vector.load %arg3[%c0_249, %c96_250] : memref<16x256xf32, #tpu.memory_space<vmem>>, vector<16x32xf32>
    %577 = vector.broadcast %549 : vector<16x1xf32> to vector<16x32xf32>
    %578 = arith.mulf %577, %576 : vector<16x32xf32>
    %579 = arith.addf %575, %578 : vector<16x32xf32>
    %c0_251 = arith.constant 0 : index
    %c128_252 = arith.constant 128 : index
    %580 = vector.load %arg3[%c0_251, %c128_252] : memref<16x256xf32, #tpu.memory_space<vmem>>, vector<16x32xf32>
    %581 = vector.broadcast %551 : vector<16x1xf32> to vector<16x32xf32>
    %582 = arith.mulf %581, %580 : vector<16x32xf32>
    %583 = arith.addf %579, %582 : vector<16x32xf32>
    %c0_253 = arith.constant 0 : index
    %c160_254 = arith.constant 160 : index
    %584 = vector.load %arg3[%c0_253, %c160_254] : memref<16x256xf32, #tpu.memory_space<vmem>>, vector<16x32xf32>
    %585 = vector.broadcast %553 : vector<16x1xf32> to vector<16x32xf32>
    %586 = arith.mulf %585, %584 : vector<16x32xf32>
    %587 = arith.addf %583, %586 : vector<16x32xf32>
    %c0_255 = arith.constant 0 : index
    %c192_256 = arith.constant 192 : index
    %588 = vector.load %arg3[%c0_255, %c192_256] : memref<16x256xf32, #tpu.memory_space<vmem>>, vector<16x32xf32>
    %589 = vector.broadcast %555 : vector<16x1xf32> to vector<16x32xf32>
    %590 = arith.mulf %589, %588 : vector<16x32xf32>
    %591 = arith.addf %587, %590 : vector<16x32xf32>
    %c0_257 = arith.constant 0 : index
    %c224_258 = arith.constant 224 : index
    %592 = vector.load %arg3[%c0_257, %c224_258] : memref<16x256xf32, #tpu.memory_space<vmem>>, vector<16x32xf32>
    %593 = vector.broadcast %557 : vector<16x1xf32> to vector<16x32xf32>
    %594 = arith.mulf %593, %592 : vector<16x32xf32>
    %595 = arith.addf %591, %594 : vector<16x32xf32>
    %596 = tpu.reciprocal %564 : vector<16x1xf32> -> vector<16x1xf32>
    %597 = vector.broadcast %596 : vector<16x1xf32> to vector<16x32xf32>
    %598 = arith.mulf %595, %597 : vector<16x32xf32>
    %c0_259 = arith.constant 0 : index
    %c160_260 = arith.constant 160 : index
    %599 = vector.load %arg4[%c0_259, %c160_260] : memref<16x256xf32, #tpu.memory_space<vmem>>, vector<16x32xf32>
    tpu.vector_store %arg4[%c0_259, %c160_260], %598 {strides = array<i32>} : memref<16x256xf32, #tpu.memory_space<vmem>>, vector<16x32xf32>,
    %c0_261 = arith.constant 0 : index
    %c192_262 = arith.constant 192 : index
    %600 = vector.load %arg1[%c0_261, %c192_262] : memref<16x256xf32, #tpu.memory_space<vmem>>, vector<16x32xf32>
    %cst_263 = arith.constant 0.176776692 : f32
    %601 = vector.broadcast %cst_263 : f32 to vector<16x32xf32>
    %602 = arith.mulf %600, %601 : vector<16x32xf32>
    %c0_264 = arith.constant 0 : index
    %c0_265 = arith.constant 0 : index
    %603 = vector.load %arg2[%c0_264, %c0_265] : memref<16x256xf32, #tpu.memory_space<vmem>>, vector<16x32xf32>
    %604 = arith.mulf %602, %603 : vector<16x32xf32>
    %cst_266 = arith.constant dense<0.000000e+00> : vector<16xf32>
    %605 = vector.multi_reduction <add>, %604, %cst_266 [1] : vector<16x32xf32> to vector<16xf32>
    %606 = vector.shape_cast %605 : vector<16xf32> to vector<16x1xf32>
    %c0_267 = arith.constant 0 : index
    %c32_268 = arith.constant 32 : index
    %607 = vector.load %arg2[%c0_267, %c32_268] : memref<16x256xf32, #tpu.memory_space<vmem>>, vector<16x32xf32>
    %608 = arith.mulf %602, %607 : vector<16x32xf32>
    %cst_269 = arith.constant dense<0.000000e+00> : vector<16xf32>
    %609 = vector.multi_reduction <add>, %608, %cst_269 [1] : vector<16x32xf32> to vector<16xf32>
    %610 = vector.shape_cast %609 : vector<16xf32> to vector<16x1xf32>
    %c0_270 = arith.constant 0 : index
    %c64_271 = arith.constant 64 : index
    %611 = vector.load %arg2[%c0_270, %c64_271] : memref<16x256xf32, #tpu.memory_space<vmem>>, vector<16x32xf32>
    %612 = arith.mulf %602, %611 : vector<16x32xf32>
    %cst_272 = arith.constant dense<0.000000e+00> : vector<16xf32>
    %613 = vector.multi_reduction <add>, %612, %cst_272 [1] : vector<16x32xf32> to vector<16xf32>
    %614 = vector.shape_cast %613 : vector<16xf32> to vector<16x1xf32>
    %c0_273 = arith.constant 0 : index
    %c96_274 = arith.constant 96 : index
    %615 = vector.load %arg2[%c0_273, %c96_274] : memref<16x256xf32, #tpu.memory_space<vmem>>, vector<16x32xf32>
    %616 = arith.mulf %602, %615 : vector<16x32xf32>
    %cst_275 = arith.constant dense<0.000000e+00> : vector<16xf32>
    %617 = vector.multi_reduction <add>, %616, %cst_275 [1] : vector<16x32xf32> to vector<16xf32>
    %618 = vector.shape_cast %617 : vector<16xf32> to vector<16x1xf32>
    %c0_276 = arith.constant 0 : index
    %c128_277 = arith.constant 128 : index
    %619 = vector.load %arg2[%c0_276, %c128_277] : memref<16x256xf32, #tpu.memory_space<vmem>>, vector<16x32xf32>
    %620 = arith.mulf %602, %619 : vector<16x32xf32>
    %cst_278 = arith.constant dense<0.000000e+00> : vector<16xf32>
    %621 = vector.multi_reduction <add>, %620, %cst_278 [1] : vector<16x32xf32> to vector<16xf32>
    %622 = vector.shape_cast %621 : vector<16xf32> to vector<16x1xf32>
    %c0_279 = arith.constant 0 : index
    %c160_280 = arith.constant 160 : index
    %623 = vector.load %arg2[%c0_279, %c160_280] : memref<16x256xf32, #tpu.memory_space<vmem>>, vector<16x32xf32>
    %624 = arith.mulf %602, %623 : vector<16x32xf32>
    %cst_281 = arith.constant dense<0.000000e+00> : vector<16xf32>
    %625 = vector.multi_reduction <add>, %624, %cst_281 [1] : vector<16x32xf32> to vector<16xf32>
    %626 = vector.shape_cast %625 : vector<16xf32> to vector<16x1xf32>
    %c0_282 = arith.constant 0 : index
    %c192_283 = arith.constant 192 : index
    %627 = vector.load %arg2[%c0_282, %c192_283] : memref<16x256xf32, #tpu.memory_space<vmem>>, vector<16x32xf32>
    %628 = arith.mulf %602, %627 : vector<16x32xf32>
    %cst_284 = arith.constant dense<0.000000e+00> : vector<16xf32>
    %629 = vector.multi_reduction <add>, %628, %cst_284 [1] : vector<16x32xf32> to vector<16xf32>
    %630 = vector.shape_cast %629 : vector<16xf32> to vector<16x1xf32>
    %c0_285 = arith.constant 0 : index
    %c224_286 = arith.constant 224 : index
    %631 = vector.load %arg2[%c0_285, %c224_286] : memref<16x256xf32, #tpu.memory_space<vmem>>, vector<16x32xf32>
    %632 = arith.mulf %602, %631 : vector<16x32xf32>
    %cst_287 = arith.constant dense<0.000000e+00> : vector<16xf32>
    %633 = vector.multi_reduction <add>, %632, %cst_287 [1] : vector<16x32xf32> to vector<16xf32>
    %634 = vector.shape_cast %633 : vector<16xf32> to vector<16x1xf32>
    %635 = arith.maximumf %606, %610 : vector<16x1xf32>
    %636 = arith.maximumf %635, %614 : vector<16x1xf32>
    %637 = arith.maximumf %636, %618 : vector<16x1xf32>
    %638 = arith.maximumf %637, %622 : vector<16x1xf32>
    %639 = arith.maximumf %638, %626 : vector<16x1xf32>
    %640 = arith.maximumf %639, %630 : vector<16x1xf32>
    %641 = arith.maximumf %640, %634 : vector<16x1xf32>
    %642 = arith.subf %606, %641 : vector<16x1xf32>
    %643 = math.exp %642 : vector<16x1xf32>
    %644 = arith.subf %610, %641 : vector<16x1xf32>
    %645 = math.exp %644 : vector<16x1xf32>
    %646 = arith.subf %614, %641 : vector<16x1xf32>
    %647 = math.exp %646 : vector<16x1xf32>
    %648 = arith.subf %618, %641 : vector<16x1xf32>
    %649 = math.exp %648 : vector<16x1xf32>
    %650 = arith.subf %622, %641 : vector<16x1xf32>
    %651 = math.exp %650 : vector<16x1xf32>
    %652 = arith.subf %626, %641 : vector<16x1xf32>
    %653 = math.exp %652 : vector<16x1xf32>
    %654 = arith.subf %630, %641 : vector<16x1xf32>
    %655 = math.exp %654 : vector<16x1xf32>
    %656 = arith.subf %634, %641 : vector<16x1xf32>
    %657 = math.exp %656 : vector<16x1xf32>
    %658 = arith.addf %643, %645 : vector<16x1xf32>
    %659 = arith.addf %658, %647 : vector<16x1xf32>
    %660 = arith.addf %659, %649 : vector<16x1xf32>
    %661 = arith.addf %660, %651 : vector<16x1xf32>
    %662 = arith.addf %661, %653 : vector<16x1xf32>
    %663 = arith.addf %662, %655 : vector<16x1xf32>
    %664 = arith.addf %663, %657 : vector<16x1xf32>
    %c0_288 = arith.constant 0 : index
    %c0_289 = arith.constant 0 : index
    %665 = vector.load %arg3[%c0_288, %c0_289] : memref<16x256xf32, #tpu.memory_space<vmem>>, vector<16x32xf32>
    %666 = vector.broadcast %643 : vector<16x1xf32> to vector<16x32xf32>
    %667 = arith.mulf %666, %665 : vector<16x32xf32>
    %c0_290 = arith.constant 0 : index
    %c32_291 = arith.constant 32 : index
    %668 = vector.load %arg3[%c0_290, %c32_291] : memref<16x256xf32, #tpu.memory_space<vmem>>, vector<16x32xf32>
    %669 = vector.broadcast %645 : vector<16x1xf32> to vector<16x32xf32>
    %670 = arith.mulf %669, %668 : vector<16x32xf32>
    %671 = arith.addf %667, %670 : vector<16x32xf32>
    %c0_292 = arith.constant 0 : index
    %c64_293 = arith.constant 64 : index
    %672 = vector.load %arg3[%c0_292, %c64_293] : memref<16x256xf32, #tpu.memory_space<vmem>>, vector<16x32xf32>
    %673 = vector.broadcast %647 : vector<16x1xf32> to vector<16x32xf32>
    %674 = arith.mulf %673, %672 : vector<16x32xf32>
    %675 = arith.addf %671, %674 : vector<16x32xf32>
    %c0_294 = arith.constant 0 : index
    %c96_295 = arith.constant 96 : index
    %676 = vector.load %arg3[%c0_294, %c96_295] : memref<16x256xf32, #tpu.memory_space<vmem>>, vector<16x32xf32>
    %677 = vector.broadcast %649 : vector<16x1xf32> to vector<16x32xf32>
    %678 = arith.mulf %677, %676 : vector<16x32xf32>
    %679 = arith.addf %675, %678 : vector<16x32xf32>
    %c0_296 = arith.constant 0 : index
    %c128_297 = arith.constant 128 : index
    %680 = vector.load %arg3[%c0_296, %c128_297] : memref<16x256xf32, #tpu.memory_space<vmem>>, vector<16x32xf32>
    %681 = vector.broadcast %651 : vector<16x1xf32> to vector<16x32xf32>
    %682 = arith.mulf %681, %680 : vector<16x32xf32>
    %683 = arith.addf %679, %682 : vector<16x32xf32>
    %c0_298 = arith.constant 0 : index
    %c160_299 = arith.constant 160 : index
    %684 = vector.load %arg3[%c0_298, %c160_299] : memref<16x256xf32, #tpu.memory_space<vmem>>, vector<16x32xf32>
    %685 = vector.broadcast %653 : vector<16x1xf32> to vector<16x32xf32>
    %686 = arith.mulf %685, %684 : vector<16x32xf32>
    %687 = arith.addf %683, %686 : vector<16x32xf32>
    %c0_300 = arith.constant 0 : index
    %c192_301 = arith.constant 192 : index
    %688 = vector.load %arg3[%c0_300, %c192_301] : memref<16x256xf32, #tpu.memory_space<vmem>>, vector<16x32xf32>
    %689 = vector.broadcast %655 : vector<16x1xf32> to vector<16x32xf32>
    %690 = arith.mulf %689, %688 : vector<16x32xf32>
    %691 = arith.addf %687, %690 : vector<16x32xf32>
    %c0_302 = arith.constant 0 : index
    %c224_303 = arith.constant 224 : index
    %692 = vector.load %arg3[%c0_302, %c224_303] : memref<16x256xf32, #tpu.memory_space<vmem>>, vector<16x32xf32>
    %693 = vector.broadcast %657 : vector<16x1xf32> to vector<16x32xf32>
    %694 = arith.mulf %693, %692 : vector<16x32xf32>
    %695 = arith.addf %691, %694 : vector<16x32xf32>
    %696 = tpu.reciprocal %664 : vector<16x1xf32> -> vector<16x1xf32>
    %697 = vector.broadcast %696 : vector<16x1xf32> to vector<16x32xf32>
    %698 = arith.mulf %695, %697 : vector<16x32xf32>
    %c0_304 = arith.constant 0 : index
    %c192_305 = arith.constant 192 : index
    %699 = vector.load %arg4[%c0_304, %c192_305] : memref<16x256xf32, #tpu.memory_space<vmem>>, vector<16x32xf32>
    tpu.vector_store %arg4[%c0_304, %c192_305], %698 {strides = array<i32>} : memref<16x256xf32, #tpu.memory_space<vmem>>, vector<16x32xf32>,
    %c0_306 = arith.constant 0 : index
    %c224_307 = arith.constant 224 : index
    %700 = vector.load %arg1[%c0_306, %c224_307] : memref<16x256xf32, #tpu.memory_space<vmem>>, vector<16x32xf32>
    %cst_308 = arith.constant 0.176776692 : f32
    %701 = vector.broadcast %cst_308 : f32 to vector<16x32xf32>
    %702 = arith.mulf %700, %701 : vector<16x32xf32>
    %c0_309 = arith.constant 0 : index
    %c0_310 = arith.constant 0 : index
    %703 = vector.load %arg2[%c0_309, %c0_310] : memref<16x256xf32, #tpu.memory_space<vmem>>, vector<16x32xf32>
    %704 = arith.mulf %702, %703 : vector<16x32xf32>
    %cst_311 = arith.constant dense<0.000000e+00> : vector<16xf32>
    %705 = vector.multi_reduction <add>, %704, %cst_311 [1] : vector<16x32xf32> to vector<16xf32>
    %706 = vector.shape_cast %705 : vector<16xf32> to vector<16x1xf32>
    %c0_312 = arith.constant 0 : index
    %c32_313 = arith.constant 32 : index
    %707 = vector.load %arg2[%c0_312, %c32_313] : memref<16x256xf32, #tpu.memory_space<vmem>>, vector<16x32xf32>
    %708 = arith.mulf %702, %707 : vector<16x32xf32>
    %cst_314 = arith.constant dense<0.000000e+00> : vector<16xf32>
    %709 = vector.multi_reduction <add>, %708, %cst_314 [1] : vector<16x32xf32> to vector<16xf32>
    %710 = vector.shape_cast %709 : vector<16xf32> to vector<16x1xf32>
    %c0_315 = arith.constant 0 : index
    %c64_316 = arith.constant 64 : index
    %711 = vector.load %arg2[%c0_315, %c64_316] : memref<16x256xf32, #tpu.memory_space<vmem>>, vector<16x32xf32>
    %712 = arith.mulf %702, %711 : vector<16x32xf32>
    %cst_317 = arith.constant dense<0.000000e+00> : vector<16xf32>
    %713 = vector.multi_reduction <add>, %712, %cst_317 [1] : vector<16x32xf32> to vector<16xf32>
    %714 = vector.shape_cast %713 : vector<16xf32> to vector<16x1xf32>
    %c0_318 = arith.constant 0 : index
    %c96_319 = arith.constant 96 : index
    %715 = vector.load %arg2[%c0_318, %c96_319] : memref<16x256xf32, #tpu.memory_space<vmem>>, vector<16x32xf32>
    %716 = arith.mulf %702, %715 : vector<16x32xf32>
    %cst_320 = arith.constant dense<0.000000e+00> : vector<16xf32>
    %717 = vector.multi_reduction <add>, %716, %cst_320 [1] : vector<16x32xf32> to vector<16xf32>
    %718 = vector.shape_cast %717 : vector<16xf32> to vector<16x1xf32>
    %c0_321 = arith.constant 0 : index
    %c128_322 = arith.constant 128 : index
    %719 = vector.load %arg2[%c0_321, %c128_322] : memref<16x256xf32, #tpu.memory_space<vmem>>, vector<16x32xf32>
    %720 = arith.mulf %702, %719 : vector<16x32xf32>
    %cst_323 = arith.constant dense<0.000000e+00> : vector<16xf32>
    %721 = vector.multi_reduction <add>, %720, %cst_323 [1] : vector<16x32xf32> to vector<16xf32>
    %722 = vector.shape_cast %721 : vector<16xf32> to vector<16x1xf32>
    %c0_324 = arith.constant 0 : index
    %c160_325 = arith.constant 160 : index
    %723 = vector.load %arg2[%c0_324, %c160_325] : memref<16x256xf32, #tpu.memory_space<vmem>>, vector<16x32xf32>
    %724 = arith.mulf %702, %723 : vector<16x32xf32>
    %cst_326 = arith.constant dense<0.000000e+00> : vector<16xf32>
    %725 = vector.multi_reduction <add>, %724, %cst_326 [1] : vector<16x32xf32> to vector<16xf32>
    %726 = vector.shape_cast %725 : vector<16xf32> to vector<16x1xf32>
    %c0_327 = arith.constant 0 : index
    %c192_328 = arith.constant 192 : index
    %727 = vector.load %arg2[%c0_327, %c192_328] : memref<16x256xf32, #tpu.memory_space<vmem>>, vector<16x32xf32>
    %728 = arith.mulf %702, %727 : vector<16x32xf32>
    %cst_329 = arith.constant dense<0.000000e+00> : vector<16xf32>
    %729 = vector.multi_reduction <add>, %728, %cst_329 [1] : vector<16x32xf32> to vector<16xf32>
    %730 = vector.shape_cast %729 : vector<16xf32> to vector<16x1xf32>
    %c0_330 = arith.constant 0 : index
    %c224_331 = arith.constant 224 : index
    %731 = vector.load %arg2[%c0_330, %c224_331] : memref<16x256xf32, #tpu.memory_space<vmem>>, vector<16x32xf32>
    %732 = arith.mulf %702, %731 : vector<16x32xf32>
    %cst_332 = arith.constant dense<0.000000e+00> : vector<16xf32>
    %733 = vector.multi_reduction <add>, %732, %cst_332 [1] : vector<16x32xf32> to vector<16xf32>
    %734 = vector.shape_cast %733 : vector<16xf32> to vector<16x1xf32>
    %735 = arith.maximumf %706, %710 : vector<16x1xf32>
    %736 = arith.maximumf %735, %714 : vector<16x1xf32>
    %737 = arith.maximumf %736, %718 : vector<16x1xf32>
    %738 = arith.maximumf %737, %722 : vector<16x1xf32>
    %739 = arith.maximumf %738, %726 : vector<16x1xf32>
    %740 = arith.maximumf %739, %730 : vector<16x1xf32>
    %741 = arith.maximumf %740, %734 : vector<16x1xf32>
    %742 = arith.subf %706, %741 : vector<16x1xf32>
    %743 = math.exp %742 : vector<16x1xf32>
    %744 = arith.subf %710, %741 : vector<16x1xf32>
    %745 = math.exp %744 : vector<16x1xf32>
    %746 = arith.subf %714, %741 : vector<16x1xf32>
    %747 = math.exp %746 : vector<16x1xf32>
    %748 = arith.subf %718, %741 : vector<16x1xf32>
    %749 = math.exp %748 : vector<16x1xf32>
    %750 = arith.subf %722, %741 : vector<16x1xf32>
    %751 = math.exp %750 : vector<16x1xf32>
    %752 = arith.subf %726, %741 : vector<16x1xf32>
    %753 = math.exp %752 : vector<16x1xf32>
    %754 = arith.subf %730, %741 : vector<16x1xf32>
    %755 = math.exp %754 : vector<16x1xf32>
    %756 = arith.subf %734, %741 : vector<16x1xf32>
    %757 = math.exp %756 : vector<16x1xf32>
    %758 = arith.addf %743, %745 : vector<16x1xf32>
    %759 = arith.addf %758, %747 : vector<16x1xf32>
    %760 = arith.addf %759, %749 : vector<16x1xf32>
    %761 = arith.addf %760, %751 : vector<16x1xf32>
    %762 = arith.addf %761, %753 : vector<16x1xf32>
    %763 = arith.addf %762, %755 : vector<16x1xf32>
    %764 = arith.addf %763, %757 : vector<16x1xf32>
    %c0_333 = arith.constant 0 : index
    %c0_334 = arith.constant 0 : index
    %765 = vector.load %arg3[%c0_333, %c0_334] : memref<16x256xf32, #tpu.memory_space<vmem>>, vector<16x32xf32>
    %766 = vector.broadcast %743 : vector<16x1xf32> to vector<16x32xf32>
    %767 = arith.mulf %766, %765 : vector<16x32xf32>
    %c0_335 = arith.constant 0 : index
    %c32_336 = arith.constant 32 : index
    %768 = vector.load %arg3[%c0_335, %c32_336] : memref<16x256xf32, #tpu.memory_space<vmem>>, vector<16x32xf32>
    %769 = vector.broadcast %745 : vector<16x1xf32> to vector<16x32xf32>
    %770 = arith.mulf %769, %768 : vector<16x32xf32>
    %771 = arith.addf %767, %770 : vector<16x32xf32>
    %c0_337 = arith.constant 0 : index
    %c64_338 = arith.constant 64 : index
    %772 = vector.load %arg3[%c0_337, %c64_338] : memref<16x256xf32, #tpu.memory_space<vmem>>, vector<16x32xf32>
    %773 = vector.broadcast %747 : vector<16x1xf32> to vector<16x32xf32>
    %774 = arith.mulf %773, %772 : vector<16x32xf32>
    %775 = arith.addf %771, %774 : vector<16x32xf32>
    %c0_339 = arith.constant 0 : index
    %c96_340 = arith.constant 96 : index
    %776 = vector.load %arg3[%c0_339, %c96_340] : memref<16x256xf32, #tpu.memory_space<vmem>>, vector<16x32xf32>
    %777 = vector.broadcast %749 : vector<16x1xf32> to vector<16x32xf32>
    %778 = arith.mulf %777, %776 : vector<16x32xf32>
    %779 = arith.addf %775, %778 : vector<16x32xf32>
    %c0_341 = arith.constant 0 : index
    %c128_342 = arith.constant 128 : index
    %780 = vector.load %arg3[%c0_341, %c128_342] : memref<16x256xf32, #tpu.memory_space<vmem>>, vector<16x32xf32>
    %781 = vector.broadcast %751 : vector<16x1xf32> to vector<16x32xf32>
    %782 = arith.mulf %781, %780 : vector<16x32xf32>
    %783 = arith.addf %779, %782 : vector<16x32xf32>
    %c0_343 = arith.constant 0 : index
    %c160_344 = arith.constant 160 : index
    %784 = vector.load %arg3[%c0_343, %c160_344] : memref<16x256xf32, #tpu.memory_space<vmem>>, vector<16x32xf32>
    %785 = vector.broadcast %753 : vector<16x1xf32> to vector<16x32xf32>
    %786 = arith.mulf %785, %784 : vector<16x32xf32>
    %787 = arith.addf %783, %786 : vector<16x32xf32>
    %c0_345 = arith.constant 0 : index
    %c192_346 = arith.constant 192 : index
    %788 = vector.load %arg3[%c0_345, %c192_346] : memref<16x256xf32, #tpu.memory_space<vmem>>, vector<16x32xf32>
    %789 = vector.broadcast %755 : vector<16x1xf32> to vector<16x32xf32>
    %790 = arith.mulf %789, %788 : vector<16x32xf32>
    %791 = arith.addf %787, %790 : vector<16x32xf32>
    %c0_347 = arith.constant 0 : index
    %c224_348 = arith.constant 224 : index
    %792 = vector.load %arg3[%c0_347, %c224_348] : memref<16x256xf32, #tpu.memory_space<vmem>>, vector<16x32xf32>
    %793 = vector.broadcast %757 : vector<16x1xf32> to vector<16x32xf32>
    %794 = arith.mulf %793, %792 : vector<16x32xf32>
    %795 = arith.addf %791, %794 : vector<16x32xf32>
    %796 = tpu.reciprocal %764 : vector<16x1xf32> -> vector<16x1xf32>
    %797 = vector.broadcast %796 : vector<16x1xf32> to vector<16x32xf32>
    %798 = arith.mulf %795, %797 : vector<16x32xf32>
    %c0_349 = arith.constant 0 : index
    %c224_350 = arith.constant 224 : index
    %799 = vector.load %arg4[%c0_349, %c224_350] : memref<16x256xf32, #tpu.memory_space<vmem>>, vector<16x32xf32>
    tpu.vector_store %arg4[%c0_349, %c224_350], %798 {strides = array<i32>} : memref<16x256xf32, #tpu.memory_space<vmem>>, vector<16x32xf32>,
    return
  }
  func.func @transform_0(%arg0: i32) -> (i32, i32) {
    %c0_i32 = arith.constant 0 : i32
    %c0_i32_0 = arith.constant 0 : i32
    return %arg0, %c0_i32 : i32, i32
  }
  func.func @transform_1(%arg0: i32) -> (i32, i32) {
    %c0_i32 = arith.constant 0 : i32
    %c0_i32_0 = arith.constant 0 : i32
    return %arg0, %c0_i32 : i32, i32
  }
  func.func @transform_2(%arg0: i32) -> (i32, i32) {
    %c0_i32 = arith.constant 0 : i32
    %c0_i32_0 = arith.constant 0 : i32
    return %arg0, %c0_i32 : i32, i32
  }
  func.func @transform_3(%arg0: i32) -> (i32, i32) {
    %c0_i32 = arith.constant 0 : i32
    %c0_i32_0 = arith.constant 0 : i32
    return %arg0, %c0_i32 : i32, i32
  }
}

</mosaic_0001>

<bundles_post_ra>
// kernel: tpu_custom_call.1
= control target key start
LH: loop header
LB: loop body
LE: loop exit
PB: predicated region body
PF: predicated region fallthrough
CT: control target
= control target key end

     0   :  { %s5301_s0 = inlined_call_operand.hbm [shape: f32[32,256], index: 0, kind: input, shape index: {}]   ;;  %s5302_s1 = inlined_call_operand.hbm [shape: f32[32,256], index: 1, kind: input, shape index: {}]   ;;  %s5303_s2 = inlined_call_operand.hbm [shape: f32[32,256], index: 2, kind: input, shape index: {}]   ;;  %s5304_s3 = inlined_call_operand.hbm [shape: f32[32,256], index: 3, kind: output, shape index: {}]  }
   0x1   :  { %5311 = sst [smem:[#allocation12_spill]] %s5301_s0 }
   0x2   :  { %8 = vsyncpa [#allocation3], 0 }
   0x3   :  { %10 = vsyncpa [#allocation3 + $0x1], 0 }
   0x4   :  { %11 = vsyncpa [#allocation6], 0 }
   0x5   :  { %13 = vsyncpa [#allocation6 + $0x1], 0 }
   0x6   :  { %14 = vsyncpa [#allocation4], 0 }
   0x7   :  { %16 = vsyncpa [#allocation4 + $0x1], 0  ;;  %s3630_s12 = smov 0   ;;  %s3632_s13 = smov 0  }
   0x8   :  { %s3634_s14 = smov 0   ;;  %s3636_s15 = smov 0  }
   0x9 LB: > { %s3651_s16 = sadd.s32 4294967295, %s3597_s15   ;;  %s3048_s17 = sadd.s32 4294967294, %s3597_s15   ;;  %s3597_s15 = sphi %s3636_s15, %s5330_s15   ;;  %s3593_s14 = sphi %s3634_s14, %s5329_s14   ;;  %s3589_s13 = sphi %s3632_s13, %s5328_s13   ;;  %s3585_s12 = sphi %s3630_s12, %s5327_s12  }
   0xa   : > { %s3655_s18 = sadd.s32 1, %s3597_s15   ;;  %s29_s19 = sadd.s32 1, %s3593_s14 }
   0xb   : > { %s26_s20 = ssub.s32 %s3597_s15, %s3655_s18  ;;  %p36_p0 = scmp.ne.s32.totalorder %s3593_s14, %s3589_s13 }
   0xc   : > { %p27_p1 = scmp.eq.s32.totalorder %s26_s20, 0  ;;  %p37_p2 = scmp.eq.s32.totalorder %s3597_s15, 0 }
   0xd   : > { %p42_p3 = scmp.ne.s32.totalorder %s3589_s13, %s3585_s12  ;;  %p43_p4 = scmp.eq.s32.totalorder %s3651_s16, 0 }
   0xe   : > { %s3667_s21 = scalar_select %p27_p1, %s3593_s14, %s29_s19  }
   0xf   : > { %p38_p5 = por %p37_p2, %p36_p0  ;;  %p3669_p6 = por %p43_p4, %p42_p3 }
  0x10   : > { %p118_p7 = scmp.eq.s32.totalorder %s3651_s16, 1  ;;  %p124_p8 = scmp.eq.s32.totalorder %s3048_s17, 1 }
  0x11   : > { %s5312_s22 = scalar_select %p3669_p6, 1, 0 }
  0x12   : > { %p3104_p10 = scmp.lt.s32.totalorder %s3597_s15, 2  ;;  %p3676_p11 = por %p118_p7, %p36_p0 }
  0x13   : > { %p3680_p12 = por %p124_p8, %p42_p3  ;;  %s144_s25 = sand.u32 1, %s3593_s14  }
  0x14   : > { %s5313_s23 = scalar_select %p3676_p11, 1, 0 }
  0x15   : > { %s5314_s24 = scalar_select %p3680_p12, 1, 0 }
  0x16   : > { %s3686_s26 = sshll.u32 %s3597_s15, 9  ;;  %s3690_s27 = sshll.u32 %s144_s25, 5 }
  0x17   : > { %p3692_p13 = pnand %p3104_p10, %p38_p5  ;;  %s166_s29 = sand.u32 1, %s3597_s15  }
  0x18   : > { %s3701_s5 = scalar_lea.hbm %s5302_s1, %s3686_s26  ;;  %s170_s6 = scalar_lea.vmem [#allocation5], %s3690_s27 }
  0x19   : > { %s178_s7 = sshll.u32 %s170_s6, 4  ;;  %s3707_s8 = scalar_lea.sflag [#allocation6], %s166_s29  ;;  %s3704_s7 = int_to_ptr.vmem [resolvable:$true] %s178_s7 }
  0x1a   : > { %s3437_s9 = scalar_lea.hbm %s3701_s5, 512  ;;  %p3713_p2 = pneg %p3692_p13 }
  0x1b   : > { %p3438_p1 = scmp.ne.s32.totalorder %s3701_s5, %s3437_s9  ;;  %s3442_s19 = scalar_lea.hbm %s5302_s1, 1024 }
  0x1c   : > { %p3443_p5 = scmp.lt.u32.totalorder %s3701_s5, %s5302_s1  ;;  %p3444_p7 = scmp.lt.u32.totalorder %s3442_s19, %s3437_s9 }
  0x1d   : > { %p3440_p3 = pnand %p3713_p2, %p3438_p1  ;;  %p3446_p10 = scmp.lt.u32.totalorder %s3437_s9, %s3701_s5 }
  0x1e   : > { %p3445_p8 = por %p3444_p7, %p3443_p5 }
  0x1f   : > { %p3441_p4 = pneg %p3440_p3 }
  0x20   : > { %p3447_p9 = por %p3446_p10, %p3445_p8 }
  0x22   : > { %p3448_p0 = pnand %p3447_p9, %p3441_p4 }
  0x24   : > { %3451 = shalt.err (!%p3448_p0)
}
  0x25   : > { %s3452_s29 = scalar_lea.vmem %s3704_s7, 512  ;;  %s3599_s4 = smov [#allocation5]  }
  0x26   : > { %p3453_p1 = scmp.ne.s32.totalorder %s3704_s7, %s3452_s29  ;;  %s3457_s6 = sshll.u32 %s3599_s4, 4  ;;  %s3458_s6 = int_to_ptr.vmem [resolvable:$false] %s3457_s6 }
  0x27   : > { %s3459_s11 = scalar_lea.vmem %s3458_s6, 1024  ;;  %p3460_p11 = scmp.lt.s32.totalorder %s3704_s7, %s3458_s6 }
  0x28   : > { %p3455_p3 = pnand %p3453_p1, %p3713_p2  ;;  %p3461_p6 = scmp.lt.s32.totalorder %s3459_s11, %s3452_s29 }
  0x2a   : > { %p3456_p12 = pneg %p3455_p3  ;;  %p3462_p5 = por %p3461_p6, %p3460_p11 }
  0x2c   : > { %p3463_p7 = pnand %p3462_p5, %p3456_p12 }
  0x2e   : > { %3466 = shalt.err (!%p3463_p7)
}
  0x2f   : > { %s5307_s9 = smov 256   ;;  %s5309_s17 = smov 16  }
  0x30   : > { %3096 = dma.hbm_to_vmem [thread:$0]  (!%p3692_p13), %s3701_s5, 512, %s3704_s7, %s3707_s8, %s5307_s9, %s5307_s9, %s5309_s17  }
  0x31   : > { %p208_p6 = scmp.lt.s32.totalorder %s3597_s15, 3  ;;  %s5317_s0 = sld [smem:[#allocation12_spill]] }
  0x32   : > { %p5318_p9 = scmp.ge.s32.totalorder %s3597_s15, 1  ;;  %s148_s4 = scalar_lea.vmem [#allocation2], %s3690_s27 }
  0x33   : > { %s156_s6 = sshll.u32 %s148_s4, 4  ;;  %s3758_s5 = scalar_lea.sflag [#allocation3], %s144_s25  ;;  %s3754_s6 = int_to_ptr.vmem [resolvable:$true] %s156_s6 }
  0x34   : > { %p3749_p11 = pnand %p5318_p9, %p208_p6 }
  0x36   : > { %s5319_s29 = scalar_select %p3749_p11, 1, 0 }
  0x37   : > { %s3745_s30 = scalar_lea.hbm %s5317_s0, %s3686_s26  ;;  %s3472_s20 = scalar_lea.hbm %s5317_s0, 1024 }
  0x38   : > { %s3467_s7 = scalar_lea.hbm %s3745_s30, 512  ;;  %p3473_p8 = scmp.lt.u32.totalorder %s3745_s30, %s5317_s0 }
  0x39   : > { %p3468_p12 = scmp.ne.s32.totalorder %s3745_s30, %s3467_s7  ;;  %p3474_p10 = scmp.lt.u32.totalorder %s3472_s20, %s3467_s7 }
  0x3a   : > { %p3476_p3 = scmp.lt.u32.totalorder %s3467_s7, %s3745_s30 }
  0x3b   : > { %p3470_p0 = pnand %p3468_p12, %p3713_p2  ;;  %p3475_p1 = por %p3474_p10, %p3473_p8 }
  0x3d   : > { %p3471_p4 = pneg %p3470_p0  ;;  %p3477_p5 = por %p3476_p3, %p3475_p1 }
  0x3f   : > { %p3478_p7 = pnand %p3477_p5, %p3471_p4 }
  0x41   : > { %3481 = shalt.err (!%p3478_p7)
}
  0x42   : > { %s3482_s25 = scalar_lea.vmem %s3754_s6, 512  ;;  %s3602_s4 = smov [#allocation2]  }
  0x43   : > { %p3483_p6 = scmp.ne.s32.totalorder %s3754_s6, %s3482_s25  ;;  %s3487_s11 = sshll.u32 %s3602_s4, 4  ;;  %s3488_s11 = int_to_ptr.vmem [resolvable:$false] %s3487_s11 }
  0x44   : > { %s3489_s9 = scalar_lea.vmem %s3488_s11, 1024  ;;  %p3490_p0 = scmp.lt.s32.totalorder %s3754_s6, %s3488_s11 }
  0x45   : > { %p3485_p9 = pnand %p3483_p6, %p3713_p2  ;;  %p3491_p11 = scmp.lt.s32.totalorder %s3489_s9, %s3482_s25 }
  0x47   : > { %p3486_p12 = pneg %p3485_p9  ;;  %p3492_p8 = por %p3491_p11, %p3490_p0 }
  0x49   : > { %p3493_p10 = pnand %p3492_p8, %p3486_p12 }
  0x4b   : > { %3496 = shalt.err (!%p3493_p10)
}
  0x4c   : > { %s5320_s17 = smov 16   ;;  %s5321_s7 = smov 256  }
  0x4d   : > { %3093 = dma.hbm_to_vmem [thread:$0]  (!%p3692_p13), %s3745_s30, 512, %s3754_s6, %s3758_s5, %s5321_s7, %s5321_s7, %s5320_s17  }
  0x4e   : > { %s3789_s4 = scalar_lea.hbm %s5303_s2, %s3686_s26  ;;  %s192_s25 = scalar_lea.vmem [#allocation7], %s3690_s27 }
  0x4f   : > { %s200_s11 = sshll.u32 %s192_s25, 4  ;;  %s3497_s9 = scalar_lea.hbm %s3789_s4, 512  ;;  %s3792_s11 = int_to_ptr.vmem [resolvable:$true] %s200_s11 }
  0x50   : > { %p3498_p11 = scmp.ne.s32.totalorder %s3789_s4, %s3497_s9  ;;  %s3502_s6 = scalar_lea.hbm %s5303_s2, 1024 }
  0x51   : > { %p3503_p3 = scmp.lt.u32.totalorder %s3789_s4, %s5303_s2  ;;  %p3504_p5 = scmp.lt.u32.totalorder %s3502_s6, %s3497_s9 }
  0x52   : > { %p3500_p4 = pnand %p3498_p11, %p3713_p2  ;;  %p3506_p6 = scmp.lt.u32.totalorder %s3497_s9, %s3789_s4 }
  0x53   : > { %p3505_p7 = por %p3504_p5, %p3503_p3 }
  0x54   : > { %p3501_p1 = pneg %p3500_p4 }
  0x55   : > { %p3507_p9 = por %p3506_p6, %p3505_p7 }
  0x57   : > { %p3508_p12 = pnand %p3507_p9, %p3501_p1 }
  0x59   : > { %3511 = shalt.err (!%p3508_p12)
}
  0x5a   : > { %s3512_s27 = scalar_lea.vmem %s3792_s11, 512  ;;  %s3603_s0 = smov [#allocation7]  }
  0x5b   : > { %p3513_p0 = scmp.ne.s32.totalorder %s3792_s11, %s3512_s27  ;;  %s3517_s19 = sshll.u32 %s3603_s0, 4  ;;  %s3518_s19 = int_to_ptr.vmem [resolvable:$false] %s3517_s19 }
  0x5c   : > { %s3519_s20 = scalar_lea.vmem %s3518_s19, 1024  ;;  %p3520_p11 = scmp.lt.s32.totalorder %s3792_s11, %s3518_s19 }
  0x5d   : > { %p3515_p8 = pnand %p3513_p0, %p3713_p2  ;;  %p3521_p4 = scmp.lt.s32.totalorder %s3519_s20, %s3512_s27 }
  0x5f   : > { %p3516_p10 = pneg %p3515_p8  ;;  %p3522_p3 = por %p3521_p4, %p3520_p11 }
  0x61   : > { %p3523_p5 = pnand %p3522_p3, %p3516_p10 }
  0x63   : > { %3526 = shalt.err (!%p3523_p5)
}
  0x64   : > { %3099 = dma.hbm_to_vmem [thread:$0]  (!%p3692_p13), %s3789_s4, 512, %s3792_s11, %s3707_s8, %s5321_s7, %s5321_s7, %s5320_s17  }
  0x65   : > { %p5322_p2 = scmp.ne.s32.totalorder %s5319_s29, 0 }
  0x66   : > { %s3822_s10 = sand.u32 (!%p5322_p2), 1, %s3589_s13   ;;  %p5323_p1 = scmp.ne.s32.totalorder (!%p5322_p2), %s5312_s22, 0 }
  0x67   : > { %212 = sbr.rel (%p5322_p2) target bundleno = 13059 (0x3303), region = 32  ;;  %s3825_s25 = sshll.u32 (!%p5322_p2), %s3822_s10, 5 }
  0x68   : > { %s215_s28 = scalar_lea.sflag (!%p5322_p2), [#allocation3], %s3822_s10  ;;  %s3829_s9 = scalar_lea.vmem (!%p5322_p2), [#allocation2], %s3825_s25 }
  0x6e   : > { %3572 = dma.done.wait (%p5323_p1), %s215_s28, 512  }
  0x6f   : > { %3574 = vsyncadd (%p5323_p1), %s215_s28, 4294966784  ;;  %s223_s8 = sand.u32 1, %s3651_s16   ;;  %s3837_s17 = scalar_lea.vmem [#allocation5], %s3825_s25 }
  0x70   : > { %s224_s29 = scalar_lea.sflag [#allocation6], %s223_s8 }
  0x71   : > { %3576 = dma.done.wait (%p5323_p1), %s224_s29, 1024  }
  0x72   : > { %3578 = vsyncadd (%p5323_p1), %s224_s29, 4294966272  ;;  %v3844_v0 = vld [vmem:[%s3837_s17] sm:$0xff]  ;;  %s3604_s7 = smov 96   ;;  %v274_v3 = vld [vmem:[%s3829_s9 + $0x10] sm:$0xff]  ;;  %vm281_vm0 = vcmask 261120   ;;  %s3605_s22 = smov 32  }
  0x73   : > { %v273_v1 = vld [vmem:[%s3829_s9] sm:$0xff]  ;;  %290 = vrot.lane.b32.xlu1 %v3844_v0, %s3604_s7  ;;  %v3853_v4 = vld [vmem:[%s3837_s17 + $0x10] sm:$0xff]  ;;  %v3855_v5 = vmul.f32 0.17677669, %v274_v3  ;;  %s3606_s4 = smov 64   ;;  %v3880_v10 = vld [vmem:[%s3837_s17 + $0x8] sm:$0xff] }
  0x74   : > { %v3849_v2 = vmul.f32 0.17677669, %v273_v1  ;;  %v3887_v12 = vld [vmem:[%s3837_s17 + $0x18] sm:$0xff]  ;;  %s3994_s11 = scalar_lea.vmem [#allocation7], %s3825_s25  ;;  %s4056_s30 = scalar_lea.vmem [#allocation8], %s3825_s25  ;;  %vm896_vm1 = vcmask 523520  }
  0x75   : > { %v3863_v7 = vmul.f32 %v3853_v4, %v3855_v5  ;;  %v3893_v14 = vmul.f32 %v3887_v12, %v3855_v5  ;;  %vm1245_vm2 = vcmask 785920   ;;  %vm1594_vm3 = vcmask 1048320   ;;  %s3081_s6 = sshll.u32 %s3651_s16, 9  ;;  %s2932_s5 = sshll.u32 %s4056_s30, 4  ;;  %s5255_s5 = int_to_ptr.vmem [resolvable:$true] %s2932_s5 }
  0x76   : > { %v3859_v6 = vmul.f32 %v3844_v0, %v3849_v2  ;;  %v3884_v11 = vmul.f32 %v3880_v10, %v3849_v2  ;;  %s5253_s0 = scalar_lea.hbm %s5304_s3, %s3081_s6  ;;  %s2918_s19 = scalar_lea.sflag [#allocation4], %s3822_s10 }
  0x77   : > { %292 = vrot.lane.b32.xlu1 %v3853_v4, %s3604_s7  ;;  %v285_v9 = vsel %vm281_vm0, %v3863_v7, 0.0  ;;  %v339_v15 = vsel %vm281_vm0, %v3893_v14, 0.0  ;;  %s3527_s20 = scalar_lea.vmem %s5255_s5, 512  ;;  %p5324_p7 = scmp.ne.s32.totalorder %s5313_s23, 0 }
  0x78   : > { %v282_v8 = vsel %vm281_vm0, %v3859_v6, 0.0  ;;  %v336_v13 = vsel %vm281_vm0, %v3884_v11, 0.0  ;;  %p3528_p13 = scmp.ne.s32.totalorder %s5255_s5, %s3527_s20  ;;  %s3607_s16 = smov [#allocation8]  }
  0x79   : > { %283 = vadd.xlane.f32.xlu0 %v282_v8  ;;  %s3531_s25 = sshll.u32 %s3607_s16, 4  ;;  %s3532_s25 = int_to_ptr.vmem [resolvable:$false] %s3531_s25 }
  0x7a   : > { %p3529_p6 = pnand %p3528_p13, %p5324_p7  ;;  %s3533_s28 = scalar_lea.vmem %s3532_s25, 1024 }
  0x7b   : > { %318 = vrot.lane.b32.xlu1 %v3844_v0, %s3605_s22  ;;  %p3534_p12 = scmp.lt.s32.totalorder %s5255_s5, %s3532_s25  ;;  %p3535_p0 = scmp.lt.s32.totalorder %s3533_s28, %s3527_s20 }
  0x7c   : > { %p3530_p9 = pneg %p3529_p6 }
  0x7d   : > { %286 = vadd.xlane.f32.xlu0 %v285_v9  ;;  %p3536_p8 = por %p3535_p0, %p3534_p12 }
  0x7f   : > { %320 = vrot.lane.b32.xlu1 %v3853_v4, %s3605_s22  ;;  %p3537_p10 = pnand %p3536_p8, %p3530_p9 }
  0x93   : > { %304 = vrot.lane.b32.xlu0 %v3844_v0, %s3606_s4 }
  0x97   : > { %306 = vrot.lane.b32.xlu0 %v3853_v4, %s3606_s4 }
  0xb6   : > { %337 = vadd.xlane.f32.xlu0 %v336_v13 }
  0xba   : > { %340 = vadd.xlane.f32.xlu0 %v339_v15 }
  0xd0   : > { %344 = vrot.lane.b32.xlu0 %v3880_v10, %s3604_s7 }
  0xd4   : > { %346 = vrot.lane.b32.xlu0 %v3887_v12, %s3604_s7 }
  0xe5   : > { %v291_v16 = vpop.permute.xlu1 %290 }
  0xe6   : > { %v296_v19 = vmul.f32 %v291_v16, %v3849_v2 }
  0xe8   : > { %v298_v21 = vsel %vm281_vm0, %v296_v19, 0.0 }
  0xe9   : > { %v293_v17 = vpop.permute.xlu1 %292 }
  0xea   : > { %v297_v18 = vmul.f32 %v293_v17, %v3855_v5 }
  0xec   : > { %v301_v20 = vsel %vm281_vm0, %v297_v18, 0.0 }
  0xed   : > { %302 = vadd.xlane.f32.xlu1 %v301_v20  ;;  %v319_v24 = vpop.permute.xlu1 %318 }
  0xee   : > { %v324_v27 = vmul.f32 %v319_v24, %v3849_v2 }
  0xf0   : > { %v326_v33 = vsel %vm281_vm0, %v324_v27, 0.0 }
  0xf1   : > { %v321_v28 = vpop.permute.xlu1 %320 }
  0xf2   : > { %v325_v32 = vmul.f32 %v321_v28, %v3855_v5 }
  0xf3   : > { %299 = vadd.xlane.f32.xlu0 %v298_v21 }
  0xf4   : > { %v329_v35 = vsel %vm281_vm0, %v325_v32, 0.0 }
 0x106   : > { %v3905_v22 = vpop.xlane.xlu0 %283 }
 0x10a   : > { %v3907_v23 = vpop.xlane.xlu0 %286 }
 0x10e   : > { %v305_v25 = vpop.permute.xlu0 %304 }
 0x10f   : > { %v310_v26 = vmul.f32 %v305_v25, %v3849_v2 }
 0x111   : > { %v312_v29 = vsel %vm281_vm0, %v310_v26, 0.0 }
 0x112   : > { %313 = vadd.xlane.f32.xlu0 %v312_v29  ;;  %v307_v30 = vpop.permute.xlu0 %306 }
 0x113   : > { %v311_v31 = vmul.f32 %v307_v30, %v3855_v5 }
 0x115   : > { %v315_v34 = vsel %vm281_vm0, %v311_v31, 0.0 }
 0x116   : > { %327 = vadd.xlane.f32.xlu0 %v326_v33  ;;  %316 = vadd.xlane.f32.xlu1 %v315_v34 }
 0x11a   : > { %330 = vadd.xlane.f32.xlu1 %v329_v35 }
 0x143   : > { %v3917_v36 = vpop.xlane.xlu0 %337 }
 0x147   : > { %v3919_v37 = vpop.xlane.xlu0 %340 }
 0x14b   : > { %v345_v38 = vpop.permute.xlu0 %344 }
 0x14c   : > { %v350_v39 = vmul.f32 %v345_v38, %v3849_v2 }
 0x14e   : > { %v352_v40 = vsel %vm281_vm0, %v350_v39, 0.0 }
 0x14f   : > { %353 = vadd.xlane.f32.xlu1 %v352_v40  ;;  %v347_v41 = vpop.permute.xlu0 %346 }
 0x150   : > { %v351_v42 = vmul.f32 %v347_v41, %v3855_v5 }
 0x152   : > { %v355_v43 = vsel %vm281_vm0, %v351_v42, 0.0 }
 0x153   : > { %356 = vadd.xlane.f32.xlu0 %v355_v43 }
 0x160   : > { %358 = vrot.lane.b32.xlu1 %v3880_v10, %s3606_s4 }
 0x164   : > { %360 = vrot.lane.b32.xlu1 %v3887_v12, %s3606_s4 }
 0x17a   : > { %v303_v44 = vpop.xlane.xlu1 %302 }
 0x17b   : > { %v387_v8 = vmax.f32 %v3907_v23, %v303_v44 }
 0x180   : > { %v300_v54 = vpop.xlane.xlu0 %299 }
 0x181   : > { %v386_v3 = vmax.f32 %v3905_v22, %v300_v54 }
 0x19f   : > { %v314_v55 = vpop.xlane.xlu0 %313 }
 0x1a0   : > { %v388_v9 = vmax.f32 %v386_v3, %v314_v55 }
 0x1a3   : > { %v3929_v45 = vpop.xlane.xlu1 %316  ;;  %v328_v56 = vpop.xlane.xlu0 %327 }
 0x1a4   : > { %v389_v13 = vmax.f32 %v387_v8, %v3929_v45  ;;  %v390_v15 = vmax.f32 %v388_v9, %v328_v56 }
 0x1a6   : > { %v392_v18 = vmax.f32 %v390_v15, %v3917_v36 }
 0x1a7   : > { %v3931_v46 = vpop.xlane.xlu1 %330 }
 0x1a8   : > { %v391_v16 = vmax.f32 %v389_v13, %v3931_v46 }
 0x1aa   : > { %v393_v19 = vmax.f32 %v391_v16, %v3919_v37 }
 0x1dc   : > { %v3933_v47 = vpop.xlane.xlu1 %353 }
 0x1dd   : > { %v394_v21 = vmax.f32 %v392_v18, %v3933_v47 }
 0x1e0   : > { %v359_v48 = vpop.permute.xlu1 %358  ;;  %v3943_v57 = vpop.xlane.xlu0 %356 }
 0x1e1   : > { %v364_v49 = vmul.f32 %v359_v48, %v3849_v2  ;;  %v395_v24 = vmax.f32 %v393_v19, %v3943_v57 }
 0x1e3   : > { %v366_v50 = vsel %vm281_vm0, %v364_v49, 0.0 }
 0x1e4   : > { %367 = vadd.xlane.f32.xlu1 %v366_v50  ;;  %v361_v51 = vpop.permute.xlu1 %360 }
 0x1e5   : > { %v365_v52 = vmul.f32 %v361_v51, %v3855_v5 }
 0x1e7   : > { %v369_v53 = vsel %vm281_vm0, %v365_v52, 0.0 }
 0x1e8   : > { %370 = vadd.xlane.f32.xlu0 %v369_v53 }
 0x1fe   : > { %372 = vrot.lane.b32.xlu0 %v3880_v10, %s3605_s22 }
 0x202   : > { %374 = vrot.lane.b32.xlu0 %v3887_v12, %s3605_s22 }
 0x271   : > { %v368_v17 = vpop.xlane.xlu1 %367 }
 0x272   : > { %v396_v25 = vmax.f32 %v394_v21, %v368_v17 }
 0x275   : > { %v3945_v58 = vpop.xlane.xlu0 %370 }
 0x276   : > { %v397_v26 = vmax.f32 %v395_v24, %v3945_v58 }
 0x279   : > { %v373_v59 = vpop.permute.xlu0 %372 }
 0x27a   : > { %v378_v60 = vmul.f32 %v373_v59, %v3849_v2 }
 0x27c   : > { %v380_v61 = vsel %vm281_vm0, %v378_v60, 0.0 }
 0x27d   : > { %381 = vadd.xlane.f32.xlu1 %v380_v61  ;;  %v375_v62 = vpop.permute.xlu0 %374 }
 0x27e   : > { %v379_v63 = vmul.f32 %v375_v62, %v3855_v5 }
 0x280   : > { %v383_v1 = vsel %vm281_vm0, %v379_v63, 0.0 }
 0x281   : > { %384 = vadd.xlane.f32.xlu0 %v383_v1 }
 0x28e   : > { %558 = vrot.lane.b32.xlu1 %v3844_v0, %s3605_s22 }
 0x297   : > { %560 = vrot.lane.b32.xlu0 %v3853_v4, %s3605_s22 }
 0x30a   : > { %v382_v20 = vpop.xlane.xlu1 %381 }
 0x30b   : > { %v398_v29 = vmax.f32 %v396_v25, %v382_v20 }
 0x30d   : > { %v406_v34 = vsub.f32 %v300_v54, %v398_v29  ;;  %v400_v38 = vsub.f32 %v3905_v22, %v398_v29  ;;  %v412_v41 = vsub.f32 %v314_v55, %v398_v29  ;;  %v418_v48 = vsub.f32 %v328_v56, %v398_v29 }
 0x30e   : > { %v559_v27 = vpop.permute.xlu1 %558  ;;  %v385_v28 = vpop.xlane.xlu0 %384  ;;  %v436_v56 = vsub.f32 %v368_v17, %v398_v29 }
 0x30f   : > { %v564_v30 = vmul.f32 %v559_v27, %v3849_v2  ;;  %v399_v31 = vmax.f32 %v397_v26, %v385_v28  ;;  %v408_v40 = vmul.f32 1.442695, %v406_v34  ;;  %v402_v49 = vmul.f32 1.442695, %v400_v38 }
 0x310   : > { %v414_v52 = vmul.f32 1.442695, %v412_v41  ;;  %v420_v54 = vmul.f32 1.442695, %v418_v48  ;;  %v438_v63 = vmul.f32 1.442695, %v436_v56 }
 0x311   : > { %568 = vrot.lane.b32.xlu1 %v564_v30, %s3604_s7  ;;  %v407_v35 = vsub.f32 %v303_v44, %v399_v31  ;;  %v401_v39 = vsub.f32 %v3907_v23, %v399_v31  ;;  %v413_v43 = vsub.f32 %v3929_v45, %v399_v31  ;;  %v419_v50 = vsub.f32 %v3931_v46, %v399_v31  ;;  %v4023_v56 = vld [vmem:[%s3994_s11 + $0x8] sm:$0xff] }
 0x312   : > { %v561_v32 = vpop.permute.xlu0 %560  ;;  %3145 = vpow2.f32 %v408_v40  ;;  %v424_v44 = vsub.f32 %v3917_v36, %v398_v29  ;;  %v425_v22 = vsub.f32 %v3919_v37, %v399_v31  ;;  %v430_v23 = vsub.f32 %v3933_v47, %v398_v29 }
 0x313   : > { %v565_v33 = vmul.f32 %v561_v32, %v3855_v5  ;;  %v410_v42 = vmul.f32 1.442695, %v407_v35  ;;  %v404_v51 = vmul.f32 1.442695, %v401_v39  ;;  %v416_v53 = vmul.f32 1.442695, %v413_v43 }
 0x314   : > { %v422_v55 = vmul.f32 1.442695, %v419_v50  ;;  %v431_v45 = vsub.f32 %v3943_v57, %v399_v31  ;;  %v426_v46 = vmul.f32 1.442695, %v424_v44  ;;  %v437_v59 = vsub.f32 %v3945_v58, %v399_v31 }
 0x315   : > { %570 = vrot.lane.b32.xlu0 %v565_v33, %s3604_s7  ;;  %3147 = vpow2.f32 %v410_v42  ;;  %v428_v60 = vmul.f32 1.442695, %v425_v22  ;;  %v442_v36 = vsub.f32 %v382_v20, %v398_v29  ;;  %v432_v61 = vmul.f32 1.442695, %v430_v23 }
 0x316   : > { %3149 = vpow2.f32 %v402_v49  ;;  %v443_v62 = vsub.f32 %v385_v28, %v399_v31  ;;  %v434_v37 = vmul.f32 1.442695, %v431_v45  ;;  %v440_v47 = vmul.f32 1.442695, %v437_v59 }
 0x317   : > { %3151 = vpow2.f32 %v404_v51  ;;  %v444_v57 = vmul.f32 1.442695, %v442_v36 }
 0x318   : > { %3153 = vpow2.f32 %v414_v52  ;;  %v446_v8 = vmul.f32 1.442695, %v443_v62  ;;  %v3997_v52 = vld [vmem:[%s3994_s11] sm:$0xff] }
 0x319   : > { %3155 = vpow2.f32 %v416_v53  ;;  %v4003_v53 = vld [vmem:[%s3994_s11 + $0x10] sm:$0xff] }
 0x31a   : > { %3157 = vpow2.f32 %v420_v54 }
 0x31b   : > { %3159 = vpow2.f32 %v422_v55 }
 0x31c   : > { %3161 = vpow2.f32 %v426_v46  ;;  %v3146_v1 = vpop.eup %3145 }
 0x31d   : > { %3163 = vpow2.f32 %v428_v60  ;;  %v466_v44 = vmul.f32 %v3146_v1, %v3997_v52 }
 0x31e   : > { %3165 = vpow2.f32 %v432_v61 }
 0x31f   : > { %v3148_v3 = vpop.eup %3147  ;;  %3167 = vpow2.f32 %v434_v37 }
 0x320   : > { %v3977_v9 = vpop.eup %3149  ;;  %3169 = vpow2.f32 %v438_v63  ;;  %v467_v22 = vmul.f32 %v3148_v3, %v4003_v53 }
 0x321   : > { %v3979_v58 = vpop.eup %3151  ;;  %3171 = vpow2.f32 %v440_v47  ;;  %v448_v13 = vadd.f32 %v3977_v9, %v3146_v1 }
 0x322   : > { %v3154_v15 = vpop.eup %3153  ;;  %3173 = vpow2.f32 %v444_v57  ;;  %v449_v16 = vadd.f32 %v3979_v58, %v3148_v3 }
 0x323   : > { %v3156_v17 = vpop.eup %3155  ;;  %3175 = vpow2.f32 %v446_v8  ;;  %v450_v18 = vadd.f32 %v3154_v15, %v448_v13  ;;  %v478_v54 = vmul.f32 %v3154_v15, %v3997_v52 }
 0x324   : > { %v3158_v19 = vpop.eup %3157  ;;  %v451_v20 = vadd.f32 %v3156_v17, %v449_v16  ;;  %v479_v55 = vmul.f32 %v3156_v17, %v4003_v53  ;;  %v464_v17 = vmul.f32 %v3977_v9, %v3997_v52 }
 0x325   : > { %v3160_v21 = vpop.eup %3159  ;;  %v452_v24 = vadd.f32 %v3158_v19, %v450_v18  ;;  %v490_v23 = vmul.f32 %v3158_v19, %v3997_v52  ;;  %v465_v18 = vmul.f32 %v3979_v58, %v4003_v53 }
 0x326   : > { %v3983_v25 = vpop.eup %3161  ;;  %v453_v26 = vadd.f32 %v3160_v21, %v451_v20 }
 0x327   : > { %v3985_v27 = vpop.eup %3163  ;;  %v454_v28 = vadd.f32 %v3983_v25, %v452_v24 }
 0x328   : > { %v3166_v29 = vpop.eup %3165  ;;  %v455_v30 = vadd.f32 %v3985_v27, %v453_v26 }
 0x329   : > { %v3168_v31 = vpop.eup %3167  ;;  %v456_v32 = vadd.f32 %v3166_v29, %v454_v28  ;;  %v508_v46 = vmul.f32 %v3166_v29, %v4023_v56 }
 0x32a   : > { %v3170_v33 = vpop.eup %3169  ;;  %v457_v34 = vadd.f32 %v3168_v31, %v455_v30 }
 0x32b   : > { %v3172_v35 = vpop.eup %3171  ;;  %v458_v38 = vadd.f32 %v3170_v33, %v456_v32  ;;  %v520_v60 = vmul.f32 %v3170_v33, %v4023_v56  ;;  %v504_v32 = vmul.f32 %v3983_v25, %v4023_v56 }
 0x32c   : > { %v3174_v39 = vpop.eup %3173  ;;  %v459_v40 = vadd.f32 %v3172_v35, %v457_v34 }
 0x32d   : > { %v3176_v41 = vpop.eup %3175  ;;  %v3989_v42 = vadd.f32 %v3174_v39, %v458_v38  ;;  %v532_v61 = vmul.f32 %v3174_v39, %v4023_v56 }
 0x32e   : > { %v461_v43 = vadd.f32 %v3176_v41, %v459_v40 }
 0x330   : > { %3177 = vrcp.f32 %v461_v43 }
 0x331   : > { %3179 = vrcp.f32 %v3989_v42 }
 0x383   : > { %v569_v48 = vpop.permute.xlu1 %568 }
 0x384   : > { %v574_v49 = vsel %vm281_vm0, %v569_v48, 0.0 }
 0x385   : > { %575 = vadd.xlane.f32.xlu1 %v574_v49  ;;  %v3178_v49 = vpop.eup %3177 }
 0x387   : > { %v571_v50 = vpop.permute.xlu0 %570 }
 0x388   : > { %v577_v51 = vsel %vm281_vm0, %v571_v50, 0.0 }
 0x389   : > { %578 = vadd.xlane.f32.xlu0 %v577_v51 }
 0x396   : > { %586 = vrot.lane.b32.xlu1 %v3863_v7, %s3604_s7  ;;  %v4014_v7 = vld [vmem:[%s3994_s11 + $0x18] sm:$0xff] }
 0x397   : > { %v533_v45 = vmul.f32 %v3176_v41, %v4014_v7  ;;  %v509_v59 = vmul.f32 %v3168_v31, %v4014_v7  ;;  %v521_v36 = vmul.f32 %v3172_v35, %v4014_v7  ;;  %v505_v9 = vmul.f32 %v3985_v27, %v4014_v7 }
 0x39a   : > { %470 = vrot.lane.b32.xlu1 %v466_v44, %s3604_s7  ;;  %v3180_v44 = vpop.eup %3179 }
 0x39e   : > { %472 = vrot.lane.b32.xlu1 %v467_v22, %s3604_s7 }
 0x39f   : > { %584 = vrot.lane.b32.xlu0 %v3859_v6, %s3604_s7  ;;  %v491_v6 = vmul.f32 %v3160_v21, %v4003_v53 }
 0x3a2   : > { %482 = vrot.lane.b32.xlu1 %v478_v54, %s3606_s4 }
 0x3a3   : > { %494 = vrot.lane.b32.xlu0 %v490_v23, %s3605_s22 }
 0x3a6   : > { %484 = vrot.lane.b32.xlu1 %v479_v55, %s3606_s4 }
 0x3a7   : > { %538 = vrot.lane.b32.xlu0 %v533_v45, %s3605_s22 }
 0x3aa   : > { %496 = vrot.lane.b32.xlu1 %v491_v6, %s3605_s22 }
 0x3ae   : > { %512 = vrot.lane.b32.xlu1 %v508_v46, %s3604_s7 }
 0x3b2   : > { %514 = vrot.lane.b32.xlu1 %v509_v59, %s3604_s7 }
 0x3b6   : > { %524 = vrot.lane.b32.xlu1 %v520_v60, %s3606_s4 }
 0x3ba   : > { %526 = vrot.lane.b32.xlu1 %v521_v36, %s3606_s4 }
 0x3be   : > { %536 = vrot.lane.b32.xlu1 %v532_v61, %s3605_s22 }
 0x412   : > { %v4036_v62 = vpop.xlane.xlu1 %575 }
 0x416   : > { %v587_v37 = vpop.permute.xlu1 %586  ;;  %v4038_v63 = vpop.xlane.xlu0 %578 }
 0x417   : > { %v593_v47 = vsel %vm281_vm0, %v587_v37, 0.0 }
 0x418   : > { %594 = vadd.xlane.f32.xlu0 %v593_v47 }
 0x41a   : > { %v471_v1 = vpop.permute.xlu1 %470  ;;  %v585_v57 = vpop.permute.xlu0 %584 }
 0x41b   : > { %v590_v3 = vsel %vm281_vm0, %v585_v57, 0.0  ;;  %v476_v20 = vadd.f32 %v471_v1, %v464_v17 }
 0x41c   : > { %591 = vadd.xlane.f32.xlu1 %v590_v3 }
 0x41e   : > { %v473_v8 = vpop.permute.xlu1 %472  ;;  %v495_v30 = vpop.permute.xlu0 %494 }
 0x41f   : > { %v477_v21 = vadd.f32 %v473_v8, %v465_v18 }
 0x422   : > { %v483_v13 = vpop.permute.xlu1 %482  ;;  %v539_v41 = vpop.permute.xlu0 %538 }
 0x423   : > { %v488_v24 = vadd.f32 %v483_v13, %v476_v20 }
 0x425   : > { %v500_v31 = vadd.f32 %v495_v30, %v488_v24 }
 0x426   : > { %v485_v15 = vpop.permute.xlu1 %484 }
 0x427   : > { %v489_v26 = vadd.f32 %v485_v15, %v477_v21  ;;  %v506_v34 = vadd.f32 %v504_v32, %v500_v31 }
 0x42a   : > { %v497_v16 = vpop.permute.xlu1 %496 }
 0x42b   : > { %v501_v29 = vadd.f32 %v497_v16, %v489_v26 }
 0x42d   : > { %598 = vrot.lane.b32.xlu1 %v3853_v4, %s3604_s7  ;;  %v507_v33 = vadd.f32 %v505_v9, %v501_v29 }
 0x42e   : > { %v513_v19 = vpop.permute.xlu1 %512  ;;  %596 = vrot.lane.b32.xlu0 %v3844_v0, %s3604_s7 }
 0x42f   : > { %v518_v39 = vadd.f32 %v513_v19, %v506_v34 }
 0x432   : > { %v515_v28 = vpop.permute.xlu1 %514 }
 0x433   : > { %v519_v35 = vadd.f32 %v515_v28, %v507_v33 }
 0x436   : > { %v525_v58 = vpop.permute.xlu1 %524 }
 0x437   : > { %v530_v48 = vadd.f32 %v525_v58, %v518_v39 }
 0x43a   : > { %v527_v38 = vpop.permute.xlu1 %526 }
 0x43b   : > { %v531_v40 = vadd.f32 %v527_v38, %v519_v35 }
 0x43d   : > { %v543_v43 = vadd.f32 %v539_v41, %v531_v40 }
 0x43e   : > { %v537_v50 = vpop.permute.xlu1 %536 }
 0x43f   : > { %v547_v51 = vmul.f32 %v3178_v49, %v543_v43  ;;  %v542_v27 = vadd.f32 %v537_v50, %v530_v48 }
 0x441   : > { %v546_v22 = vmul.f32 %v3180_v44, %v542_v27  ;;  %549 = vst.msk [vmem:[%s4056_s30 + $0x10] sm:$0xff] %vm281_vm0, %v547_v51 }
 0x443   : > { %548 = vst.msk [vmem:[%s4056_s30] sm:$0xff] %vm281_vm0, %v546_v22 }
 0x4a5   : > { %v4062_v25 = vpop.xlane.xlu0 %594 }
 0x4a9   : > { %v4064_v42 = vpop.xlane.xlu1 %591  ;;  %v597_v54 = vpop.permute.xlu0 %596 }
 0x4aa   : > { %v602_v23 = vmul.f32 %v597_v54, %v3849_v2  ;;  %v727_v54 = vmax.f32 %v4038_v63, %v4062_v25 }
 0x4ac   : > { %606 = vrot.lane.b32.xlu1 %v602_v23, %s3604_s7  ;;  %v726_v23 = vmax.f32 %v4036_v62, %v4064_v42 }
 0x4ad   : > { %v599_v55 = vpop.permute.xlu1 %598 }
 0x4ae   : > { %v603_v45 = vmul.f32 %v599_v55, %v3855_v5 }
 0x4b0   : > { %608 = vrot.lane.b32.xlu0 %v603_v45, %s3604_s7 }
 0x51e   : > { %v607_v6 = vpop.permute.xlu1 %606 }
 0x51f   : > { %v612_v46 = vsel %vm281_vm0, %v607_v6, 0.0 }
 0x520   : > { %613 = vadd.xlane.f32.xlu1 %v612_v46 }
 0x522   : > { %v609_v59 = vpop.permute.xlu0 %608 }
 0x523   : > { %v615_v60 = vsel %vm281_vm0, %v609_v59, 0.0 }
 0x524   : > { %616 = vadd.xlane.f32.xlu0 %v615_v60 }
 0x531   : > { %620 = vrot.lane.b32.xlu1 %v3853_v4, %s3606_s4 }
 0x53a   : > { %618 = vrot.lane.b32.xlu0 %v3844_v0, %s3606_s4 }
 0x5ad   : > { %v4076_v36 = vpop.xlane.xlu1 %613 }
 0x5ae   : > { %v728_v45 = vmax.f32 %v726_v23, %v4076_v36 }
 0x5b1   : > { %v621_v61 = vpop.permute.xlu1 %620  ;;  %v4078_v37 = vpop.xlane.xlu0 %616 }
 0x5b2   : > { %v625_v47 = vmul.f32 %v621_v61, %v3855_v5 }
 0x5b4   : > { %630 = vrot.lane.b32.xlu0 %v625_v47, %s3604_s7 }
 0x5b5   : > { %v619_v1 = vpop.permute.xlu0 %618 }
 0x5b6   : > { %v624_v57 = vmul.f32 %v619_v1, %v3849_v2 }
 0x5b8   : > { %628 = vrot.lane.b32.xlu1 %v624_v57, %s3604_s7 }
 0x626   : > { %v631_v3 = vpop.permute.xlu0 %630 }
 0x627   : > { %v637_v4 = vsel %vm281_vm0, %v631_v3, 0.0 }
 0x628   : > { %638 = vadd.xlane.f32.xlu0 %v637_v4 }
 0x62a   : > { %v629_v8 = vpop.permute.xlu1 %628 }
 0x62b   : > { %v634_v0 = vsel %vm281_vm0, %v629_v8, 0.0 }
 0x62c   : > { %635 = vadd.xlane.f32.xlu1 %v634_v0 }
 0x63d   : > { %646 = vrot.lane.b32.xlu1 %v3887_v12, %s3605_s22 }
 0x63e   : > { %644 = vrot.lane.b32.xlu0 %v3880_v10, %s3605_s22 }
 0x6b5   : > { %v4090_v13 = vpop.xlane.xlu0 %638 }
 0x6b9   : > { %v4092_v15 = vpop.xlane.xlu1 %635  ;;  %v645_v16 = vpop.permute.xlu0 %644 }
 0x6ba   : > { %v650_v17 = vmul.f32 %v645_v16, %v3849_v2  ;;  %v730_v46 = vmax.f32 %v728_v45, %v4092_v15 }
 0x6bc   : > { %654 = vrot.lane.b32.xlu1 %v650_v17, %s3604_s7 }
 0x6bd   : > { %v647_v18 = vpop.permute.xlu1 %646 }
 0x6be   : > { %v651_v19 = vmul.f32 %v647_v18, %v3855_v5 }
 0x6c0   : > { %656 = vrot.lane.b32.xlu0 %v651_v19, %s3604_s7 }
 0x72e   : > { %v655_v20 = vpop.permute.xlu1 %654 }
 0x72f   : > { %v660_v21 = vsel %vm281_vm0, %v655_v20, 0.0 }
 0x730   : > { %661 = vadd.xlane.f32.xlu1 %v660_v21 }
 0x732   : > { %v657_v24 = vpop.permute.xlu0 %656 }
 0x733   : > { %v663_v26 = vsel %vm281_vm0, %v657_v24, 0.0 }
 0x734   : > { %664 = vadd.xlane.f32.xlu0 %v663_v26 }
 0x741   : > { %672 = vrot.lane.b32.xlu1 %v3893_v14, %s3604_s7 }
 0x74a   : > { %670 = vrot.lane.b32.xlu0 %v3884_v11, %s3604_s7 }
 0x7bd   : > { %v4104_v28 = vpop.xlane.xlu1 %661 }
 0x7be   : > { %v732_v60 = vmax.f32 %v730_v46, %v4104_v28 }
 0x7c1   : > { %v673_v29 = vpop.permute.xlu1 %672  ;;  %v4106_v30 = vpop.xlane.xlu0 %664 }
 0x7c2   : > { %v679_v31 = vsel %vm281_vm0, %v673_v29, 0.0 }
 0x7c3   : > { %680 = vadd.xlane.f32.xlu0 %v679_v31 }
 0x7c5   : > { %v671_v9 = vpop.permute.xlu0 %670 }
 0x7c6   : > { %v676_v58 = vsel %vm281_vm0, %v671_v9, 0.0 }
 0x7c7   : > { %677 = vadd.xlane.f32.xlu1 %v676_v58 }
 0x7d8   : > { %684 = vrot.lane.b32.xlu1 %v3887_v12, %s3604_s7 }
 0x7d9   : > { %682 = vrot.lane.b32.xlu0 %v3880_v10, %s3604_s7 }
 0x850   : > { %v4114_v14 = vpop.xlane.xlu0 %680 }
 0x854   : > { %v4116_v11 = vpop.xlane.xlu1 %677  ;;  %v683_v32 = vpop.permute.xlu0 %682 }
 0x855   : > { %v688_v33 = vmul.f32 %v683_v32, %v3849_v2  ;;  %v734_v1 = vmax.f32 %v732_v60, %v4116_v11 }
 0x857   : > { %692 = vrot.lane.b32.xlu1 %v688_v33, %s3604_s7 }
 0x858   : > { %v685_v34 = vpop.permute.xlu1 %684 }
 0x859   : > { %v689_v35 = vmul.f32 %v685_v34, %v3855_v5 }
 0x85b   : > { %694 = vrot.lane.b32.xlu0 %v689_v35, %s3604_s7 }
 0x8c9   : > { %v693_v38 = vpop.permute.xlu1 %692 }
 0x8ca   : > { %v698_v39 = vsel %vm281_vm0, %v693_v38, 0.0 }
 0x8cb   : > { %699 = vadd.xlane.f32.xlu1 %v698_v39 }
 0x8cd   : > { %v695_v40 = vpop.permute.xlu0 %694 }
 0x8ce   : > { %v701_v41 = vsel %vm281_vm0, %v695_v40, 0.0 }
 0x8cf   : > { %702 = vadd.xlane.f32.xlu0 %v701_v41 }
 0x8dc   : > { %706 = vrot.lane.b32.xlu1 %v3887_v12, %s3606_s4 }
 0x8e5   : > { %704 = vrot.lane.b32.xlu0 %v3880_v10, %s3606_s4 }
 0x958   : > { %v4128_v48 = vpop.xlane.xlu1 %699 }
 0x959   : > { %v736_v3 = vmax.f32 %v734_v1, %v4128_v48 }
 0x95c   : > { %v707_v43 = vpop.permute.xlu1 %706  ;;  %v4130_v49 = vpop.xlane.xlu0 %702 }
 0x95d   : > { %v711_v50 = vmul.f32 %v707_v43, %v3855_v5  ;;  %v729_v5 = vmax.f32 %v727_v54, %v4078_v37 }
 0x95f   : > { %716 = vrot.lane.b32.xlu0 %v711_v50, %s3604_s7  ;;  %v731_v55 = vmax.f32 %v729_v5, %v4090_v13 }
 0x960   : > { %v705_v51 = vpop.permute.xlu0 %704 }
 0x961   : > { %v710_v27 = vmul.f32 %v705_v51, %v3849_v2  ;;  %v733_v6 = vmax.f32 %v731_v55, %v4106_v30 }
 0x963   : > { %714 = vrot.lane.b32.xlu1 %v710_v27, %s3604_s7  ;;  %v735_v59 = vmax.f32 %v733_v6, %v4114_v14 }
 0x965   : > { %v737_v61 = vmax.f32 %v735_v59, %v4130_v49 }
 0x9d1   : > { %v717_v44 = vpop.permute.xlu0 %716 }
 0x9d2   : > { %v723_v12 = vsel %vm281_vm0, %v717_v44, 0.0 }
 0x9d3   : > { %724 = vadd.xlane.f32.xlu0 %v723_v12 }
 0x9d5   : > { %v715_v22 = vpop.permute.xlu1 %714 }
 0x9d6   : > { %v720_v10 = vsel %vm281_vm0, %v715_v22, 0.0 }
 0x9d7   : > { %721 = vadd.xlane.f32.xlu1 %v720_v10 }
 0xa60   : > { %v725_v47 = vpop.xlane.xlu0 %724 }
 0xa61   : > { %v739_v57 = vmax.f32 %v737_v61, %v725_v47 }
 0xa63   : > { %v747_v4 = vsub.f32 %v4062_v25, %v739_v57  ;;  %v753_v17 = vsub.f32 %v4078_v37, %v739_v57  ;;  %v759_v26 = vsub.f32 %v4090_v13, %v739_v57  ;;  %v741_v9 = vsub.f32 %v4038_v63, %v739_v57 }
 0xa64   : > { %v722_v8 = vpop.xlane.xlu1 %721  ;;  %v771_v58 = vsub.f32 %v4114_v14, %v739_v57  ;;  %v777_v13 = vsub.f32 %v4130_v49, %v739_v57 }
 0xa65   : > { %v738_v0 = vmax.f32 %v736_v3, %v722_v8  ;;  %v750_v16 = vmul.f32 1.442695, %v747_v4  ;;  %v756_v29 = vmul.f32 1.442695, %v753_v17  ;;  %v744_v32 = vmul.f32 1.442695, %v741_v9 }
 0xa66   : > { %v774_v34 = vmul.f32 1.442695, %v771_v58  ;;  %v780_v14 = vmul.f32 1.442695, %v777_v13 }
 0xa67   : > { %v746_v18 = vsub.f32 %v4064_v42, %v738_v0  ;;  %v752_v19 = vsub.f32 %v4076_v36, %v738_v0  ;;  %3181 = vpow2.f32 %v750_v16  ;;  %v758_v20 = vsub.f32 %v4092_v15, %v738_v0 }
 0xa68   : > { %v770_v31 = vsub.f32 %v4116_v11, %v738_v0  ;;  %v740_v37 = vsub.f32 %v4036_v62, %v738_v0  ;;  %v762_v42 = vmul.f32 1.442695, %v759_v26  ;;  %v776_v15 = vsub.f32 %v4128_v48, %v738_v0 }
 0xa69   : > { %v748_v21 = vmul.f32 1.442695, %v746_v18  ;;  %v754_v24 = vmul.f32 1.442695, %v752_v19  ;;  %v760_v25 = vmul.f32 1.442695, %v758_v20  ;;  %v765_v11 = vsub.f32 %v4106_v30, %v739_v57 }
 0xa6a   : > { %v772_v36 = vmul.f32 1.442695, %v770_v31  ;;  %v742_v33 = vmul.f32 1.442695, %v740_v37  ;;  %v764_v62 = vsub.f32 %v4104_v28, %v738_v0  ;;  %v782_v35 = vsub.f32 %v722_v8, %v738_v0 }
 0xa6b   : > { %3183 = vpow2.f32 %v748_v21  ;;  %v778_v39 = vmul.f32 1.442695, %v776_v15  ;;  %v768_v40 = vmul.f32 1.442695, %v765_v11  ;;  %v783_v48 = vsub.f32 %v725_v47, %v739_v57 }
 0xa6c   : > { %3185 = vpow2.f32 %v754_v24  ;;  %v766_v43 = vmul.f32 1.442695, %v764_v62  ;;  %v784_v49 = vmul.f32 1.442695, %v782_v35 }
 0xa6d   : > { %3187 = vpow2.f32 %v756_v29  ;;  %v786_v44 = vmul.f32 1.442695, %v783_v48 }
 0xa6e   : > { %3189 = vpow2.f32 %v760_v25 }
 0xa6f   : > { %3191 = vpow2.f32 %v762_v42 }
 0xa70   : > { %3193 = vpow2.f32 %v772_v36 }
 0xa71   : > { %v3182_v63 = vpop.eup %3181  ;;  %3195 = vpow2.f32 %v744_v32 }
 0xa72   : > { %v807_v38 = vmul.f32 %v3182_v63, %v4003_v53  ;;  %3197 = vpow2.f32 %v742_v33 }
 0xa73   : > { %3199 = vpow2.f32 %v774_v34 }
 0xa74   : > { %812 = vrot.lane.b32.xlu1 %v807_v38, %s3604_s7  ;;  %3201 = vpow2.f32 %v778_v39 }
 0xa75   : > { %v3184_v41 = vpop.eup %3183  ;;  %3203 = vpow2.f32 %v780_v14 }
 0xa76   : > { %v3186_v30 = vpop.eup %3185  ;;  %v806_v50 = vmul.f32 %v3184_v41, %v3997_v52  ;;  %3205 = vpow2.f32 %v768_v40 }
 0xa77   : > { %v3188_v28 = vpop.eup %3187  ;;  %v818_v51 = vmul.f32 %v3186_v30, %v3997_v52  ;;  %3207 = vpow2.f32 %v766_v43 }
 0xa78   : > { %v3190_v27 = vpop.eup %3189  ;;  %810 = vrot.lane.b32.xlu0 %v806_v50, %s3604_s7  ;;  %3209 = vpow2.f32 %v784_v49  ;;  %v819_v22 = vmul.f32 %v3188_v28, %v4003_v53 }
 0xa79   : > { %822 = vrot.lane.b32.xlu1 %v818_v51, %s3606_s4  ;;  %v3192_v12 = vpop.eup %3191  ;;  %v830_v54 = vmul.f32 %v3190_v27, %v3997_v52  ;;  %3211 = vpow2.f32 %v786_v44 }
 0xa7a   : > { %v3194_v10 = vpop.eup %3193  ;;  %v831_v45 = vmul.f32 %v3192_v12, %v4003_v53 }
 0xa7b   : > { %v3196_v5 = vpop.eup %3195  ;;  %v848_v59 = vmul.f32 %v3194_v10, %v4023_v56 }
 0xa7c   : > { %824 = vrot.lane.b32.xlu0 %v819_v22, %s3606_s4  ;;  %v3198_v23 = vpop.eup %3197  ;;  %v789_v55 = vadd.f32 %v3196_v5, %v3182_v63  ;;  %v805_v33 = vmul.f32 %v3196_v5, %v4003_v53 }
 0xa7d   : > { %834 = vrot.lane.b32.xlu1 %v830_v54, %s3605_s22  ;;  %v788_v6 = vadd.f32 %v3198_v23, %v3184_v41  ;;  %v3200_v46 = vpop.eup %3199  ;;  %v804_v58 = vmul.f32 %v3198_v23, %v3997_v52  ;;  %v3433_v23 = vld [vmem:[%s3837_s17] sm:$0xff] }
 0xa7e   : > { %v791_v60 = vadd.f32 %v3188_v28, %v789_v55  ;;  %v3202_v61 = vpop.eup %3201  ;;  %v849_v4 = vmul.f32 %v3200_v46, %v4014_v7  ;;  %v3434_v55 = vld [vmem:[%s3837_s17 + $0x10] sm:$0xff] }
 0xa7f   : > { %v790_v47 = vadd.f32 %v3186_v30, %v788_v6  ;;  %v3204_v1 = vpop.eup %3203  ;;  %v860_v16 = vmul.f32 %v3202_v61, %v4023_v56  ;;  %v900_v6 = vld [vmem:[%s3829_s9 + $0x10] sm:$0xff] }
 0xa80   : > { %836 = vrot.lane.b32.xlu0 %v831_v45, %s3605_s22  ;;  %v793_v57 = vadd.f32 %v3192_v12, %v791_v60  ;;  %v3206_v3 = vpop.eup %3205  ;;  %v861_v21 = vmul.f32 %v3204_v1, %v4014_v7  ;;  %v4205_v60 = vmul.f32 0.17677669, %v900_v6 }
 0xa81   : > { %852 = vrot.lane.b32.xlu1 %v848_v59, %s3604_s7  ;;  %v792_v8 = vadd.f32 %v3190_v27, %v790_v47  ;;  %v3208_v0 = vpop.eup %3207  ;;  %v845_v52 = vmul.f32 %v3206_v3, %v4014_v7 }
 0xa82   : > { %v795_v17 = vadd.f32 %v3206_v3, %v793_v57  ;;  %v3210_v18 = vpop.eup %3209  ;;  %v844_v39 = vmul.f32 %v3208_v0, %v4023_v56 }
 0xa83   : > { %v794_v19 = vadd.f32 %v3208_v0, %v792_v8  ;;  %v3212_v26 = vpop.eup %3211  ;;  %v872_v29 = vmul.f32 %v3210_v18, %v4023_v56 }
 0xa84   : > { %854 = vrot.lane.b32.xlu0 %v849_v4, %s3604_s7  ;;  %v797_v20 = vadd.f32 %v3200_v46, %v795_v17  ;;  %v873_v37 = vmul.f32 %v3212_v26, %v4014_v7 }
 0xa85   : > { %864 = vrot.lane.b32.xlu1 %v860_v16, %s3606_s4  ;;  %v796_v24 = vadd.f32 %v3194_v10, %v794_v19 }
 0xa86   : > { %v799_v31 = vadd.f32 %v3204_v1, %v797_v20 }
 0xa87   : > { %v798_v25 = vadd.f32 %v3202_v61, %v796_v24 }
 0xa88   : > { %866 = vrot.lane.b32.xlu0 %v861_v21, %s3606_s4  ;;  %v801_v9 = vadd.f32 %v3212_v26, %v799_v31  ;;  %v952_v31 = vmul.f32 %v3434_v55, %v4205_v60 }
 0xa89   : > { %876 = vrot.lane.b32.xlu1 %v872_v29, %s3605_s22  ;;  %v800_v42 = vadd.f32 %v3210_v18, %v798_v25  ;;  %v951_v25 = vmul.f32 %v3433_v23, %v3849_v2 }
 0xa8b   : > { %3213 = vrcp.f32 %v800_v42 }
 0xa8c   : > { %878 = vrot.lane.b32.xlu0 %v873_v37, %s3605_s22  ;;  %3215 = vrcp.f32 %v801_v9 }
 0xa95   : > { %v3214_v56 = vpop.eup %3213 }
 0xa96   : > { %v3216_v54 = vpop.eup %3215 }
 0xae6   : > { %v813_v36 = vpop.permute.xlu1 %812 }
 0xae7   : > { %v817_v34 = vadd.f32 %v813_v36, %v805_v33 }
 0xaea   : > { %v811_v15 = vpop.permute.xlu0 %810 }
 0xaeb   : > { %v823_v32 = vpop.permute.xlu1 %822  ;;  %v816_v13 = vadd.f32 %v811_v15, %v804_v58 }
 0xaed   : > { %v828_v11 = vadd.f32 %v823_v32, %v816_v13 }
 0xaee   : > { %v825_v63 = vpop.permute.xlu0 %824 }
 0xaef   : > { %v835_v62 = vpop.permute.xlu1 %834  ;;  %v829_v38 = vadd.f32 %v825_v63, %v817_v34 }
 0xaf0   : > { %v840_v35 = vadd.f32 %v835_v62, %v828_v11 }
 0xaf2   : > { %v837_v14 = vpop.permute.xlu0 %836  ;;  %v846_v48 = vadd.f32 %v844_v39, %v840_v35 }
 0xaf3   : > { %v853_v40 = vpop.permute.xlu1 %852  ;;  %v841_v41 = vadd.f32 %v837_v14, %v829_v38  ;;  %v4248_v14 = vld [vmem:[%s3837_s17 + $0x18] sm:$0xff] }
 0xaf4   : > { %v858_v53 = vadd.f32 %v853_v40, %v846_v48  ;;  %v4251_v40 = vld [vmem:[%s3837_s17 + $0x8] sm:$0xff] }
 0xaf5   : > { %v847_v49 = vadd.f32 %v845_v52, %v841_v41 }
 0xaf6   : > { %v855_v43 = vpop.permute.xlu0 %854 }
 0xaf7   : > { %v865_v30 = vpop.permute.xlu1 %864  ;;  %v859_v51 = vadd.f32 %v855_v43, %v847_v49 }
 0xaf8   : > { %v870_v50 = vadd.f32 %v865_v30, %v858_v53 }
 0xafa   : > { %v867_v28 = vpop.permute.xlu0 %866 }
 0xafb   : > { %v877_v27 = vpop.permute.xlu1 %876  ;;  %v871_v12 = vadd.f32 %v867_v28, %v859_v51 }
 0xafc   : > { %v882_v44 = vadd.f32 %v877_v27, %v870_v50 }
 0xafe   : > { %v886_v22 = vmul.f32 %v3214_v56, %v882_v44  ;;  %v879_v10 = vpop.permute.xlu0 %878 }
 0xaff   : > { %v883_v7 = vadd.f32 %v879_v10, %v871_v12 }
 0xb00   : > { %890 = vrot.lane.b32.xlu1 %v886_v22, %s3605_s22 }
 0xb01   : > { %v887_v5 = vmul.f32 %v3216_v54, %v883_v7 }
 0xb03   : > { %892 = vrot.lane.b32.xlu0 %v887_v5, %s3605_s22 }
 0xb04   : > { %907 = vrot.lane.b32.xlu1 %v3433_v23, %s3606_s4 }
 0xb07   : > { %909 = vrot.lane.b32.xlu0 %v3434_v55, %s3606_s4 }
 0xb72   : > { %v891_v45 = vpop.permute.xlu1 %890 }
 0xb73   : > { %897 = vst.msk [vmem:[%s4056_s30] sm:$0xff] %vm896_vm1, %v891_v45  ;;  %v1037_v45 = vmul.f32 %v4251_v40, %v3849_v2 }
 0xb75   : > { %v893_v46 = vpop.permute.xlu0 %892 }
 0xb76   : > { %v908_v59 = vpop.permute.xlu1 %907  ;;  %898 = vst.msk [vmem:[%s4056_s30 + $0x10] sm:$0xff] %vm896_vm1, %v893_v46 }
 0xb77   : > { %v913_v61 = vmul.f32 %v908_v59, %v3849_v2 }
 0xb79   : > { %917 = vrot.lane.b32.xlu1 %v913_v61, %s3606_s4  ;;  %v910_v47 = vpop.permute.xlu0 %909 }
 0xb7a   : > { %v914_v1 = vmul.f32 %v910_v47, %v4205_v60 }
 0xb7c   : > { %919 = vrot.lane.b32.xlu0 %v914_v1, %s3606_s4 }
 0xbeb   : > { %v918_v57 = vpop.permute.xlu1 %917 }
 0xbec   : > { %v923_v3 = vsel %vm281_vm0, %v918_v57, 0.0 }
 0xbed   : > { %924 = vadd.xlane.f32.xlu1 %v923_v3 }
 0xbee   : > { %v920_v4 = vpop.permute.xlu0 %919 }
 0xbef   : > { %v926_v8 = vsel %vm281_vm0, %v920_v4, 0.0 }
 0xbf0   : > { %927 = vadd.xlane.f32.xlu0 %v926_v8 }
 0xbfe   : > { %931 = vrot.lane.b32.xlu1 %v3434_v55, %s3605_s22 }
 0xc06   : > { %929 = vrot.lane.b32.xlu0 %v3433_v23, %s3605_s22 }
 0xc7a   : > { %v4215_v0 = vpop.xlane.xlu1 %924 }
 0xc7d   : > { %v4217_v16 = vpop.xlane.xlu0 %927 }
 0xc7e   : > { %v932_v17 = vpop.permute.xlu1 %931 }
 0xc7f   : > { %v936_v18 = vmul.f32 %v932_v17, %v4205_v60 }
 0xc81   : > { %941 = vrot.lane.b32.xlu0 %v936_v18, %s3606_s4  ;;  %v930_v19 = vpop.permute.xlu0 %929 }
 0xc82   : > { %v935_v20 = vmul.f32 %v930_v19, %v3849_v2 }
 0xc84   : > { %939 = vrot.lane.b32.xlu1 %v935_v20, %s3606_s4 }
 0xcf3   : > { %v942_v21 = vpop.permute.xlu0 %941 }
 0xcf4   : > { %v948_v24 = vsel %vm281_vm0, %v942_v21, 0.0 }
 0xcf5   : > { %949 = vadd.xlane.f32.xlu0 %v948_v24 }
 0xcf6   : > { %v940_v26 = vpop.permute.xlu1 %939 }
 0xcf7   : > { %v945_v29 = vsel %vm281_vm0, %v940_v26, 0.0 }
 0xcf8   : > { %946 = vadd.xlane.f32.xlu1 %v945_v29 }
 0xd09   : > { %957 = vrot.lane.b32.xlu1 %v952_v31, %s3606_s4 }
 0xd0b   : > { %955 = vrot.lane.b32.xlu0 %v951_v25, %s3606_s4 }
 0xd82   : > { %v4229_v9 = vpop.xlane.xlu0 %949 }
 0xd83   : > { %v1076_v26 = vmax.f32 %v4217_v16, %v4229_v9 }
 0xd85   : > { %v4231_v37 = vpop.xlane.xlu1 %946 }
 0xd86   : > { %v956_v42 = vpop.permute.xlu0 %955  ;;  %v1075_v31 = vmax.f32 %v4215_v0, %v4231_v37 }
 0xd87   : > { %v961_v36 = vsel %vm281_vm0, %v956_v42, 0.0 }
 0xd88   : > { %962 = vadd.xlane.f32.xlu1 %v961_v36 }
 0xd89   : > { %v958_v58 = vpop.permute.xlu1 %957 }
 0xd8a   : > { %v964_v15 = vsel %vm281_vm0, %v958_v58, 0.0 }
 0xd8b   : > { %965 = vadd.xlane.f32.xlu0 %v964_v15 }
 0xd99   : > { %969 = vrot.lane.b32.xlu1 %v3434_v55, %s3604_s7  ;;  %v4283_v55 = vmul.f32 %v4248_v14, %v4205_v60 }
 0xda1   : > { %967 = vrot.lane.b32.xlu0 %v3433_v23, %s3604_s7 }
 0xe15   : > { %v4237_v32 = vpop.xlane.xlu1 %962 }
 0xe16   : > { %v1077_v25 = vmax.f32 %v1075_v31, %v4237_v32  ;;  %v4350_v31 = vld [vmem:[%s3994_s11 + $0x8] sm:$0xff] }
 0xe18   : > { %v4239_v13 = vpop.xlane.xlu0 %965 }
 0xe19   : > { %v970_v33 = vpop.permute.xlu1 %969  ;;  %v1078_v29 = vmax.f32 %v1076_v26, %v4239_v13 }
 0xe1a   : > { %v974_v11 = vmul.f32 %v970_v33, %v4205_v60 }
 0xe1c   : > { %979 = vrot.lane.b32.xlu0 %v974_v11, %s3606_s4  ;;  %v968_v63 = vpop.permute.xlu0 %967 }
 0xe1d   : > { %v973_v34 = vmul.f32 %v968_v63, %v3849_v2 }
 0xe1f   : > { %977 = vrot.lane.b32.xlu1 %v973_v34, %s3606_s4 }
 0xe8e   : > { %v980_v62 = vpop.permute.xlu0 %979 }
 0xe8f   : > { %v986_v35 = vsel %vm281_vm0, %v980_v62, 0.0 }
 0xe90   : > { %987 = vadd.xlane.f32.xlu0 %v986_v35 }
 0xe91   : > { %v978_v38 = vpop.permute.xlu1 %977 }
 0xe92   : > { %v983_v39 = vsel %vm281_vm0, %v978_v38, 0.0 }
 0xe93   : > { %984 = vadd.xlane.f32.xlu1 %v983_v39 }
 0xea4   : > { %995 = vrot.lane.b32.xlu1 %v4248_v14, %s3606_s4 }
 0xea6   : > { %993 = vrot.lane.b32.xlu0 %v4251_v40, %s3606_s4 }
 0xf1d   : > { %v4257_v41 = vpop.xlane.xlu0 %987 }
 0xf20   : > { %v4259_v48 = vpop.xlane.xlu1 %984 }
 0xf21   : > { %v994_v52 = vpop.permute.xlu0 %993  ;;  %v1079_v36 = vmax.f32 %v1077_v25, %v4259_v48 }
 0xf22   : > { %v999_v43 = vmul.f32 %v994_v52, %v3849_v2 }
 0xf24   : > { %1003 = vrot.lane.b32.xlu1 %v999_v43, %s3606_s4  ;;  %v996_v30 = vpop.permute.xlu1 %995 }
 0xf25   : > { %v1000_v49 = vmul.f32 %v996_v30, %v4205_v60 }
 0xf27   : > { %1005 = vrot.lane.b32.xlu0 %v1000_v49, %s3606_s4 }
 0xf96   : > { %v1004_v53 = vpop.permute.xlu1 %1003 }
 0xf97   : > { %v1009_v50 = vsel %vm281_vm0, %v1004_v53, 0.0 }
 0xf98   : > { %1010 = vadd.xlane.f32.xlu1 %v1009_v50 }
 0xf99   : > { %v1006_v28 = vpop.permute.xlu0 %1005 }
 0xf9a   : > { %v1012_v51 = vsel %vm281_vm0, %v1006_v28, 0.0 }
 0xf9b   : > { %1013 = vadd.xlane.f32.xlu0 %v1012_v51 }
 0xfa9   : > { %1017 = vrot.lane.b32.xlu1 %v4248_v14, %s3605_s22 }
 0xfb1   : > { %1015 = vrot.lane.b32.xlu0 %v4251_v40, %s3605_s22 }
0x1025   : > { %v4271_v27 = vpop.xlane.xlu1 %1010 }
0x1026   : > { %v1081_v15 = vmax.f32 %v1079_v36, %v4271_v27 }
0x1028   : > { %v4273_v44 = vpop.xlane.xlu0 %1013 }
0x1029   : > { %v1018_v56 = vpop.permute.xlu1 %1017 }
0x102a   : > { %v1022_v12 = vmul.f32 %v1018_v56, %v4205_v60 }
0x102c   : > { %1027 = vrot.lane.b32.xlu0 %v1022_v12, %s3606_s4  ;;  %v1016_v22 = vpop.permute.xlu0 %1015 }
0x102d   : > { %v1021_v10 = vmul.f32 %v1016_v22, %v3849_v2 }
0x102f   : > { %1025 = vrot.lane.b32.xlu1 %v1021_v10, %s3606_s4 }
0x109e   : > { %v1028_v7 = vpop.permute.xlu0 %1027 }
0x109f   : > { %v1034_v54 = vsel %vm281_vm0, %v1028_v7, 0.0 }
0x10a0   : > { %1035 = vadd.xlane.f32.xlu0 %v1034_v54 }
0x10a1   : > { %v1026_v5 = vpop.permute.xlu1 %1025 }
0x10a2   : > { %v1031_v23 = vsel %vm281_vm0, %v1026_v5, 0.0 }
0x10a3   : > { %1032 = vadd.xlane.f32.xlu1 %v1031_v23 }
0x10b4   : > { %1043 = vrot.lane.b32.xlu1 %v4283_v55, %s3606_s4 }
0x10b6   : > { %1041 = vrot.lane.b32.xlu0 %v1037_v45, %s3606_s4 }
0x112d   : > { %v4290_v6 = vpop.xlane.xlu0 %1035 }
0x1130   : > { %v1033_v46 = vpop.xlane.xlu1 %1032 }
0x1131   : > { %v1042_v59 = vpop.permute.xlu0 %1041  ;;  %v1083_v11 = vmax.f32 %v1081_v15, %v1033_v46 }
0x1132   : > { %v1047_v61 = vsel %vm281_vm0, %v1042_v59, 0.0 }
0x1133   : > { %1048 = vadd.xlane.f32.xlu1 %v1047_v61 }
0x1134   : > { %v1044_v47 = vpop.permute.xlu1 %1043 }
0x1135   : > { %v1050_v1 = vsel %vm281_vm0, %v1044_v47, 0.0  ;;  %v4339_v47 = vld [vmem:[%s3994_s11] sm:$0xff] }
0x1136   : > { %1051 = vadd.xlane.f32.xlu0 %v1050_v1 }
0x1144   : > { %1055 = vrot.lane.b32.xlu1 %v4248_v14, %s3604_s7 }
0x114c   : > { %1053 = vrot.lane.b32.xlu0 %v4251_v40, %s3604_s7 }
0x11c0   : > { %v4298_v57 = vpop.xlane.xlu1 %1048 }
0x11c1   : > { %v1085_v62 = vmax.f32 %v1083_v11, %v4298_v57 }
0x11c3   : > { %v4300_v3 = vpop.xlane.xlu0 %1051 }
0x11c4   : > { %v1056_v4 = vpop.permute.xlu1 %1055 }
0x11c5   : > { %v1060_v8 = vmul.f32 %v1056_v4, %v4205_v60 }
0x11c7   : > { %1065 = vrot.lane.b32.xlu0 %v1060_v8, %s3606_s4  ;;  %v1054_v17 = vpop.permute.xlu0 %1053 }
0x11c8   : > { %v1059_v18 = vmul.f32 %v1054_v17, %v3849_v2  ;;  %v1080_v2 = vmax.f32 %v1078_v29, %v4257_v41 }
0x11ca   : > { %1063 = vrot.lane.b32.xlu1 %v1059_v18, %s3606_s4  ;;  %v1082_v42 = vmax.f32 %v1080_v2, %v4273_v44 }
0x11cc   : > { %v1084_v58 = vmax.f32 %v1082_v42, %v4290_v6 }
0x11ce   : > { %v1086_v33 = vmax.f32 %v1084_v58, %v4300_v3 }
0x1239   : > { %v1066_v19 = vpop.permute.xlu0 %1065 }
0x123a   : > { %v1072_v20 = vsel %vm281_vm0, %v1066_v19, 0.0 }
0x123b   : > { %1073 = vadd.xlane.f32.xlu0 %v1072_v20 }
0x123c   : > { %v1064_v21 = vpop.permute.xlu1 %1063 }
0x123d   : > { %v1069_v24 = vsel %vm281_vm0, %v1064_v21, 0.0 }
0x123e   : > { %1070 = vadd.xlane.f32.xlu1 %v1069_v24 }
0x12c8   : > { %v1074_v63 = vpop.xlane.xlu0 %1073 }
0x12c9   : > { %v1088_v34 = vmax.f32 %v1086_v33, %v1074_v63  ;;  %v4356_v33 = vld [vmem:[%s3994_s11 + $0x18] sm:$0xff] }
0x12cb   : > { %v1071_v35 = vpop.xlane.xlu1 %1070  ;;  %v1096_v38 = vsub.f32 %v4229_v9, %v1088_v34  ;;  %v1102_v43 = vsub.f32 %v4239_v13, %v1088_v34  ;;  %v1108_v56 = vsub.f32 %v4257_v41, %v1088_v34  ;;  %v1090_v9 = vsub.f32 %v4217_v16, %v1088_v34  ;;  %v4332_v41 = vld [vmem:[%s3994_s11 + $0x10] sm:$0xff] }
0x12cc   : > { %v1087_v39 = vmax.f32 %v1085_v62, %v1071_v35  ;;  %v1126_v5 = vsub.f32 %v4300_v3, %v1088_v34  ;;  %v1132_v3 = vsub.f32 %v1074_v63, %v1088_v34 }
0x12cd   : > { %v1099_v52 = vmul.f32 1.442695, %v1096_v38  ;;  %v1105_v51 = vmul.f32 1.442695, %v1102_v43  ;;  %v1093_v54 = vmul.f32 1.442695, %v1090_v9 }
0x12ce   : > { %v1095_v30 = vsub.f32 %v4231_v37, %v1087_v39  ;;  %v1101_v49 = vsub.f32 %v4237_v32, %v1087_v39  ;;  %v1107_v53 = vsub.f32 %v4259_v48, %v1087_v39  ;;  %v1119_v22 = vsub.f32 %v1033_v46, %v1087_v39 }
0x12cf   : > { %3217 = vpow2.f32 %v1099_v52  ;;  %v1089_v13 = vsub.f32 %v4215_v0, %v1087_v39  ;;  %v1111_v37 = vmul.f32 1.442695, %v1108_v56  ;;  %v1120_v32 = vsub.f32 %v4290_v6, %v1088_v34 }
0x12d0   : > { %v1097_v50 = vmul.f32 1.442695, %v1095_v30  ;;  %v1103_v28 = vmul.f32 1.442695, %v1101_v49  ;;  %v1109_v12 = vmul.f32 1.442695, %v1107_v53  ;;  %v1125_v10 = vsub.f32 %v4298_v57, %v1087_v39 }
0x12d1   : > { %v1121_v48 = vmul.f32 1.442695, %v1119_v22  ;;  %v1131_v7 = vsub.f32 %v1071_v35, %v1087_v39  ;;  %v1091_v23 = vmul.f32 1.442695, %v1089_v13  ;;  %v1123_v16 = vmul.f32 1.442695, %v1120_v32 }
0x12d2   : > { %3219 = vpow2.f32 %v1097_v50  ;;  %v1114_v0 = vsub.f32 %v4273_v44, %v1088_v34  ;;  %v1127_v46 = vmul.f32 1.442695, %v1125_v10  ;;  %v1113_v6 = vsub.f32 %v4271_v27, %v1087_v39 }
0x12d3   : > { %3221 = vpow2.f32 %v1103_v28  ;;  %v1133_v59 = vmul.f32 1.442695, %v1131_v7  ;;  %v1129_v1 = vmul.f32 1.442695, %v1126_v5  ;;  %v1135_v20 = vmul.f32 1.442695, %v1132_v3 }
0x12d4   : > { %3223 = vpow2.f32 %v1105_v51  ;;  %v1117_v4 = vmul.f32 1.442695, %v1114_v0  ;;  %v1115_v17 = vmul.f32 1.442695, %v1113_v6 }
0x12d5   : > { %3225 = vpow2.f32 %v1109_v12 }
0x12d6   : > { %3227 = vpow2.f32 %v1111_v37 }
0x12d7   : > { %3229 = vpow2.f32 %v1121_v48 }
0x12d8   : > { %3231 = vpow2.f32 %v1093_v54 }
0x12d9   : > { %v3218_v45 = vpop.eup %3217  ;;  %3233 = vpow2.f32 %v1091_v23 }
0x12da   : > { %v1156_v61 = vmul.f32 %v3218_v45, %v4332_v41  ;;  %3235 = vpow2.f32 %v1123_v16 }
0x12db   : > { %3237 = vpow2.f32 %v1127_v46 }
0x12dc   : > { %v3220_v57 = vpop.eup %3219  ;;  %1161 = vrot.lane.b32.xlu1 %v1156_v61, %s3604_s7  ;;  %3239 = vpow2.f32 %v1133_v59 }
0x12dd   : > { %v3222_v44 = vpop.eup %3221  ;;  %v1155_v8 = vmul.f32 %v3220_v57, %v4339_v47  ;;  %3241 = vpow2.f32 %v1129_v1 }
0x12de   : > { %v3224_v27 = vpop.eup %3223  ;;  %v1167_v18 = vmul.f32 %v3222_v44, %v4339_v47  ;;  %3243 = vpow2.f32 %v1117_v4 }
0x12df   : > { %v3226_v19 = vpop.eup %3225  ;;  %1159 = vrot.lane.b32.xlu0 %v1155_v8, %s3604_s7  ;;  %v1168_v21 = vmul.f32 %v3224_v27, %v4332_v41  ;;  %3245 = vpow2.f32 %v1115_v17 }
0x12e0   : > { %1171 = vrot.lane.b32.xlu1 %v1167_v18, %s3606_s4  ;;  %v3228_v24 = vpop.eup %3227  ;;  %v1179_v26 = vmul.f32 %v3226_v19, %v4339_v47  ;;  %3247 = vpow2.f32 %v1135_v20 }
0x12e1   : > { %v3230_v29 = vpop.eup %3229  ;;  %v1180_v42 = vmul.f32 %v3228_v24, %v4332_v41 }
0x12e2   : > { %v3232_v2 = vpop.eup %3231  ;;  %v1197_v15 = vmul.f32 %v3230_v29, %v4350_v31 }
0x12e3   : > { %1173 = vrot.lane.b32.xlu0 %v1168_v21, %s3606_s4  ;;  %v3234_v25 = vpop.eup %3233  ;;  %v1138_v36 = vadd.f32 %v3232_v2, %v3218_v45  ;;  %v1154_v0 = vmul.f32 %v3232_v2, %v4332_v41 }
0x12e4   : > { %1183 = vrot.lane.b32.xlu1 %v1179_v26, %s3605_s22  ;;  %v3236_v58 = vpop.eup %3235  ;;  %v1137_v11 = vadd.f32 %v3234_v25, %v3220_v57  ;;  %v1153_v54 = vmul.f32 %v3234_v25, %v4339_v47 }
0x12e5   : > { %v3238_v63 = vpop.eup %3237  ;;  %v1140_v34 = vadd.f32 %v3224_v27, %v1138_v36  ;;  %v1198_v39 = vmul.f32 %v3236_v58, %v4356_v33 }
0x12e6   : > { %v3240_v62 = vpop.eup %3239  ;;  %v1139_v35 = vadd.f32 %v3222_v44, %v1137_v11  ;;  %v1209_v30 = vmul.f32 %v3238_v63, %v4350_v31 }
0x12e7   : > { %1185 = vrot.lane.b32.xlu0 %v1180_v42, %s3605_s22  ;;  %v3242_v38 = vpop.eup %3241  ;;  %v1142_v52 = vadd.f32 %v3228_v24, %v1140_v34  ;;  %v1221_v22 = vmul.f32 %v3240_v62, %v4350_v31  ;;  %v4376_v34 = vld [vmem:[%s3837_s17] sm:$0xff] }
0x12e8   : > { %1201 = vrot.lane.b32.xlu1 %v1197_v15, %s3604_s7  ;;  %v3244_v43 = vpop.eup %3243  ;;  %v1141_v49 = vadd.f32 %v3226_v19, %v1139_v35  ;;  %v1210_v51 = vmul.f32 %v3242_v38, %v4356_v33  ;;  %v1248_v35 = vld [vmem:[%s3829_s9] sm:$0xff] }
0x12e9   : > { %v3246_v53 = vpop.eup %3245  ;;  %v1144_v50 = vadd.f32 %v3244_v43, %v1142_v52  ;;  %v1194_v17 = vmul.f32 %v3244_v43, %v4356_v33 }
0x12ea   : > { %v1143_v28 = vadd.f32 %v3246_v53, %v1141_v49  ;;  %v3248_v12 = vpop.eup %3247  ;;  %v1193_v57 = vmul.f32 %v3246_v53, %v4350_v31 }
0x12eb   : > { %1203 = vrot.lane.b32.xlu0 %v1198_v39, %s3604_s7  ;;  %v1146_v56 = vadd.f32 %v3236_v58, %v1144_v50  ;;  %v1222_v32 = vmul.f32 %v3248_v12, %v4356_v33  ;;  %v4389_v39 = vmul.f32 0.17677669, %v1248_v35 }
0x12ec   : > { %1213 = vrot.lane.b32.xlu1 %v1209_v30, %s3606_s4  ;;  %v1145_v9 = vadd.f32 %v3230_v29, %v1143_v28 }
0x12ed   : > { %v1148_v13 = vadd.f32 %v3242_v38, %v1146_v56 }
0x12ee   : > { %v1147_v37 = vadd.f32 %v3238_v63, %v1145_v9 }
0x12ef   : > { %1215 = vrot.lane.b32.xlu0 %v1210_v51, %s3606_s4  ;;  %v1150_v48 = vadd.f32 %v3248_v12, %v1148_v13 }
0x12f0   : > { %1225 = vrot.lane.b32.xlu1 %v1221_v22, %s3605_s22  ;;  %v1149_v10 = vadd.f32 %v3240_v62, %v1147_v37  ;;  %v4382_v62 = vld [vmem:[%s3837_s17 + $0x10] sm:$0xff] }
0x12f2   : > { %3249 = vrcp.f32 %v1149_v10 }
0x12f3   : > { %1227 = vrot.lane.b32.xlu0 %v1222_v32, %s3605_s22  ;;  %3251 = vrcp.f32 %v1150_v48 }
0x12fc   : > { %v3250_v25 = vpop.eup %3249 }
0x12fd   : > { %v3252_v11 = vpop.eup %3251 }
0x134e   : > { %v1162_v7 = vpop.permute.xlu1 %1161 }
0x134f   : > { %v1166_v6 = vadd.f32 %v1162_v7, %v1154_v0 }
0x1351   : > { %v1160_v5 = vpop.permute.xlu0 %1159 }
0x1352   : > { %v1172_v23 = vpop.permute.xlu1 %1171  ;;  %v1165_v16 = vadd.f32 %v1160_v5, %v1153_v54 }
0x1354   : > { %v1177_v45 = vadd.f32 %v1172_v23, %v1165_v16 }
0x1355   : > { %v1174_v46 = vpop.permute.xlu0 %1173 }
0x1356   : > { %v1184_v59 = vpop.permute.xlu1 %1183  ;;  %v1178_v1 = vadd.f32 %v1174_v46, %v1166_v6 }
0x1357   : > { %v1189_v61 = vadd.f32 %v1184_v59, %v1177_v45 }
0x1359   : > { %v1186_v3 = vpop.permute.xlu0 %1185  ;;  %v1195_v8 = vadd.f32 %v1193_v57, %v1189_v61  ;;  %v1323_v57 = vmul.f32 %v4382_v62, %v4205_v60 }
0x135a   : > { %v1202_v4 = vpop.permute.xlu1 %1201  ;;  %v1190_v44 = vadd.f32 %v1186_v3, %v1178_v1  ;;  %v1322_v3 = vmul.f32 %v4376_v34, %v4389_v39 }
0x135b   : > { %v1207_v20 = vadd.f32 %v1202_v4, %v1195_v8 }
0x135c   : > { %v1196_v19 = vadd.f32 %v1194_v17, %v1190_v44 }
0x135d   : > { %v1204_v27 = vpop.permute.xlu0 %1203 }
0x135e   : > { %v1214_v18 = vpop.permute.xlu1 %1213  ;;  %v1208_v26 = vadd.f32 %v1204_v27, %v1196_v19 }
0x135f   : > { %v1219_v21 = vadd.f32 %v1214_v18, %v1207_v20 }
0x1361   : > { %v1216_v24 = vpop.permute.xlu0 %1215 }
0x1362   : > { %v1226_v29 = vpop.permute.xlu1 %1225  ;;  %v1220_v42 = vadd.f32 %v1216_v24, %v1208_v26 }
0x1363   : > { %v1231_v2 = vadd.f32 %v1226_v29, %v1219_v21 }
0x1365   : > { %v1235_v36 = vmul.f32 %v3250_v25, %v1231_v2  ;;  %v1228_v58 = vpop.permute.xlu0 %1227 }
0x1366   : > { %v1232_v15 = vadd.f32 %v1228_v58, %v1220_v42 }
0x1367   : > { %1239 = vrot.lane.b32.xlu1 %v1235_v36, %s3606_s4 }
0x1368   : > { %v1236_v63 = vmul.f32 %v3252_v11, %v1232_v15 }
0x136a   : > { %1241 = vrot.lane.b32.xlu0 %v1236_v63, %s3606_s4 }
0x136b   : > { %1256 = vrot.lane.b32.xlu1 %v4376_v34, %s3604_s7 }
0x136e   : > { %1258 = vrot.lane.b32.xlu0 %v4382_v62, %s3604_s7 }
0x13d9   : > { %v1240_v38 = vpop.permute.xlu1 %1239 }
0x13da   : > { %1246 = vst.msk [vmem:[%s4056_s30] sm:$0xff] %vm1245_vm2, %v1240_v38 }
0x13dc   : > { %v1242_v52 = vpop.permute.xlu0 %1241 }
0x13dd   : > { %v1257_v43 = vpop.permute.xlu1 %1256  ;;  %1247 = vst.msk [vmem:[%s4056_s30 + $0x10] sm:$0xff] %vm1245_vm2, %v1242_v52 }
0x13de   : > { %v1262_v30 = vmul.f32 %v1257_v43, %v4389_v39 }
0x13e0   : > { %1266 = vrot.lane.b32.xlu1 %v1262_v30, %s3605_s22  ;;  %v1259_v49 = vpop.permute.xlu0 %1258 }
0x13e1   : > { %v1263_v53 = vmul.f32 %v1259_v49, %v4205_v60 }
0x13e3   : > { %1268 = vrot.lane.b32.xlu0 %v1263_v53, %s3605_s22 }
0x1452   : > { %v1267_v50 = vpop.permute.xlu1 %1266 }
0x1453   : > { %v1272_v28 = vsel %vm281_vm0, %v1267_v50, 0.0 }
0x1454   : > { %1273 = vadd.xlane.f32.xlu1 %v1272_v28 }
0x1455   : > { %v1269_v51 = vpop.permute.xlu0 %1268 }
0x1456   : > { %v1275_v56 = vsel %vm281_vm0, %v1269_v51, 0.0 }
0x1457   : > { %1276 = vadd.xlane.f32.xlu0 %v1275_v56 }
0x1465   : > { %1280 = vrot.lane.b32.xlu1 %v4382_v62, %s3606_s4 }
0x146d   : > { %1278 = vrot.lane.b32.xlu0 %v4376_v34, %s3606_s4 }
0x14e1   : > { %v4403_v12 = vpop.xlane.xlu1 %1273 }
0x14e4   : > { %v4405_v22 = vpop.xlane.xlu0 %1276 }
0x14e5   : > { %v1281_v9 = vpop.permute.xlu1 %1280 }
0x14e6   : > { %v1285_v13 = vmul.f32 %v1281_v9, %v4205_v60 }
0x14e8   : > { %1290 = vrot.lane.b32.xlu0 %v1285_v13, %s3605_s22  ;;  %v1279_v37 = vpop.permute.xlu0 %1278 }
0x14e9   : > { %v1284_v32 = vmul.f32 %v1279_v37, %v4389_v39 }
0x14eb   : > { %1288 = vrot.lane.b32.xlu1 %v1284_v32, %s3605_s22 }
0x155a   : > { %v1291_v48 = vpop.permute.xlu0 %1290 }
0x155b   : > { %v1297_v10 = vsel %vm281_vm0, %v1291_v48, 0.0  ;;  %v1408_v48 = vmul.f32 %v4389_v39, %v4251_v40 }
0x155c   : > { %1298 = vadd.xlane.f32.xlu0 %v1297_v10 }
0x155d   : > { %v1289_v7 = vpop.permute.xlu1 %1288 }
0x155e   : > { %v1294_v54 = vsel %vm281_vm0, %v1289_v7, 0.0 }
0x155f   : > { %1295 = vadd.xlane.f32.xlu1 %v1294_v54 }
0x1570   : > { %1302 = vrot.lane.b32.xlu1 %v4382_v62, %s3605_s22 }
0x1572   : > { %1300 = vrot.lane.b32.xlu0 %v4376_v34, %s3605_s22 }
0x15e9   : > { %v4417_v5 = vpop.xlane.xlu0 %1298 }
0x15ec   : > { %v4419_v23 = vpop.xlane.xlu1 %1295 }
0x15ed   : > { %v1301_v16 = vpop.permute.xlu0 %1300 }
0x15ee   : > { %v1306_v0 = vmul.f32 %v1301_v16, %v4389_v39 }
0x15f0   : > { %1310 = vrot.lane.b32.xlu1 %v1306_v0, %s3605_s22  ;;  %v1303_v45 = vpop.permute.xlu1 %1302 }
0x15f1   : > { %v1307_v46 = vmul.f32 %v1303_v45, %v4205_v60  ;;  %v1425_v45 = vmax.f32 %v4405_v22, %v4417_v5 }
0x15f3   : > { %1312 = vrot.lane.b32.xlu0 %v1307_v46, %s3605_s22 }
0x1662   : > { %v1311_v6 = vpop.permute.xlu1 %1310 }
0x1663   : > { %v1316_v59 = vsel %vm281_vm0, %v1311_v6, 0.0 }
0x1664   : > { %1317 = vadd.xlane.f32.xlu1 %v1316_v59 }
0x1665   : > { %v1313_v61 = vpop.permute.xlu0 %1312 }
0x1666   : > { %v1319_v1 = vsel %vm281_vm0, %v1313_v61, 0.0 }
0x1667   : > { %1320 = vadd.xlane.f32.xlu0 %v1319_v1 }
0x1675   : > { %1328 = vrot.lane.b32.xlu1 %v1323_v57, %s3605_s22 }
0x167d   : > { %1326 = vrot.lane.b32.xlu0 %v1322_v3, %s3605_s22 }
0x16f1   : > { %v4433_v4 = vpop.xlane.xlu1 %1317 }
0x16f4   : > { %v4435_v44 = vpop.xlane.xlu0 %1320 }
0x16f5   : > { %v1329_v8 = vpop.permute.xlu1 %1328 }
0x16f6   : > { %v1335_v17 = vsel %vm281_vm0, %v1329_v8, 0.0 }
0x16f7   : > { %1336 = vadd.xlane.f32.xlu0 %v1335_v17 }
0x16f8   : > { %v1327_v27 = vpop.permute.xlu0 %1326 }
0x16f9   : > { %v1332_v18 = vsel %vm281_vm0, %v1327_v27, 0.0 }
0x16fa   : > { %1333 = vadd.xlane.f32.xlu1 %v1332_v18 }
0x170b   : > { %1344 = vrot.lane.b32.xlu1 %v4248_v14, %s3604_s7 }
0x170d   : > { %1342 = vrot.lane.b32.xlu0 %v4251_v40, %s3604_s7 }
0x1784   : > { %v4443_v19 = vpop.xlane.xlu0 %1336 }
0x1787   : > { %v4445_v20 = vpop.xlane.xlu1 %1333 }
0x1788   : > { %v1343_v21 = vpop.permute.xlu0 %1342 }
0x1789   : > { %v1348_v24 = vmul.f32 %v1343_v21, %v4389_v39 }
0x178b   : > { %1352 = vrot.lane.b32.xlu1 %v1348_v24, %s3605_s22  ;;  %v1345_v26 = vpop.permute.xlu1 %1344 }
0x178c   : > { %v1349_v29 = vmul.f32 %v1345_v26, %v4205_v60 }
0x178e   : > { %1354 = vrot.lane.b32.xlu0 %v1349_v29, %s3605_s22 }
0x17fd   : > { %v1353_v2 = vpop.permute.xlu1 %1352 }
0x17fe   : > { %v1358_v25 = vsel %vm281_vm0, %v1353_v2, 0.0 }
0x17ff   : > { %1359 = vadd.xlane.f32.xlu1 %v1358_v25 }
0x1800   : > { %v1355_v42 = vpop.permute.xlu0 %1354 }
0x1801   : > { %v1361_v36 = vsel %vm281_vm0, %v1355_v42, 0.0 }
0x1802   : > { %1362 = vadd.xlane.f32.xlu0 %v1361_v36 }
0x1810   : > { %1366 = vrot.lane.b32.xlu1 %v4248_v14, %s3606_s4 }
0x1818   : > { %1364 = vrot.lane.b32.xlu0 %v4251_v40, %s3606_s4 }
0x188c   : > { %v4457_v58 = vpop.xlane.xlu1 %1359 }
0x188f   : > { %v4459_v15 = vpop.xlane.xlu0 %1362 }
0x1890   : > { %v1367_v11 = vpop.permute.xlu1 %1366 }
0x1891   : > { %v1371_v63 = vmul.f32 %v1367_v11, %v4205_v60 }
0x1893   : > { %1376 = vrot.lane.b32.xlu0 %v1371_v63, %s3605_s22  ;;  %v1365_v35 = vpop.permute.xlu0 %1364 }
0x1894   : > { %v1370_v38 = vmul.f32 %v1365_v35, %v4389_v39 }
0x1896   : > { %1374 = vrot.lane.b32.xlu1 %v1370_v38, %s3605_s22 }
0x1905   : > { %v1377_v52 = vpop.permute.xlu0 %1376 }
0x1906   : > { %v1383_v43 = vsel %vm281_vm0, %v1377_v52, 0.0 }
0x1907   : > { %1384 = vadd.xlane.f32.xlu0 %v1383_v43 }
0x1908   : > { %v1375_v30 = vpop.permute.xlu1 %1374 }
0x1909   : > { %v1380_v49 = vsel %vm281_vm0, %v1375_v30, 0.0 }
0x190a   : > { %1381 = vadd.xlane.f32.xlu1 %v1380_v49 }
0x191b   : > { %1388 = vrot.lane.b32.xlu1 %v4248_v14, %s3605_s22 }
0x191d   : > { %1386 = vrot.lane.b32.xlu0 %v4251_v40, %s3605_s22  ;;  %v1424_v40 = vmax.f32 %v4403_v12, %v4419_v23 }
0x191f   : > { %v1426_v46 = vmax.f32 %v1424_v40, %v4433_v4 }
0x1921   : > { %v1428_v59 = vmax.f32 %v1426_v46, %v4445_v20 }
0x1923   : > { %v1430_v1 = vmax.f32 %v1428_v59, %v4457_v58 }
0x1994   : > { %v4471_v53 = vpop.xlane.xlu0 %1384 }
0x1997   : > { %v1382_v50 = vpop.xlane.xlu1 %1381 }
0x1998   : > { %v1387_v28 = vpop.permute.xlu0 %1386  ;;  %v1432_v3 = vmax.f32 %v1430_v1, %v1382_v50 }
0x1999   : > { %v1392_v51 = vmul.f32 %v1387_v28, %v4389_v39 }
0x199b   : > { %1396 = vrot.lane.b32.xlu1 %v1392_v51, %s3605_s22  ;;  %v1389_v56 = vpop.permute.xlu1 %1388 }
0x199c   : > { %v1393_v9 = vmul.f32 %v1389_v56, %v4205_v60 }
0x199e   : > { %1398 = vrot.lane.b32.xlu0 %v1393_v9, %s3605_s22 }
0x1a0d   : > { %v1397_v13 = vpop.permute.xlu1 %1396 }
0x1a0e   : > { %v1402_v37 = vsel %vm281_vm0, %v1397_v13, 0.0 }
0x1a0f   : > { %1403 = vadd.xlane.f32.xlu1 %v1402_v37 }
0x1a10   : > { %v1399_v14 = vpop.permute.xlu0 %1398 }
0x1a11   : > { %v1405_v32 = vsel %vm281_vm0, %v1399_v14, 0.0 }
0x1a12   : > { %1406 = vadd.xlane.f32.xlu0 %v1405_v32 }
0x1a20   : > { %1414 = vrot.lane.b32.xlu1 %v4283_v55, %s3605_s22  ;;  %v1427_v55 = vmax.f32 %v1425_v45, %v4435_v44 }
0x1a22   : > { %v1429_v39 = vmax.f32 %v1427_v55, %v4443_v19 }
0x1a24   : > { %v1431_v6 = vmax.f32 %v1429_v39, %v4459_v15 }
0x1a26   : > { %v1433_v61 = vmax.f32 %v1431_v6, %v4471_v53 }
0x1a28   : > { %1412 = vrot.lane.b32.xlu0 %v1408_v48, %s3605_s22 }
0x1a9c   : > { %v1404_v10 = vpop.xlane.xlu1 %1403 }
0x1a9d   : > { %v1434_v27 = vmax.f32 %v1432_v3, %v1404_v10 }
0x1a9f   : > { %v1407_v60 = vpop.xlane.xlu0 %1406 }
0x1aa0   : > { %v1415_v7 = vpop.permute.xlu1 %1414  ;;  %v1435_v57 = vmax.f32 %v1433_v61, %v1407_v60 }
0x1aa1   : > { %v1421_v54 = vsel %vm281_vm0, %v1415_v7, 0.0 }
0x1aa2   : > { %1422 = vadd.xlane.f32.xlu0 %v1421_v54 }
0x1aa3   : > { %v1413_v16 = vpop.permute.xlu0 %1412 }
0x1aa4   : > { %v1418_v0 = vsel %vm281_vm0, %v1413_v16, 0.0 }
0x1aa5   : > { %1419 = vadd.xlane.f32.xlu1 %v1418_v0 }
0x1b2f   : > { %v1423_v8 = vpop.xlane.xlu0 %1422 }
0x1b30   : > { %v1437_v17 = vmax.f32 %v1435_v57, %v1423_v8 }
0x1b32   : > { %v1420_v18 = vpop.xlane.xlu1 %1419  ;;  %v1445_v21 = vsub.f32 %v4417_v5, %v1437_v17  ;;  %v1451_v29 = vsub.f32 %v4435_v44, %v1437_v17  ;;  %v1457_v35 = vsub.f32 %v4443_v19, %v1437_v17  ;;  %v1439_v5 = vsub.f32 %v4405_v22, %v1437_v17 }
0x1b33   : > { %v1436_v24 = vmax.f32 %v1434_v27, %v1420_v18  ;;  %v1475_v28 = vsub.f32 %v1407_v60, %v1437_v17  ;;  %v1481_v14 = vsub.f32 %v1423_v8, %v1437_v17 }
0x1b34   : > { %v1448_v26 = vmul.f32 1.442695, %v1445_v21  ;;  %v1454_v63 = vmul.f32 1.442695, %v1451_v29  ;;  %v1442_v49 = vmul.f32 1.442695, %v1439_v5 }
0x1b35   : > { %v1444_v2 = vsub.f32 %v4419_v23, %v1436_v24  ;;  %v1450_v25 = vsub.f32 %v4433_v4, %v1436_v24  ;;  %v1456_v42 = vsub.f32 %v4445_v20, %v1436_v24  ;;  %v1468_v52 = vsub.f32 %v1382_v50, %v1436_v24 }
0x1b36   : > { %3253 = vpow2.f32 %v1448_v26  ;;  %v1438_v44 = vsub.f32 %v4403_v12, %v1436_v24  ;;  %v1460_v23 = vmul.f32 1.442695, %v1457_v35  ;;  %v1469_v4 = vsub.f32 %v4471_v53, %v1437_v17 }
0x1b37   : > { %v1446_v36 = vmul.f32 1.442695, %v1444_v2  ;;  %v1452_v11 = vmul.f32 1.442695, %v1450_v25  ;;  %v1458_v38 = vmul.f32 1.442695, %v1456_v42  ;;  %v1474_v43 = vsub.f32 %v1404_v10, %v1436_v24 }
0x1b38   : > { %v1470_v20 = vmul.f32 1.442695, %v1468_v52  ;;  %v1480_v30 = vsub.f32 %v1420_v18, %v1436_v24  ;;  %v1440_v51 = vmul.f32 1.442695, %v1438_v44  ;;  %v1472_v19 = vmul.f32 1.442695, %v1469_v4 }
0x1b39   : > { %3255 = vpow2.f32 %v1446_v36  ;;  %v1463_v50 = vsub.f32 %v4459_v15, %v1437_v17  ;;  %v1476_v22 = vmul.f32 1.442695, %v1474_v43  ;;  %v1462_v12 = vsub.f32 %v4457_v58, %v1436_v24 }
0x1b3a   : > { %3257 = vpow2.f32 %v1452_v11  ;;  %v1482_v9 = vmul.f32 1.442695, %v1480_v30  ;;  %v1478_v53 = vmul.f32 1.442695, %v1475_v28  ;;  %v1484_v54 = vmul.f32 1.442695, %v1481_v14 }
0x1b3b   : > { %3259 = vpow2.f32 %v1454_v63  ;;  %v1466_v32 = vmul.f32 1.442695, %v1463_v50  ;;  %v1464_v10 = vmul.f32 1.442695, %v1462_v12 }
0x1b3c   : > { %3261 = vpow2.f32 %v1458_v38 }
0x1b3d   : > { %3263 = vpow2.f32 %v1460_v23 }
0x1b3e   : > { %3265 = vpow2.f32 %v1470_v20 }
0x1b3f   : > { %3267 = vpow2.f32 %v1442_v49 }
0x1b40   : > { %v3254_v56 = vpop.eup %3253  ;;  %3269 = vpow2.f32 %v1440_v51 }
0x1b41   : > { %v1505_v13 = vmul.f32 %v3254_v56, %v4332_v41  ;;  %3271 = vpow2.f32 %v1472_v19 }
0x1b42   : > { %3273 = vpow2.f32 %v1476_v22 }
0x1b43   : > { %v3256_v37 = vpop.eup %3255  ;;  %1510 = vrot.lane.b32.xlu1 %v1505_v13, %s3604_s7  ;;  %3275 = vpow2.f32 %v1482_v9 }
0x1b44   : > { %v3258_v48 = vpop.eup %3257  ;;  %v1504_v15 = vmul.f32 %v3256_v37, %v4339_v47  ;;  %3277 = vpow2.f32 %v1478_v53 }
0x1b45   : > { %v3260_v60 = vpop.eup %3259  ;;  %v1516_v58 = vmul.f32 %v3258_v48, %v4339_v47  ;;  %3279 = vpow2.f32 %v1466_v32 }
0x1b46   : > { %v3262_v7 = vpop.eup %3261  ;;  %1508 = vrot.lane.b32.xlu0 %v1504_v15, %s3604_s7  ;;  %v1517_v16 = vmul.f32 %v3260_v60, %v4332_v41  ;;  %3281 = vpow2.f32 %v1464_v10 }
0x1b47   : > { %1520 = vrot.lane.b32.xlu1 %v1516_v58, %s3606_s4  ;;  %v3264_v0 = vpop.eup %3263  ;;  %v1528_v45 = vmul.f32 %v3262_v7, %v4339_v47  ;;  %3283 = vpow2.f32 %v1484_v54 }
0x1b48   : > { %v3266_v55 = vpop.eup %3265  ;;  %v1529_v46 = vmul.f32 %v3264_v0, %v4332_v41 }
0x1b49   : > { %v3268_v40 = vpop.eup %3267  ;;  %v1546_v61 = vmul.f32 %v3266_v55, %v4350_v31 }
0x1b4a   : > { %1522 = vrot.lane.b32.xlu0 %v1517_v16, %s3606_s4  ;;  %v3270_v39 = vpop.eup %3269  ;;  %v1487_v6 = vadd.f32 %v3268_v40, %v3254_v56  ;;  %v1503_v51 = vmul.f32 %v3268_v40, %v4332_v41 }
0x1b4b   : > { %1532 = vrot.lane.b32.xlu1 %v1528_v45, %s3605_s22  ;;  %v3272_v59 = vpop.eup %3271  ;;  %v1486_v1 = vadd.f32 %v3270_v39, %v3256_v37  ;;  %v1502_v43 = vmul.f32 %v3270_v39, %v4339_v47 }
0x1b4c   : > { %v3274_v57 = vpop.eup %3273  ;;  %v1489_v3 = vadd.f32 %v3260_v60, %v1487_v6  ;;  %v1547_v18 = vmul.f32 %v3272_v59, %v4356_v33  ;;  %v1597_v6 = vld [vmem:[%s3829_s9 + $0x8] sm:$0xff] }
0x1b4d   : > { %v3276_v8 = vpop.eup %3275  ;;  %v1488_v17 = vadd.f32 %v3258_v48, %v1486_v1  ;;  %v1558_v26 = vmul.f32 %v3274_v57, %v4350_v31 }
0x1b4e   : > { %1534 = vrot.lane.b32.xlu0 %v1529_v46, %s3605_s22  ;;  %v3278_v27 = vpop.eup %3277  ;;  %v1491_v21 = vadd.f32 %v3264_v0, %v1489_v3  ;;  %v1570_v35 = vmul.f32 %v3276_v8, %v4350_v31  ;;  %v1598_v46 = vld [vmem:[%s3829_s9 + $0x18] sm:$0xff] }
0x1b4f   : > { %1550 = vrot.lane.b32.xlu1 %v1546_v61, %s3604_s7  ;;  %v3280_v24 = vpop.eup %3279  ;;  %v1490_v29 = vadd.f32 %v3262_v7, %v1488_v17  ;;  %v1559_v36 = vmul.f32 %v3278_v27, %v4356_v33  ;;  %v4542_v61 = vmul.f32 0.17677669, %v1597_v6 }
0x1b50   : > { %v3282_v2 = vpop.eup %3281  ;;  %v1493_v25 = vadd.f32 %v3280_v24, %v1491_v21  ;;  %v1543_v47 = vmul.f32 %v3280_v24, %v4356_v33 }
0x1b51   : > { %v1492_v42 = vadd.f32 %v3282_v2, %v1490_v29  ;;  %v3284_v63 = vpop.eup %3283  ;;  %v1542_v13 = vmul.f32 %v3282_v2, %v4350_v31 }
0x1b52   : > { %1552 = vrot.lane.b32.xlu0 %v1547_v18, %s3604_s7  ;;  %v1495_v11 = vadd.f32 %v3272_v59, %v1493_v25  ;;  %v1571_v44 = vmul.f32 %v3284_v63, %v4356_v33  ;;  %v4540_v59 = vmul.f32 0.17677669, %v1598_v46 }
0x1b53   : > { %1562 = vrot.lane.b32.xlu1 %v1558_v26, %s3606_s4  ;;  %v1494_v38 = vadd.f32 %v3266_v55, %v1492_v42 }
0x1b54   : > { %v1497_v52 = vadd.f32 %v3278_v27, %v1495_v11  ;;  %v4546_v1 = vmul.f32 %v4540_v59, %v4382_v62 }
0x1b55   : > { %v1496_v5 = vadd.f32 %v3274_v57, %v1494_v38  ;;  %v4550_v57 = vmul.f32 %v4542_v61, %v4376_v34 }
0x1b56   : > { %1564 = vrot.lane.b32.xlu0 %v1559_v36, %s3606_s4  ;;  %v1499_v23 = vadd.f32 %v3284_v63, %v1497_v52  ;;  %v1608_v3 = vsel %vm281_vm0, %v4546_v1, 0.0 }
0x1b57   : > { %1574 = vrot.lane.b32.xlu1 %v1570_v35, %s3605_s22  ;;  %v1498_v4 = vadd.f32 %v3276_v8, %v1496_v5  ;;  %v1605_v8 = vsel %vm281_vm0, %v4550_v57, 0.0 }
0x1b59   : > { %3285 = vrcp.f32 %v1498_v4 }
0x1b5a   : > { %1576 = vrot.lane.b32.xlu0 %v1571_v44, %s3605_s22  ;;  %3287 = vrcp.f32 %v1499_v23 }
0x1b63   : > { %v3286_v31 = vpop.eup %3285 }
0x1b64   : > { %v3288_v39 = vpop.eup %3287 }
0x1bb5   : > { %v1511_v20 = vpop.permute.xlu1 %1510 }
0x1bb6   : > { %v1515_v56 = vadd.f32 %v1511_v20, %v1503_v51  ;;  %v4593_v20 = vld [vmem:[%s3837_s17 + $0x18] sm:$0xff] }
0x1bb8   : > { %v1509_v30 = vpop.permute.xlu0 %1508 }
0x1bb9   : > { %v1521_v49 = vpop.permute.xlu1 %1520  ;;  %v1514_v28 = vadd.f32 %v1509_v30, %v1502_v43  ;;  %v4596_v30 = vld [vmem:[%s3837_s17 + $0x8] sm:$0xff] }
0x1bbb   : > { %v1526_v19 = vadd.f32 %v1521_v49, %v1514_v28  ;;  %v4601_v28 = vmul.f32 %v4593_v20, %v4540_v59 }
0x1bbc   : > { %v1523_v50 = vpop.permute.xlu0 %1522 }
0x1bbd   : > { %v1533_v22 = vpop.permute.xlu1 %1532  ;;  %v1527_v9 = vadd.f32 %v1523_v50, %v1515_v56  ;;  %v4607_v56 = vmul.f32 %v4596_v30, %v4542_v61 }
0x1bbe   : > { %v1538_v12 = vadd.f32 %v1533_v22, %v1526_v19 }
0x1bc0   : > { %v1535_v53 = vpop.permute.xlu0 %1534  ;;  %v1544_v32 = vadd.f32 %v1542_v13, %v1538_v12  ;;  %v1662_v12 = vsel %vm281_vm0, %v4601_v28, 0.0 }
0x1bc1   : > { %v1551_v37 = vpop.permute.xlu1 %1550  ;;  %v1539_v14 = vadd.f32 %v1535_v53, %v1527_v9  ;;  %v1659_v9 = vsel %vm281_vm0, %v4607_v56, 0.0 }
0x1bc2   : > { %v1556_v41 = vadd.f32 %v1551_v37, %v1544_v32 }
0x1bc3   : > { %v1545_v10 = vadd.f32 %v1543_v47, %v1539_v14 }
0x1bc4   : > { %v1553_v48 = vpop.permute.xlu0 %1552 }
0x1bc5   : > { %v1563_v15 = vpop.permute.xlu1 %1562  ;;  %v1557_v7 = vadd.f32 %v1553_v48, %v1545_v10 }
0x1bc6   : > { %v1568_v60 = vadd.f32 %v1563_v15, %v1556_v41 }
0x1bc8   : > { %v1565_v58 = vpop.permute.xlu0 %1564 }
0x1bc9   : > { %v1575_v54 = vpop.permute.xlu1 %1574  ;;  %v1569_v0 = vadd.f32 %v1565_v58, %v1557_v7 }
0x1bca   : > { %v1580_v16 = vadd.f32 %v1575_v54, %v1568_v60 }
0x1bcc   : > { %v1584_v45 = vmul.f32 %v3286_v31, %v1580_v16  ;;  %v1577_v55 = vpop.permute.xlu0 %1576 }
0x1bcd   : > { %v1581_v40 = vadd.f32 %v1577_v55, %v1569_v0 }
0x1bce   : > { %1588 = vrot.lane.b32.xlu1 %v1584_v45, %s3604_s7 }
0x1bcf   : > { %v1585_v33 = vmul.f32 %v3288_v39, %v1581_v40 }
0x1bd1   : > { %1590 = vrot.lane.b32.xlu0 %v1585_v33, %s3604_s7 }
0x1bf0   : > { %1609 = vadd.xlane.f32.xlu0 %v1608_v3 }
0x1bf2   : > { %1606 = vadd.xlane.f32.xlu1 %v1605_v8 }
0x1c03   : > { %1615 = vrot.lane.b32.xlu1 %v4382_v62, %s3604_s7 }
0x1c06   : > { %1613 = vrot.lane.b32.xlu0 %v4376_v34, %s3604_s7 }
0x1c40   : > { %v1589_v17 = vpop.permute.xlu1 %1588 }
0x1c41   : > { %1595 = vst.msk [vmem:[%s4056_s30] sm:$0xff] %vm1594_vm3, %v1589_v17 }
0x1c43   : > { %v1591_v27 = vpop.permute.xlu0 %1590 }
0x1c44   : > { %1596 = vst.msk [vmem:[%s4056_s30 + $0x10] sm:$0xff] %vm1594_vm3, %v1591_v27 }
0x1c7d   : > { %v4564_v18 = vpop.xlane.xlu0 %1609 }
0x1c7f   : > { %v4566_v21 = vpop.xlane.xlu1 %1606 }
0x1c81   : > { %v1614_v24 = vpop.permute.xlu0 %1613 }
0x1c82   : > { %v1619_v26 = vmul.f32 %v1614_v24, %v4542_v61 }
0x1c83   : > { %v1616_v29 = vpop.permute.xlu1 %1615 }
0x1c84   : > { %v1620_v2 = vmul.f32 %v1616_v29, %v4540_v59  ;;  %v1621_v25 = vsel %vm281_vm0, %v1619_v26, 0.0 }
0x1c85   : > { %1622 = vadd.xlane.f32.xlu1 %v1621_v25 }
0x1c86   : > { %v1624_v42 = vsel %vm281_vm0, %v1620_v2, 0.0 }
0x1c87   : > { %1625 = vadd.xlane.f32.xlu0 %v1624_v42 }
0x1c96   : > { %1629 = vrot.lane.b32.xlu1 %v4382_v62, %s3606_s4 }
0x1c9d   : > { %1627 = vrot.lane.b32.xlu0 %v4376_v34, %s3606_s4 }
0x1d12   : > { %v4576_v36 = vpop.xlane.xlu1 %1622 }
0x1d13   : > { %v1709_v24 = vmax.f32 %v4566_v21, %v4576_v36 }
0x1d14   : > { %v4578_v11 = vpop.xlane.xlu0 %1625 }
0x1d15   : > { %v1710_v17 = vmax.f32 %v4564_v18, %v4578_v11 }
0x1d16   : > { %v1630_v63 = vpop.permute.xlu1 %1629 }
0x1d17   : > { %v1634_v35 = vmul.f32 %v1630_v63, %v4540_v59 }
0x1d18   : > { %v1628_v38 = vpop.permute.xlu0 %1627 }
0x1d19   : > { %v1633_v52 = vmul.f32 %v1628_v38, %v4542_v61  ;;  %v1638_v5 = vsel %vm281_vm0, %v1634_v35, 0.0 }
0x1d1a   : > { %1639 = vadd.xlane.f32.xlu0 %v1638_v5 }
0x1d1b   : > { %v1635_v44 = vsel %vm281_vm0, %v1633_v52, 0.0 }
0x1d1c   : > { %1636 = vadd.xlane.f32.xlu1 %v1635_v44 }
0x1d2d   : > { %1643 = vrot.lane.b32.xlu1 %v4382_v62, %s3605_s22 }
0x1d30   : > { %1641 = vrot.lane.b32.xlu0 %v4376_v34, %s3605_s22 }
0x1da7   : > { %v4588_v23 = vpop.xlane.xlu0 %1639 }
0x1da8   : > { %v1712_v27 = vmax.f32 %v1710_v17, %v4588_v23 }
0x1da9   : > { %v4590_v4 = vpop.xlane.xlu1 %1636 }
0x1daa   : > { %v1711_v29 = vmax.f32 %v1709_v24, %v4590_v4 }
0x1dab   : > { %v1642_v43 = vpop.permute.xlu0 %1641 }
0x1dac   : > { %v1647_v49 = vmul.f32 %v1642_v43, %v4542_v61 }
0x1dad   : > { %v1644_v51 = vpop.permute.xlu1 %1643 }
0x1dae   : > { %v1648_v19 = vmul.f32 %v1644_v51, %v4540_v59  ;;  %v1649_v50 = vsel %vm281_vm0, %v1647_v49, 0.0 }
0x1daf   : > { %1650 = vadd.xlane.f32.xlu1 %v1649_v50 }
0x1db0   : > { %v1652_v22 = vsel %vm281_vm0, %v1648_v19, 0.0 }
0x1db1   : > { %1653 = vadd.xlane.f32.xlu0 %v1652_v22 }
0x1db3   : > { %1663 = vadd.xlane.f32.xlu1 %v1662_v12 }
0x1db5   : > { %1660 = vadd.xlane.f32.xlu0 %v1659_v9 }
0x1dc4   : > { %1669 = vrot.lane.b32.xlu1 %v4593_v20, %s3604_s7 }
0x1dcb   : > { %1667 = vrot.lane.b32.xlu0 %v4596_v30, %s3604_s7 }
0x1e3c   : > { %v4618_v13 = vpop.xlane.xlu1 %1650 }
0x1e3d   : > { %v1713_v2 = vmax.f32 %v1711_v29, %v4618_v13 }
0x1e3e   : > { %v4620_v53 = vpop.xlane.xlu0 %1653 }
0x1e3f   : > { %v1714_v26 = vmax.f32 %v1712_v27, %v4620_v53 }
0x1e40   : > { %v4622_v37 = vpop.xlane.xlu1 %1663 }
0x1e41   : > { %v1716_v25 = vmax.f32 %v1714_v26, %v4622_v37 }
0x1e42   : > { %v4624_v14 = vpop.xlane.xlu0 %1660 }
0x1e43   : > { %v1715_v42 = vmax.f32 %v1713_v2, %v4624_v14 }
0x1e44   : > { %v1670_v32 = vpop.permute.xlu1 %1669 }
0x1e45   : > { %v1674_v47 = vmul.f32 %v1670_v32, %v4540_v59 }
0x1e46   : > { %v1668_v48 = vpop.permute.xlu0 %1667 }
0x1e47   : > { %v1673_v15 = vmul.f32 %v1668_v48, %v4542_v61  ;;  %v1678_v10 = vsel %vm281_vm0, %v1674_v47, 0.0 }
0x1e48   : > { %1679 = vadd.xlane.f32.xlu0 %v1678_v10 }
0x1e49   : > { %v1675_v41 = vsel %vm281_vm0, %v1673_v15, 0.0 }
0x1e4a   : > { %1676 = vadd.xlane.f32.xlu1 %v1675_v41 }
0x1e5b   : > { %1683 = vrot.lane.b32.xlu1 %v4593_v20, %s3606_s4 }
0x1e5e   : > { %1681 = vrot.lane.b32.xlu0 %v4596_v30, %s3606_s4 }
0x1ed5   : > { %v1680_v60 = vpop.xlane.xlu0 %1679 }
0x1ed6   : > { %v1718_v63 = vmax.f32 %v1716_v25, %v1680_v60 }
0x1ed7   : > { %v1677_v58 = vpop.xlane.xlu1 %1676 }
0x1ed8   : > { %v1717_v35 = vmax.f32 %v1715_v42, %v1677_v58 }
0x1ed9   : > { %v1682_v7 = vpop.permute.xlu0 %1681 }
0x1eda   : > { %v1687_v54 = vmul.f32 %v1682_v7, %v4542_v61 }
0x1edb   : > { %v1684_v16 = vpop.permute.xlu1 %1683 }
0x1edc   : > { %v1688_v31 = vmul.f32 %v1684_v16, %v4540_v59  ;;  %v1689_v0 = vsel %vm281_vm0, %v1687_v54, 0.0 }
0x1edd   : > { %1690 = vadd.xlane.f32.xlu1 %v1689_v0 }
0x1ede   : > { %v1692_v45 = vsel %vm281_vm0, %v1688_v31, 0.0 }
0x1edf   : > { %1693 = vadd.xlane.f32.xlu0 %v1692_v45  ;;  %v4673_v45 = vld [vmem:[%s3994_s11] sm:$0xff] }
0x1eee   : > { %1697 = vrot.lane.b32.xlu1 %v4593_v20, %s3605_s22 }
0x1ef5   : > { %1695 = vrot.lane.b32.xlu0 %v4596_v30, %s3605_s22 }
0x1f6a   : > { %v1691_v55 = vpop.xlane.xlu1 %1690 }
0x1f6b   : > { %v1719_v5 = vmax.f32 %v1717_v35, %v1691_v55  ;;  %v4686_v35 = vld [vmem:[%s3994_s11 + $0x8] sm:$0xff] }
0x1f6c   : > { %v4642_v40 = vpop.xlane.xlu0 %1693 }
0x1f6d   : > { %v1720_v38 = vmax.f32 %v1718_v63, %v4642_v40 }
0x1f6e   : > { %v1698_v39 = vpop.permute.xlu1 %1697 }
0x1f6f   : > { %v1702_v33 = vmul.f32 %v1698_v39, %v4540_v59 }
0x1f70   : > { %v1696_v46 = vpop.permute.xlu0 %1695 }
0x1f71   : > { %v1701_v6 = vmul.f32 %v1696_v46, %v4542_v61  ;;  %v1706_v3 = vsel %vm281_vm0, %v1702_v33, 0.0 }
0x1f72   : > { %1707 = vadd.xlane.f32.xlu0 %v1706_v3 }
0x1f73   : > { %v1703_v8 = vsel %vm281_vm0, %v1701_v6, 0.0 }
0x1f74   : > { %1704 = vadd.xlane.f32.xlu1 %v1703_v8 }
0x1fff   : > { %v1708_v52 = vpop.xlane.xlu0 %1707 }
0x2000   : > { %v1722_v44 = vmax.f32 %v1720_v38, %v1708_v52 }
0x2001   : > { %v1705_v43 = vpop.xlane.xlu1 %1704 }
0x2002   : > { %v1721_v49 = vmax.f32 %v1719_v5, %v1705_v43  ;;  %v1730_v51 = vsub.f32 %v4578_v11, %v1722_v44  ;;  %v1736_v19 = vsub.f32 %v4588_v23, %v1722_v44  ;;  %v1742_v15 = vsub.f32 %v4620_v53, %v1722_v44  ;;  %v4668_v53 = vld [vmem:[%s3994_s11 + $0x10] sm:$0xff] }
0x2003   : > { %v1754_v11 = vsub.f32 %v1680_v60, %v1722_v44  ;;  %v1724_v23 = vsub.f32 %v4564_v18, %v1722_v44  ;;  %v1748_v18 = vsub.f32 %v4622_v37, %v1722_v44  ;;  %v1766_v6 = vsub.f32 %v1708_v52, %v1722_v44 }
0x2004   : > { %v1733_v50 = vmul.f32 1.442695, %v1730_v51  ;;  %v1729_v22 = vsub.f32 %v4576_v36, %v1721_v49  ;;  %v1735_v12 = vsub.f32 %v4590_v4, %v1721_v49  ;;  %v1741_v9 = vsub.f32 %v4618_v13, %v1721_v49 }
0x2005   : > { %v1739_v48 = vmul.f32 1.442695, %v1736_v19  ;;  %v1753_v10 = vsub.f32 %v1677_v58, %v1721_v49  ;;  %v1745_v36 = vmul.f32 1.442695, %v1742_v15  ;;  %v1723_v4 = vsub.f32 %v4566_v21, %v1721_v49 }
0x2006   : > { %v1731_v32 = vmul.f32 1.442695, %v1729_v22  ;;  %3289 = vpow2.f32 %v1733_v50  ;;  %v1737_v47 = vmul.f32 1.442695, %v1735_v12  ;;  %v1743_v41 = vmul.f32 1.442695, %v1741_v9 }
0x2007   : > { %v1755_v13 = vmul.f32 1.442695, %v1753_v10  ;;  %v1757_v7 = vmul.f32 1.442695, %v1754_v11  ;;  %v1759_v54 = vsub.f32 %v1691_v55, %v1721_v49  ;;  %v1765_v16 = vsub.f32 %v1705_v43, %v1721_v49 }
0x2008   : > { %3291 = vpow2.f32 %v1731_v32  ;;  %v1727_v31 = vmul.f32 1.442695, %v1724_v23  ;;  %v1760_v58 = vsub.f32 %v4642_v40, %v1722_v44  ;;  %v1725_v60 = vmul.f32 1.442695, %v1723_v4  ;;  %v4691_v44 = vld [vmem:[%s3994_s11 + $0x18] sm:$0xff] }
0x2009   : > { %3293 = vpow2.f32 %v1737_v47  ;;  %v1761_v21 = vmul.f32 1.442695, %v1759_v54  ;;  %v1747_v39 = vsub.f32 %v4624_v14, %v1721_v49  ;;  %v1767_v33 = vmul.f32 1.442695, %v1765_v16 }
0x200a   : > { %3295 = vpow2.f32 %v1739_v48  ;;  %v1763_v3 = vmul.f32 1.442695, %v1760_v58  ;;  %v1751_v8 = vmul.f32 1.442695, %v1748_v18  ;;  %v1769_v26 = vmul.f32 1.442695, %v1766_v6 }
0x200b   : > { %3297 = vpow2.f32 %v1743_v41  ;;  %v1749_v27 = vmul.f32 1.442695, %v1747_v39 }
0x200c   : > { %3299 = vpow2.f32 %v1745_v36 }
0x200d   : > { %3301 = vpow2.f32 %v1755_v13 }
0x200e   : > { %3303 = vpow2.f32 %v1757_v7 }
0x200f   : > { %3305 = vpow2.f32 %v1727_v31 }
0x2010   : > { %v3290_v0 = vpop.eup %3289  ;;  %3307 = vpow2.f32 %v1725_v60 }
0x2011   : > { %v1790_v55 = vmul.f32 %v3290_v0, %v4668_v53  ;;  %3309 = vpow2.f32 %v1761_v21 }
0x2012   : > { %v3292_v46 = vpop.eup %3291  ;;  %3311 = vpow2.f32 %v1767_v33 }
0x2013   : > { %v3294_v40 = vpop.eup %3293  ;;  %1795 = vrot.lane.b32.xlu1 %v1790_v55, %s3604_s7  ;;  %v1789_v37 = vmul.f32 %v3292_v46, %v4673_v45  ;;  %3313 = vpow2.f32 %v1763_v3 }
0x2014   : > { %v3296_v17 = vpop.eup %3295  ;;  %v1801_v14 = vmul.f32 %v3294_v40, %v4673_v45  ;;  %3315 = vpow2.f32 %v1751_v8 }
0x2015   : > { %1793 = vrot.lane.b32.xlu0 %v1789_v37, %s3604_s7  ;;  %v3298_v24 = vpop.eup %3297  ;;  %v1802_v29 = vmul.f32 %v3296_v17, %v4668_v53  ;;  %3317 = vpow2.f32 %v1749_v27 }
0x2016   : > { %v3300_v2 = vpop.eup %3299  ;;  %v1813_v42 = vmul.f32 %v3298_v24, %v4673_v45  ;;  %3319 = vpow2.f32 %v1769_v26 }
0x2017   : > { %1805 = vrot.lane.b32.xlu1 %v1801_v14, %s3606_s4  ;;  %v3302_v25 = vpop.eup %3301  ;;  %v1814_v52 = vmul.f32 %v3300_v2, %v4668_v53 }
0x2018   : > { %v3304_v63 = vpop.eup %3303  ;;  %v1831_v49 = vmul.f32 %v3302_v25, %v4686_v35 }
0x2019   : > { %1807 = vrot.lane.b32.xlu0 %v1802_v29, %s3606_s4  ;;  %v3306_v38 = vpop.eup %3305  ;;  %v1832_v12 = vmul.f32 %v3304_v63, %v4691_v44 }
0x201a   : > { %v3308_v5 = vpop.eup %3307  ;;  %v1772_v43 = vadd.f32 %v3306_v38, %v3290_v0 }
0x201b   : > { %1817 = vrot.lane.b32.xlu1 %v1813_v42, %s3605_s22  ;;  %v1771_v51 = vadd.f32 %v3308_v5, %v3292_v46  ;;  %v3310_v19 = vpop.eup %3309  ;;  %v1787_v21 = vmul.f32 %v3308_v5, %v4673_v45  ;;  %v1788_v46 = vmul.f32 %v3306_v38, %v4668_v53 }
0x201c   : > { %v1774_v50 = vadd.f32 %v3296_v17, %v1772_v43  ;;  %v3312_v22 = vpop.eup %3311  ;;  %v1843_v15 = vmul.f32 %v3310_v19, %v4686_v35 }
0x201d   : > { %1819 = vrot.lane.b32.xlu0 %v1814_v52, %s3605_s22  ;;  %v1773_v9 = vadd.f32 %v3294_v40, %v1771_v51  ;;  %v3314_v32 = vpop.eup %3313  ;;  %v1855_v7 = vmul.f32 %v3312_v22, %v4686_v35 }
0x201e   : > { %v1776_v47 = vadd.f32 %v3300_v2, %v1774_v50  ;;  %v3316_v48 = vpop.eup %3315  ;;  %v1844_v23 = vmul.f32 %v3314_v32, %v4691_v44 }
0x201f   : > { %1835 = vrot.lane.b32.xlu1 %v1831_v49, %s3604_s7  ;;  %v1775_v10 = vadd.f32 %v3298_v24, %v1773_v9  ;;  %v3318_v41 = vpop.eup %3317  ;;  %v1828_v26 = vmul.f32 %v3316_v48, %v4691_v44 }
0x2020   : > { %v1778_v11 = vadd.f32 %v3316_v48, %v1776_v47  ;;  %v3320_v4 = vpop.eup %3319 }
0x2021   : > { %1837 = vrot.lane.b32.xlu0 %v1832_v12, %s3604_s7  ;;  %v1777_v36 = vadd.f32 %v3318_v41, %v1775_v10  ;;  %v1856_v31 = vmul.f32 %v3320_v4, %v4691_v44 }
0x2022   : > { %v1780_v13 = vadd.f32 %v3304_v63, %v1778_v11 }
0x2023   : > { %1847 = vrot.lane.b32.xlu1 %v1843_v15, %s3606_s4  ;;  %v1779_v54 = vadd.f32 %v3302_v25, %v1777_v36 }
0x2024   : > { %v1782_v16 = vadd.f32 %v3314_v32, %v1780_v13 }
0x2025   : > { %1849 = vrot.lane.b32.xlu0 %v1844_v23, %s3606_s4  ;;  %v1781_v58 = vadd.f32 %v3310_v19, %v1779_v54 }
0x2026   : > { %v1784_v60 = vadd.f32 %v3320_v4, %v1782_v16 }
0x2027   : > { %1859 = vrot.lane.b32.xlu1 %v1855_v7, %s3605_s22  ;;  %v1783_v18 = vadd.f32 %v3312_v22, %v1781_v58  ;;  %v3436_v58 = vld [vmem:[%s3837_s17] sm:$0xff] }
0x2029   : > { %1861 = vrot.lane.b32.xlu0 %v1856_v31, %s3605_s22  ;;  %3321 = vrcp.f32 %v1783_v18  ;;  %v3435_v31 = vld [vmem:[%s3837_s17 + $0x10] sm:$0xff] }
0x202a   : > { %3323 = vrcp.f32 %v1784_v60 }
0x202b   : > { %1881 = vrot.lane.b32.xlu1 %v4376_v34, %s3605_s22  ;;  %v1827_v34 = vmul.f32 %v3318_v41, %v4686_v35 }
0x202d   : > { %1883 = vrot.lane.b32.xlu0 %v4382_v62, %s3605_s22 }
0x2033   : > { %v3322_v51 = vpop.eup %3321 }
0x2034   : > { %v3324_v12 = vpop.eup %3323 }
0x2085   : > { %v1796_v0 = vpop.permute.xlu1 %1795 }
0x2086   : > { %v1800_v3 = vadd.f32 %v1796_v0, %v1788_v46 }
0x2087   : > { %v1794_v39 = vpop.permute.xlu0 %1793 }
0x2088   : > { %v1799_v33 = vadd.f32 %v1794_v39, %v1787_v21 }
0x2089   : > { %v1806_v55 = vpop.permute.xlu1 %1805 }
0x208a   : > { %v1811_v40 = vadd.f32 %v1806_v55, %v1799_v33 }
0x208b   : > { %v1808_v6 = vpop.permute.xlu0 %1807 }
0x208c   : > { %v1812_v8 = vadd.f32 %v1808_v6, %v1800_v3 }
0x208d   : > { %v1818_v37 = vpop.permute.xlu1 %1817 }
0x208e   : > { %v1823_v17 = vadd.f32 %v1818_v37, %v1811_v40 }
0x208f   : > { %v1820_v27 = vpop.permute.xlu0 %1819 }
0x2090   : > { %v1824_v14 = vadd.f32 %v1820_v27, %v1812_v8  ;;  %v1829_v62 = vadd.f32 %v1827_v34, %v1823_v17 }
0x2091   : > { %v1836_v24 = vpop.permute.xlu1 %1835 }
0x2092   : > { %v1830_v2 = vadd.f32 %v1828_v26, %v1824_v14  ;;  %v1841_v42 = vadd.f32 %v1836_v24, %v1829_v62 }
0x2093   : > { %v1838_v29 = vpop.permute.xlu0 %1837 }
0x2094   : > { %v1842_v38 = vadd.f32 %v1838_v29, %v1830_v2 }
0x2095   : > { %v1848_v25 = vpop.permute.xlu1 %1847 }
0x2096   : > { %v1853_v52 = vadd.f32 %v1848_v25, %v1841_v42 }
0x2097   : > { %v1850_v63 = vpop.permute.xlu0 %1849 }
0x2098   : > { %v1854_v43 = vadd.f32 %v1850_v63, %v1842_v38 }
0x2099   : > { %v1860_v5 = vpop.permute.xlu1 %1859 }
0x209a   : > { %v1865_v49 = vadd.f32 %v1860_v5, %v1853_v52 }
0x209b   : > { %v1862_v19 = vpop.permute.xlu0 %1861 }
0x209c   : > { %v1869_v50 = vmul.f32 %v3322_v51, %v1865_v49  ;;  %v1866_v22 = vadd.f32 %v1862_v19, %v1854_v43 }
0x209d   : > { %v1882_v9 = vpop.permute.xlu1 %1881 }
0x209e   : > { %1871 = vst.msk [vmem:[%s4056_s30 + $0x8] sm:$0xff] %vm281_vm0, %v1869_v50  ;;  %v1870_v32 = vmul.f32 %v3324_v12, %v1866_v22  ;;  %v1887_v47 = vmul.f32 %v1882_v9, %v4542_v61 }
0x209f   : > { %v1884_v48 = vpop.permute.xlu0 %1883 }
0x20a0   : > { %1872 = vst.msk [vmem:[%s4056_s30 + $0x18] sm:$0xff] %vm281_vm0, %v1870_v32  ;;  %v1888_v15 = vmul.f32 %v1884_v48, %v4540_v59  ;;  %1891 = vrot.lane.b32.xlu1 %v1887_v47, %s3604_s7 }
0x20a2   : > { %1893 = vrot.lane.b32.xlu0 %v1888_v15, %s3604_s7 }
0x2112   : > { %v1892_v10 = vpop.permute.xlu1 %1891 }
0x2113   : > { %v1897_v41 = vsel %vm281_vm0, %v1892_v10, 0.0 }
0x2114   : > { %v1894_v11 = vpop.permute.xlu0 %1893  ;;  %1898 = vadd.xlane.f32.xlu1 %v1897_v41 }
0x2115   : > { %v1900_v23 = vsel %vm281_vm0, %v1894_v11, 0.0 }
0x2116   : > { %1901 = vadd.xlane.f32.xlu0 %v1900_v23 }
0x2125   : > { %1909 = vrot.lane.b32.xlu1 %v4546_v1, %s3604_s7 }
0x212c   : > { %1907 = vrot.lane.b32.xlu0 %v4550_v57, %s3604_s7 }
0x21a1   : > { %v4728_v36 = vpop.xlane.xlu1 %1898 }
0x21a3   : > { %v4730_v4 = vpop.xlane.xlu0 %1901 }
0x21a5   : > { %v1910_v13 = vpop.permute.xlu1 %1909 }
0x21a6   : > { %v1916_v7 = vsel %vm281_vm0, %v1910_v13, 0.0 }
0x21a7   : > { %v1908_v54 = vpop.permute.xlu0 %1907  ;;  %1917 = vadd.xlane.f32.xlu0 %v1916_v7 }
0x21a8   : > { %v1913_v16 = vsel %vm281_vm0, %v1908_v54, 0.0 }
0x21a9   : > { %1914 = vadd.xlane.f32.xlu1 %v1913_v16 }
0x21ba   : > { %1921 = vrot.lane.b32.xlu1 %v3435_v31, %s3604_s7 }
0x21bd   : > { %1919 = vrot.lane.b32.xlu0 %v3436_v58, %s3604_s7 }
0x2234   : > { %v4738_v1 = vpop.xlane.xlu0 %1917 }
0x2236   : > { %v4740_v57 = vpop.xlane.xlu1 %1914 }
0x2238   : > { %v1920_v60 = vpop.permute.xlu0 %1919 }
0x2239   : > { %v1925_v18 = vmul.f32 %v1920_v60, %v4542_v61  ;;  %v2050_v60 = vmax.f32 %v4730_v4, %v4738_v1 }
0x223a   : > { %v1922_v0 = vpop.permute.xlu1 %1921 }
0x223b   : > { %v1926_v21 = vmul.f32 %v1922_v0, %v4540_v59  ;;  %1929 = vrot.lane.b32.xlu1 %v1925_v18, %s3604_s7 }
0x223d   : > { %1931 = vrot.lane.b32.xlu0 %v1926_v21, %s3604_s7 }
0x22ad   : > { %v1930_v39 = vpop.permute.xlu1 %1929 }
0x22ae   : > { %v1935_v33 = vsel %vm281_vm0, %v1930_v39, 0.0 }
0x22af   : > { %v1932_v55 = vpop.permute.xlu0 %1931  ;;  %1936 = vadd.xlane.f32.xlu1 %v1935_v33 }
0x22b0   : > { %v1938_v46 = vsel %vm281_vm0, %v1932_v55, 0.0 }
0x22b1   : > { %1939 = vadd.xlane.f32.xlu0 %v1938_v46 }
0x22c0   : > { %1943 = vrot.lane.b32.xlu1 %v3435_v31, %s3606_s4 }
0x22c7   : > { %1941 = vrot.lane.b32.xlu0 %v3436_v58, %s3606_s4 }
0x233c   : > { %v4750_v6 = vpop.xlane.xlu1 %1936 }
0x233e   : > { %v4752_v3 = vpop.xlane.xlu0 %1939 }
0x233f   : > { %v2052_v18 = vmax.f32 %v2050_v60, %v4752_v3 }
0x2340   : > { %v1944_v40 = vpop.permute.xlu1 %1943 }
0x2341   : > { %v1948_v37 = vmul.f32 %v1944_v40, %v4540_v59 }
0x2342   : > { %v1942_v8 = vpop.permute.xlu0 %1941 }
0x2343   : > { %v1947_v17 = vmul.f32 %v1942_v8, %v4542_v61  ;;  %1953 = vrot.lane.b32.xlu0 %v1948_v37, %s3604_s7 }
0x2345   : > { %1951 = vrot.lane.b32.xlu1 %v1947_v17, %s3604_s7 }
0x23b5   : > { %v1954_v27 = vpop.permute.xlu0 %1953 }
0x23b6   : > { %v1960_v14 = vsel %vm281_vm0, %v1954_v27, 0.0 }
0x23b7   : > { %v1952_v34 = vpop.permute.xlu1 %1951  ;;  %1961 = vadd.xlane.f32.xlu0 %v1960_v14 }
0x23b8   : > { %v1957_v24 = vsel %vm281_vm0, %v1952_v34, 0.0 }
0x23b9   : > { %1958 = vadd.xlane.f32.xlu1 %v1957_v24 }
0x23ca   : > { %1969 = vrot.lane.b32.xlu1 %v4593_v20, %s3605_s22 }
0x23cd   : > { %1967 = vrot.lane.b32.xlu0 %v4596_v30, %s3605_s22 }
0x2444   : > { %v4764_v62 = vpop.xlane.xlu0 %1961 }
0x2445   : > { %v2054_v21 = vmax.f32 %v2052_v18, %v4764_v62 }
0x2446   : > { %v4766_v26 = vpop.xlane.xlu1 %1958 }
0x2448   : > { %v1968_v29 = vpop.permute.xlu0 %1967 }
0x2449   : > { %v1973_v2 = vmul.f32 %v1968_v29, %v4542_v61 }
0x244a   : > { %v1970_v25 = vpop.permute.xlu1 %1969 }
0x244b   : > { %v1974_v42 = vmul.f32 %v1970_v25, %v4540_v59  ;;  %1977 = vrot.lane.b32.xlu1 %v1973_v2, %s3604_s7 }
0x244d   : > { %1979 = vrot.lane.b32.xlu0 %v1974_v42, %s3604_s7 }
0x24bd   : > { %v1978_v63 = vpop.permute.xlu1 %1977 }
0x24be   : > { %v1983_v38 = vsel %vm281_vm0, %v1978_v63, 0.0 }
0x24bf   : > { %v1980_v52 = vpop.permute.xlu0 %1979  ;;  %1984 = vadd.xlane.f32.xlu1 %v1983_v38 }
0x24c0   : > { %v1986_v5 = vsel %vm281_vm0, %v1980_v52, 0.0 }
0x24c1   : > { %1987 = vadd.xlane.f32.xlu0 %v1986_v5 }
0x24d0   : > { %1995 = vrot.lane.b32.xlu1 %v4601_v28, %s3604_s7 }
0x24d7   : > { %1993 = vrot.lane.b32.xlu0 %v4607_v56, %s3604_s7 }
0x254c   : > { %v4778_v43 = vpop.xlane.xlu1 %1984 }
0x254e   : > { %v4780_v49 = vpop.xlane.xlu0 %1987 }
0x254f   : > { %v2056_v33 = vmax.f32 %v2054_v21, %v4780_v49 }
0x2550   : > { %v1996_v51 = vpop.permute.xlu1 %1995 }
0x2551   : > { %v2002_v19 = vsel %vm281_vm0, %v1996_v51, 0.0 }
0x2552   : > { %v1994_v50 = vpop.permute.xlu0 %1993  ;;  %2003 = vadd.xlane.f32.xlu0 %v2002_v19 }
0x2553   : > { %v1999_v22 = vsel %vm281_vm0, %v1994_v50, 0.0 }
0x2554   : > { %2000 = vadd.xlane.f32.xlu1 %v1999_v22 }
0x2565   : > { %2007 = vrot.lane.b32.xlu1 %v4593_v20, %s3604_s7 }
0x2568   : > { %2005 = vrot.lane.b32.xlu0 %v4596_v30, %s3604_s7 }
0x25df   : > { %v4788_v28 = vpop.xlane.xlu0 %2003 }
0x25e0   : > { %v2058_v46 = vmax.f32 %v2056_v33, %v4788_v28 }
0x25e1   : > { %v4790_v56 = vpop.xlane.xlu1 %2000 }
0x25e3   : > { %v2006_v12 = vpop.permute.xlu0 %2005 }
0x25e4   : > { %v2011_v9 = vmul.f32 %v2006_v12, %v4542_v61 }
0x25e5   : > { %v2008_v32 = vpop.permute.xlu1 %2007 }
0x25e6   : > { %v2012_v47 = vmul.f32 %v2008_v32, %v4540_v59  ;;  %2015 = vrot.lane.b32.xlu1 %v2011_v9, %s3604_s7 }
0x25e8   : > { %2017 = vrot.lane.b32.xlu0 %v2012_v47, %s3604_s7 }
0x2658   : > { %v2016_v48 = vpop.permute.xlu1 %2015 }
0x2659   : > { %v2021_v15 = vsel %vm281_vm0, %v2016_v48, 0.0 }
0x265a   : > { %v2018_v10 = vpop.permute.xlu0 %2017  ;;  %2022 = vadd.xlane.f32.xlu1 %v2021_v15 }
0x265b   : > { %v2024_v41 = vsel %vm281_vm0, %v2018_v10, 0.0 }
0x265c   : > { %2025 = vadd.xlane.f32.xlu0 %v2024_v41 }
0x266b   : > { %2029 = vrot.lane.b32.xlu1 %v4593_v20, %s3606_s4 }
0x2672   : > { %2027 = vrot.lane.b32.xlu0 %v4596_v30, %s3606_s4 }
0x26e7   : > { %v4802_v11 = vpop.xlane.xlu1 %2022 }
0x26e9   : > { %v4804_v23 = vpop.xlane.xlu0 %2025 }
0x26ea   : > { %v2060_v37 = vmax.f32 %v2058_v46, %v4804_v23 }
0x26eb   : > { %v2030_v13 = vpop.permute.xlu1 %2029 }
0x26ec   : > { %v2034_v7 = vmul.f32 %v2030_v13, %v4540_v59  ;;  %v2049_v59 = vmax.f32 %v4728_v36, %v4740_v57 }
0x26ed   : > { %v2028_v54 = vpop.permute.xlu0 %2027 }
0x26ee   : > { %v2033_v16 = vmul.f32 %v2028_v54, %v4542_v61  ;;  %2039 = vrot.lane.b32.xlu0 %v2034_v7, %s3604_s7  ;;  %v2051_v0 = vmax.f32 %v2049_v59, %v4750_v6 }
0x26f0   : > { %2037 = vrot.lane.b32.xlu1 %v2033_v16, %s3604_s7  ;;  %v2053_v39 = vmax.f32 %v2051_v0, %v4766_v26 }
0x26f2   : > { %v2055_v55 = vmax.f32 %v2053_v39, %v4778_v43 }
0x26f4   : > { %v2057_v40 = vmax.f32 %v2055_v55, %v4790_v56 }
0x26f6   : > { %v2059_v17 = vmax.f32 %v2057_v40, %v4802_v11 }
0x2760   : > { %v2040_v31 = vpop.permute.xlu0 %2039 }
0x2761   : > { %v2046_v20 = vsel %vm281_vm0, %v2040_v31, 0.0 }
0x2762   : > { %v2038_v58 = vpop.permute.xlu1 %2037  ;;  %2047 = vadd.xlane.f32.xlu0 %v2046_v20 }
0x2763   : > { %v2043_v30 = vsel %vm281_vm0, %v2038_v58, 0.0 }
0x2764   : > { %2044 = vadd.xlane.f32.xlu1 %v2043_v30 }
0x27ef   : > { %v2048_v8 = vpop.xlane.xlu0 %2047 }
0x27f0   : > { %v2062_v27 = vmax.f32 %v2060_v37, %v2048_v8 }
0x27f1   : > { %v2045_v14 = vpop.xlane.xlu1 %2044 }
0x27f2   : > { %v2061_v34 = vmax.f32 %v2059_v17, %v2045_v14  ;;  %v2070_v24 = vsub.f32 %v4738_v1, %v2062_v27  ;;  %v2076_v29 = vsub.f32 %v4752_v3, %v2062_v27  ;;  %v2082_v51 = vsub.f32 %v4764_v62, %v2062_v27 }
0x27f3   : > { %v2094_v1 = vsub.f32 %v4788_v28, %v2062_v27  ;;  %v2064_v3 = vsub.f32 %v4730_v4, %v2062_v27  ;;  %v2088_v28 = vsub.f32 %v4780_v49, %v2062_v27  ;;  %v2106_v41 = vsub.f32 %v2048_v8, %v2062_v27 }
0x27f4   : > { %v2073_v2 = vmul.f32 1.442695, %v2070_v24  ;;  %v2069_v25 = vsub.f32 %v4740_v57, %v2061_v34  ;;  %v2075_v42 = vsub.f32 %v4750_v6, %v2061_v34  ;;  %v2081_v63 = vsub.f32 %v4766_v26, %v2061_v34 }
0x27f5   : > { %v2079_v5 = vmul.f32 1.442695, %v2076_v29  ;;  %v2093_v19 = vsub.f32 %v4790_v56, %v2061_v34  ;;  %v2085_v57 = vmul.f32 1.442695, %v2082_v51  ;;  %v2063_v6 = vsub.f32 %v4728_v36, %v2061_v34 }
0x27f6   : > { %v2071_v38 = vmul.f32 1.442695, %v2069_v25  ;;  %3325 = vpow2.f32 %v2073_v2  ;;  %v2077_v52 = vmul.f32 1.442695, %v2075_v42  ;;  %v2083_v50 = vmul.f32 1.442695, %v2081_v63 }
0x27f7   : > { %v2095_v26 = vmul.f32 1.442695, %v2093_v19  ;;  %v2097_v22 = vmul.f32 1.442695, %v2094_v1  ;;  %v2099_v12 = vsub.f32 %v4802_v11, %v2061_v34  ;;  %v2105_v9 = vsub.f32 %v2045_v14, %v2061_v34 }
0x27f8   : > { %3327 = vpow2.f32 %v2071_v38  ;;  %v2067_v62 = vmul.f32 1.442695, %v2064_v3  ;;  %v2100_v56 = vsub.f32 %v4804_v23, %v2062_v27  ;;  %v2065_v32 = vmul.f32 1.442695, %v2063_v6 }
0x27f9   : > { %3329 = vpow2.f32 %v2077_v52  ;;  %v2101_v4 = vmul.f32 1.442695, %v2099_v12  ;;  %v2087_v48 = vsub.f32 %v4778_v43, %v2061_v34  ;;  %v2107_v36 = vmul.f32 1.442695, %v2105_v9 }
0x27fa   : > { %3331 = vpow2.f32 %v2079_v5  ;;  %v2103_v11 = vmul.f32 1.442695, %v2100_v56  ;;  %v2091_v7 = vmul.f32 1.442695, %v2088_v28  ;;  %v2109_v31 = vmul.f32 1.442695, %v2106_v41 }
0x27fb   : > { %3333 = vpow2.f32 %v2083_v50  ;;  %v2089_v54 = vmul.f32 1.442695, %v2087_v48 }
0x27fc   : > { %3335 = vpow2.f32 %v2085_v57 }
0x27fd   : > { %3337 = vpow2.f32 %v2095_v26 }
0x27fe   : > { %3339 = vpow2.f32 %v2097_v22 }
0x27ff   : > { %3341 = vpow2.f32 %v2067_v62 }
0x2800   : > { %v3326_v47 = vpop.eup %3325  ;;  %3343 = vpow2.f32 %v2065_v32 }
0x2801   : > { %v2130_v15 = vmul.f32 %v3326_v47, %v4668_v53  ;;  %3345 = vpow2.f32 %v2101_v4 }
0x2802   : > { %v3328_v10 = vpop.eup %3327  ;;  %3347 = vpow2.f32 %v2107_v36 }
0x2803   : > { %v3330_v13 = vpop.eup %3329  ;;  %2135 = vrot.lane.b32.xlu1 %v2130_v15, %s3604_s7  ;;  %v2129_v23 = vmul.f32 %v3328_v10, %v4673_v45  ;;  %3349 = vpow2.f32 %v2103_v11 }
0x2804   : > { %v3332_v49 = vpop.eup %3331  ;;  %v2141_v43 = vmul.f32 %v3330_v13, %v4673_v45  ;;  %3351 = vpow2.f32 %v2091_v7 }
0x2805   : > { %2133 = vrot.lane.b32.xlu0 %v2129_v23, %s3604_s7  ;;  %v3334_v16 = vpop.eup %3333  ;;  %v2142_v20 = vmul.f32 %v3332_v49, %v4668_v53  ;;  %3353 = vpow2.f32 %v2089_v54 }
0x2806   : > { %v3336_v58 = vpop.eup %3335  ;;  %v2153_v60 = vmul.f32 %v3334_v16, %v4673_v45  ;;  %3355 = vpow2.f32 %v2109_v31 }
0x2807   : > { %2145 = vrot.lane.b32.xlu1 %v2141_v43, %s3606_s4  ;;  %v3338_v30 = vpop.eup %3337  ;;  %v2154_v0 = vmul.f32 %v3336_v58, %v4668_v53 }
0x2808   : > { %v3340_v59 = vpop.eup %3339  ;;  %v2171_v33 = vmul.f32 %v3338_v30, %v4686_v35 }
0x2809   : > { %2147 = vrot.lane.b32.xlu0 %v2142_v20, %s3606_s4  ;;  %v3342_v18 = vpop.eup %3341  ;;  %v2172_v8 = vmul.f32 %v3340_v59, %v4691_v44 }
0x280a   : > { %v3344_v21 = vpop.eup %3343  ;;  %v2112_v39 = vadd.f32 %v3342_v18, %v3326_v47  ;;  %v2128_v62 = vmul.f32 %v3342_v18, %v4668_v53  ;;  %v4870_v18 = vld [vmem:[%s3837_s17] sm:$0xff] }
0x280b   : > { %2157 = vrot.lane.b32.xlu1 %v2153_v60, %s3605_s22  ;;  %v2111_v55 = vadd.f32 %v3344_v21, %v3328_v10  ;;  %v3346_v46 = vpop.eup %3345  ;;  %v2127_v26 = vmul.f32 %v3344_v21, %v4673_v45 }
0x280c   : > { %v2114_v40 = vadd.f32 %v3332_v49, %v2112_v39  ;;  %v3348_v37 = vpop.eup %3347  ;;  %v2183_v24 = vmul.f32 %v3346_v46, %v4686_v35  ;;  %v2222_v39 = vld [vmem:[%s3829_s9 + $0x18] sm:$0xff] }
0x280d   : > { %2159 = vrot.lane.b32.xlu0 %v2154_v0, %s3605_s22  ;;  %v2113_v17 = vadd.f32 %v3330_v13, %v2111_v55  ;;  %v3350_v27 = vpop.eup %3349  ;;  %v2195_v5 = vmul.f32 %v3348_v37, %v4686_v35  ;;  %v4874_v0 = vld [vmem:[%s3837_s17 + $0x10] sm:$0xff]  ;;  %v4885_v55 = vmul.f32 0.17677669, %v2222_v39 }
0x280e   : > { %v2116_v14 = vadd.f32 %v3336_v58, %v2114_v40  ;;  %v3352_v34 = vpop.eup %3351  ;;  %v2184_v42 = vmul.f32 %v3350_v27, %v4691_v44 }
0x280f   : > { %2175 = vrot.lane.b32.xlu1 %v2171_v33, %s3604_s7  ;;  %v2115_v29 = vadd.f32 %v3334_v16, %v2113_v17  ;;  %v3354_v2 = vpop.eup %3353  ;;  %v2168_v45 = vmul.f32 %v3352_v34, %v4691_v44 }
0x2810   : > { %v2118_v25 = vadd.f32 %v3352_v34, %v2116_v14  ;;  %v3356_v38 = vpop.eup %3355  ;;  %v2167_v10 = vmul.f32 %v3354_v2, %v4686_v35 }
0x2811   : > { %2177 = vrot.lane.b32.xlu0 %v2172_v8, %s3604_s7  ;;  %v2117_v63 = vadd.f32 %v3354_v2, %v2115_v29  ;;  %v2196_v50 = vmul.f32 %v3356_v38, %v4691_v44 }
0x2812   : > { %v2120_v52 = vadd.f32 %v3340_v59, %v2118_v25 }
0x2813   : > { %2187 = vrot.lane.b32.xlu1 %v2183_v24, %s3606_s4  ;;  %v2119_v51 = vadd.f32 %v3338_v30, %v2117_v63 }
0x2814   : > { %v2122_v19 = vadd.f32 %v3350_v27, %v2120_v52 }
0x2815   : > { %2189 = vrot.lane.b32.xlu0 %v2184_v42, %s3606_s4  ;;  %v2121_v1 = vadd.f32 %v3346_v46, %v2119_v51 }
0x2816   : > { %v2124_v3 = vadd.f32 %v3356_v38, %v2122_v19  ;;  %v4909_v19 = vmul.f32 %v4874_v0, %v4885_v55 }
0x2817   : > { %2199 = vrot.lane.b32.xlu1 %v2195_v5, %s3605_s22  ;;  %v2123_v57 = vadd.f32 %v3348_v37, %v2121_v1 }
0x2819   : > { %2201 = vrot.lane.b32.xlu0 %v2196_v50, %s3605_s22  ;;  %3357 = vrcp.f32 %v2123_v57  ;;  %v2273_v50 = vmul.f32 %v4870_v18, %v4542_v61 }
0x281a   : > { %3359 = vrcp.f32 %v2124_v3 }
0x2823   : > { %v3358_v20 = vpop.eup %3357 }
0x2824   : > { %v3360_v60 = vpop.eup %3359 }
0x2875   : > { %v2136_v6 = vpop.permute.xlu1 %2135 }
0x2876   : > { %v2140_v32 = vadd.f32 %v2136_v6, %v2128_v62 }
0x2877   : > { %v2134_v22 = vpop.permute.xlu0 %2133 }
0x2878   : > { %v2139_v12 = vadd.f32 %v2134_v22, %v2127_v26 }
0x2879   : > { %v2146_v9 = vpop.permute.xlu1 %2145 }
0x287a   : > { %v2151_v28 = vadd.f32 %v2146_v9, %v2139_v12 }
0x287b   : > { %v2148_v56 = vpop.permute.xlu0 %2147 }
0x287c   : > { %v2152_v4 = vadd.f32 %v2148_v56, %v2140_v32 }
0x287d   : > { %v2158_v47 = vpop.permute.xlu1 %2157 }
0x287e   : > { %v2163_v48 = vadd.f32 %v2158_v47, %v2151_v28 }
0x287f   : > { %v2160_v36 = vpop.permute.xlu0 %2159 }
0x2880   : > { %v2164_v15 = vadd.f32 %v2160_v36, %v2152_v4  ;;  %v2169_v11 = vadd.f32 %v2167_v10, %v2163_v48  ;;  %v4940_v10 = vld [vmem:[%s3837_s17 + $0x8] sm:$0xff] }
0x2881   : > { %v2176_v41 = vpop.permute.xlu1 %2175 }
0x2882   : > { %v2170_v23 = vadd.f32 %v2168_v45, %v2164_v15  ;;  %v2181_v7 = vadd.f32 %v2176_v41, %v2169_v11  ;;  %v4937_v15 = vld [vmem:[%s3837_s17 + $0x18] sm:$0xff] }
0x2883   : > { %v2178_v13 = vpop.permute.xlu0 %2177  ;;  %v4972_v39 = vmul.f32 %v4937_v15, %v4885_v55 }
0x2884   : > { %v2182_v54 = vadd.f32 %v2178_v13, %v2170_v23 }
0x2885   : > { %v2188_v53 = vpop.permute.xlu1 %2187 }
0x2886   : > { %v2193_v43 = vadd.f32 %v2188_v53, %v2181_v7 }
0x2887   : > { %v2190_v49 = vpop.permute.xlu0 %2189 }
0x2888   : > { %v2194_v31 = vadd.f32 %v2190_v49, %v2182_v54 }
0x2889   : > { %v2200_v16 = vpop.permute.xlu1 %2199 }
0x288a   : > { %v2205_v35 = vadd.f32 %v2200_v16, %v2193_v43 }
0x288b   : > { %v2202_v58 = vpop.permute.xlu0 %2201 }
0x288c   : > { %v2209_v30 = vmul.f32 %v3358_v20, %v2205_v35  ;;  %v2206_v44 = vadd.f32 %v2202_v58, %v2194_v31 }
0x288e   : > { %v2210_v59 = vmul.f32 %v3360_v60, %v2206_v44  ;;  %2213 = vrot.lane.b32.xlu1 %v2209_v30, %s3605_s22 }
0x2890   : > { %2215 = vrot.lane.b32.xlu0 %v2210_v59, %s3605_s22 }
0x2892   : > { %2229 = vrot.lane.b32.xlu1 %v4870_v18, %s3606_s4 }
0x2894   : > { %2231 = vrot.lane.b32.xlu0 %v4874_v0, %s3606_s4 }
0x2900   : > { %v2214_v21 = vpop.permute.xlu1 %2213 }
0x2901   : > { %2219 = vst.msk [vmem:[%s4056_s30 + $0x8] sm:$0xff] %vm896_vm1, %v2214_v21 }
0x2902   : > { %v2216_v33 = vpop.permute.xlu0 %2215 }
0x2903   : > { %2220 = vst.msk [vmem:[%s4056_s30 + $0x18] sm:$0xff] %vm896_vm1, %v2216_v33  ;;  %v2359_v33 = vmul.f32 %v4940_v10, %v4542_v61 }
0x2904   : > { %v2230_v46 = vpop.permute.xlu1 %2229 }
0x2905   : > { %v2235_v40 = vmul.f32 %v2230_v46, %v4542_v61 }
0x2906   : > { %v2232_v37 = vpop.permute.xlu0 %2231 }
0x2907   : > { %v2236_v8 = vmul.f32 %v2232_v37, %v4885_v55  ;;  %2239 = vrot.lane.b32.xlu1 %v2235_v40, %s3606_s4 }
0x2909   : > { %2241 = vrot.lane.b32.xlu0 %v2236_v8, %s3606_s4 }
0x2979   : > { %v2240_v17 = vpop.permute.xlu1 %2239 }
0x297a   : > { %v2245_v27 = vsel %vm281_vm0, %v2240_v17, 0.0 }
0x297b   : > { %v2242_v14 = vpop.permute.xlu0 %2241  ;;  %2246 = vadd.xlane.f32.xlu1 %v2245_v27 }
0x297c   : > { %v2248_v34 = vsel %vm281_vm0, %v2242_v14, 0.0 }
0x297d   : > { %2249 = vadd.xlane.f32.xlu0 %v2248_v34 }
0x298c   : > { %2253 = vrot.lane.b32.xlu1 %v4874_v0, %s3605_s22 }
0x2993   : > { %2251 = vrot.lane.b32.xlu0 %v4870_v18, %s3605_s22 }
0x2a08   : > { %v4897_v24 = vpop.xlane.xlu1 %2246 }
0x2a0a   : > { %v4899_v29 = vpop.xlane.xlu0 %2249 }
0x2a0c   : > { %v2254_v2 = vpop.permute.xlu1 %2253 }
0x2a0d   : > { %v2258_v25 = vmul.f32 %v2254_v2, %v4885_v55 }
0x2a0e   : > { %v2252_v42 = vpop.permute.xlu0 %2251 }
0x2a0f   : > { %v2257_v63 = vmul.f32 %v2252_v42, %v4542_v61  ;;  %2263 = vrot.lane.b32.xlu0 %v2258_v25, %s3606_s4 }
0x2a11   : > { %2261 = vrot.lane.b32.xlu1 %v2257_v63, %s3606_s4 }
0x2a81   : > { %v2264_v38 = vpop.permute.xlu0 %2263 }
0x2a82   : > { %v2270_v52 = vsel %vm281_vm0, %v2264_v38, 0.0 }
0x2a83   : > { %v2262_v5 = vpop.permute.xlu1 %2261  ;;  %2271 = vadd.xlane.f32.xlu0 %v2270_v52 }
0x2a84   : > { %v2267_v51 = vsel %vm281_vm0, %v2262_v5, 0.0 }
0x2a85   : > { %2268 = vadd.xlane.f32.xlu1 %v2267_v51 }
0x2a96   : > { %2279 = vrot.lane.b32.xlu1 %v4909_v19, %s3606_s4 }
0x2a99   : > { %2277 = vrot.lane.b32.xlu0 %v2273_v50, %s3606_s4 }
0x2b10   : > { %v4916_v1 = vpop.xlane.xlu0 %2271 }
0x2b12   : > { %v4918_v3 = vpop.xlane.xlu1 %2268 }
0x2b14   : > { %v2278_v57 = vpop.permute.xlu0 %2277 }
0x2b15   : > { %v2283_v6 = vsel %vm281_vm0, %v2278_v57, 0.0 }
0x2b16   : > { %v2280_v26 = vpop.permute.xlu1 %2279  ;;  %2284 = vadd.xlane.f32.xlu1 %v2283_v6 }
0x2b17   : > { %v2286_v22 = vsel %vm281_vm0, %v2280_v26, 0.0 }
0x2b18   : > { %2287 = vadd.xlane.f32.xlu0 %v2286_v22 }
0x2b27   : > { %2291 = vrot.lane.b32.xlu1 %v4874_v0, %s3604_s7 }
0x2b2e   : > { %2289 = vrot.lane.b32.xlu0 %v4870_v18, %s3604_s7 }
0x2ba3   : > { %v4926_v12 = vpop.xlane.xlu1 %2284 }
0x2ba5   : > { %v4928_v9 = vpop.xlane.xlu0 %2287 }
0x2ba7   : > { %v2292_v62 = vpop.permute.xlu1 %2291 }
0x2ba8   : > { %v2296_v56 = vmul.f32 %v2292_v62, %v4885_v55 }
0x2ba9   : > { %v2290_v32 = vpop.permute.xlu0 %2289 }
0x2baa   : > { %v2295_v28 = vmul.f32 %v2290_v32, %v4542_v61  ;;  %2301 = vrot.lane.b32.xlu0 %v2296_v56, %s3606_s4  ;;  %v2398_v56 = vmax.f32 %v4899_v29, %v4916_v1 }
0x2bac   : > { %2299 = vrot.lane.b32.xlu1 %v2295_v28, %s3606_s4  ;;  %v2397_v28 = vmax.f32 %v4897_v24, %v4918_v3 }
0x2c1c   : > { %v2302_v47 = vpop.permute.xlu0 %2301 }
0x2c1d   : > { %v2308_v4 = vsel %vm281_vm0, %v2302_v47, 0.0  ;;  %v2400_v47 = vmax.f32 %v2398_v56, %v4928_v9 }
0x2c1e   : > { %v2300_v48 = vpop.permute.xlu1 %2299  ;;  %2309 = vadd.xlane.f32.xlu0 %v2308_v4 }
0x2c1f   : > { %v2305_v36 = vsel %vm281_vm0, %v2300_v48, 0.0  ;;  %v2399_v48 = vmax.f32 %v2397_v28, %v4926_v12 }
0x2c20   : > { %2306 = vadd.xlane.f32.xlu1 %v2305_v36 }
0x2c31   : > { %2317 = vrot.lane.b32.xlu1 %v4937_v15, %s3606_s4 }
0x2c34   : > { %2315 = vrot.lane.b32.xlu0 %v4940_v10, %s3606_s4 }
0x2cab   : > { %v4946_v41 = vpop.xlane.xlu0 %2309 }
0x2cac   : > { %v2402_v36 = vmax.f32 %v2400_v47, %v4946_v41 }
0x2cad   : > { %v4948_v11 = vpop.xlane.xlu1 %2306 }
0x2caf   : > { %v2316_v45 = vpop.permute.xlu0 %2315 }
0x2cb0   : > { %v2321_v13 = vmul.f32 %v2316_v45, %v4542_v61 }
0x2cb1   : > { %v2318_v23 = vpop.permute.xlu1 %2317 }
0x2cb2   : > { %v2322_v53 = vmul.f32 %v2318_v23, %v4885_v55  ;;  %2325 = vrot.lane.b32.xlu1 %v2321_v13, %s3606_s4 }
0x2cb4   : > { %2327 = vrot.lane.b32.xlu0 %v2322_v53, %s3606_s4 }
0x2d24   : > { %v2326_v7 = vpop.permute.xlu1 %2325 }
0x2d25   : > { %v2331_v49 = vsel %vm281_vm0, %v2326_v7, 0.0 }
0x2d26   : > { %v2328_v54 = vpop.permute.xlu0 %2327  ;;  %2332 = vadd.xlane.f32.xlu1 %v2331_v49 }
0x2d27   : > { %v2334_v43 = vsel %vm281_vm0, %v2328_v54, 0.0 }
0x2d28   : > { %2335 = vadd.xlane.f32.xlu0 %v2334_v43 }
0x2d37   : > { %2339 = vrot.lane.b32.xlu1 %v4937_v15, %s3605_s22 }
0x2d3e   : > { %2337 = vrot.lane.b32.xlu0 %v4940_v10, %s3605_s22 }
0x2db3   : > { %v4960_v16 = vpop.xlane.xlu1 %2332 }
0x2db5   : > { %v4962_v31 = vpop.xlane.xlu0 %2335 }
0x2db6   : > { %v2404_v45 = vmax.f32 %v2402_v36, %v4962_v31 }
0x2db7   : > { %v2340_v35 = vpop.permute.xlu1 %2339 }
0x2db8   : > { %v2344_v20 = vmul.f32 %v2340_v35, %v4885_v55 }
0x2db9   : > { %v2338_v58 = vpop.permute.xlu0 %2337 }
0x2dba   : > { %v2343_v30 = vmul.f32 %v2338_v58, %v4542_v61  ;;  %2349 = vrot.lane.b32.xlu0 %v2344_v20, %s3606_s4 }
0x2dbc   : > { %2347 = vrot.lane.b32.xlu1 %v2343_v30, %s3606_s4 }
0x2e2c   : > { %v2350_v44 = vpop.permute.xlu0 %2349 }
0x2e2d   : > { %v2356_v60 = vsel %vm281_vm0, %v2350_v44, 0.0 }
0x2e2e   : > { %v2348_v59 = vpop.permute.xlu1 %2347  ;;  %2357 = vadd.xlane.f32.xlu0 %v2356_v60 }
0x2e2f   : > { %v2353_v21 = vsel %vm281_vm0, %v2348_v59, 0.0 }
0x2e30   : > { %2354 = vadd.xlane.f32.xlu1 %v2353_v21 }
0x2e41   : > { %2365 = vrot.lane.b32.xlu1 %v4972_v39, %s3606_s4 }
0x2e44   : > { %2363 = vrot.lane.b32.xlu0 %v2359_v33, %s3606_s4 }
0x2ebb   : > { %v4979_v46 = vpop.xlane.xlu0 %2357 }
0x2ebc   : > { %v2406_v53 = vmax.f32 %v2404_v45, %v4979_v46 }
0x2ebd   : > { %v4981_v40 = vpop.xlane.xlu1 %2354 }
0x2ebf   : > { %v2364_v37 = vpop.permute.xlu0 %2363 }
0x2ec0   : > { %v2369_v8 = vsel %vm281_vm0, %v2364_v37, 0.0 }
0x2ec1   : > { %v2366_v17 = vpop.permute.xlu1 %2365  ;;  %2370 = vadd.xlane.f32.xlu1 %v2369_v8 }
0x2ec2   : > { %v2372_v27 = vsel %vm281_vm0, %v2366_v17, 0.0 }
0x2ec3   : > { %2373 = vadd.xlane.f32.xlu0 %v2372_v27 }
0x2ed2   : > { %2377 = vrot.lane.b32.xlu1 %v4937_v15, %s3604_s7 }
0x2ed9   : > { %2375 = vrot.lane.b32.xlu0 %v4940_v10, %s3604_s7 }
0x2f4e   : > { %v4989_v14 = vpop.xlane.xlu1 %2370 }
0x2f50   : > { %v4991_v34 = vpop.xlane.xlu0 %2373 }
0x2f51   : > { %v2408_v54 = vmax.f32 %v2406_v53, %v4991_v34 }
0x2f52   : > { %v2378_v2 = vpop.permute.xlu1 %2377 }
0x2f53   : > { %v2382_v25 = vmul.f32 %v2378_v2, %v4885_v55 }
0x2f54   : > { %v2376_v42 = vpop.permute.xlu0 %2375 }
0x2f55   : > { %v2381_v63 = vmul.f32 %v2376_v42, %v4542_v61  ;;  %2387 = vrot.lane.b32.xlu0 %v2382_v25, %s3606_s4 }
0x2f57   : > { %2385 = vrot.lane.b32.xlu1 %v2381_v63, %s3606_s4 }
0x2f59   : > { %2579 = vrot.lane.b32.xlu0 %v4874_v0, %s3604_s7 }
0x2f5b   : > { %2577 = vrot.lane.b32.xlu1 %v4870_v18, %s3604_s7 }
0x2f5d   : > { %2601 = vrot.lane.b32.xlu0 %v4874_v0, %s3606_s4 }
0x2f5f   : > { %2599 = vrot.lane.b32.xlu1 %v4870_v18, %s3606_s4 }
0x2f61   : > { %2623 = vrot.lane.b32.xlu0 %v4874_v0, %s3605_s22 }
0x2f63   : > { %2621 = vrot.lane.b32.xlu1 %v4870_v18, %s3605_s22 }
0x2f65   : > { %2665 = vrot.lane.b32.xlu0 %v4937_v15, %s3604_s7 }
0x2f67   : > { %2663 = vrot.lane.b32.xlu1 %v4940_v10, %s3604_s7 }
0x2f69   : > { %2687 = vrot.lane.b32.xlu0 %v4937_v15, %s3606_s4 }
0x2f6b   : > { %2685 = vrot.lane.b32.xlu1 %v4940_v10, %s3606_s4 }
0x2f6d   : > { %2709 = vrot.lane.b32.xlu0 %v4937_v15, %s3605_s22  ;;  %v2401_v15 = vmax.f32 %v2399_v48, %v4948_v11 }
0x2f6f   : > { %2707 = vrot.lane.b32.xlu1 %v4940_v10, %s3605_s22  ;;  %v2403_v23 = vmax.f32 %v2401_v15, %v4960_v16 }
0x2f71   : > { %v2405_v49 = vmax.f32 %v2403_v23, %v4981_v40 }
0x2f73   : > { %v2407_v35 = vmax.f32 %v2405_v49, %v4989_v14 }
0x2fc7   : > { %v2388_v61 = vpop.permute.xlu0 %2387 }
0x2fc8   : > { %v2394_v0 = vsel %vm281_vm0, %v2388_v61, 0.0  ;;  %v5074_v61 = vld [vmem:[%s3994_s11] sm:$0xff] }
0x2fc9   : > { %v2386_v38 = vpop.permute.xlu1 %2385  ;;  %2395 = vadd.xlane.f32.xlu0 %v2394_v0 }
0x2fca   : > { %v2391_v52 = vsel %vm281_vm0, %v2386_v38, 0.0 }
0x2fcb   : > { %2392 = vadd.xlane.f32.xlu1 %v2391_v52  ;;  %v5023_v5 = vpop.permute.xlu0 %2579 }
0x2fcd   : > { %v5025_v51 = vpop.permute.xlu1 %2577 }
0x2fcf   : > { %v5027_v50 = vpop.permute.xlu0 %2601 }
0x2fd1   : > { %v5029_v57 = vpop.permute.xlu1 %2599 }
0x2fd3   : > { %v5031_v6 = vpop.permute.xlu0 %2623 }
0x2fd5   : > { %v5033_v26 = vpop.permute.xlu1 %2621 }
0x2fd7   : > { %v5035_v22 = vpop.permute.xlu0 %2665 }
0x2fd9   : > { %v5037_v62 = vpop.permute.xlu1 %2663 }
0x2fdb   : > { %v5041_v32 = vpop.permute.xlu0 %2687 }
0x2fdd   : > { %v5046_v4 = vpop.permute.xlu1 %2685 }
0x2fdf   : > { %v5052_v13 = vpop.permute.xlu0 %2709 }
0x2fe1   : > { %v5056_v7 = vpop.permute.xlu1 %2707 }
0x3056   : > { %v2396_v43 = vpop.xlane.xlu0 %2395 }
0x3057   : > { %v2410_v20 = vmax.f32 %v2408_v54, %v2396_v43 }
0x3058   : > { %v2393_v58 = vpop.xlane.xlu1 %2392 }
0x3059   : > { %v2409_v30 = vmax.f32 %v2407_v35, %v2393_v58  ;;  %v2418_v44 = vsub.f32 %v4916_v1, %v2410_v20  ;;  %v2424_v60 = vsub.f32 %v4928_v9, %v2410_v20  ;;  %v2412_v1 = vsub.f32 %v4899_v29, %v2410_v20 }
0x305a   : > { %v2436_v42 = vsub.f32 %v4962_v31, %v2410_v20  ;;  %v2448_v28 = vsub.f32 %v4991_v34, %v2410_v20  ;;  %v2454_v45 = vsub.f32 %v2396_v43, %v2410_v20 }
0x305b   : > { %v2421_v59 = vmul.f32 1.442695, %v2418_v44  ;;  %v2417_v21 = vsub.f32 %v4918_v3, %v2409_v30  ;;  %v2423_v33 = vsub.f32 %v4926_v12, %v2409_v30  ;;  %v2429_v37 = vsub.f32 %v4948_v11, %v2409_v30  ;;  %v5070_v12 = vld [vmem:[%s3994_s11 + $0x10] sm:$0xff] }
0x305c   : > { %v2427_v27 = vmul.f32 1.442695, %v2424_v60  ;;  %v2411_v9 = vsub.f32 %v4897_v24, %v2409_v30  ;;  %v2430_v3 = vsub.f32 %v4946_v41, %v2410_v20  ;;  %v2415_v25 = vmul.f32 1.442695, %v2412_v1 }
0x305d   : > { %v2419_v8 = vmul.f32 1.442695, %v2417_v21  ;;  %3361 = vpow2.f32 %v2421_v59  ;;  %v2425_v17 = vmul.f32 1.442695, %v2423_v33  ;;  %v2431_v2 = vmul.f32 1.442695, %v2429_v37 }
0x305e   : > { %v2413_v11 = vmul.f32 1.442695, %v2411_v9  ;;  %v2435_v0 = vsub.f32 %v4960_v16, %v2409_v30  ;;  %v2433_v38 = vmul.f32 1.442695, %v2430_v3  ;;  %v2442_v24 = vsub.f32 %v4979_v46, %v2410_v20  ;;  %v2569_v16 = vld [vmem:[%s3829_s9 + $0x8] sm:$0xff] }
0x305f   : > { %3363 = vpow2.f32 %v2419_v8  ;;  %v2441_v41 = vsub.f32 %v4981_v40, %v2409_v30  ;;  %v2439_v47 = vmul.f32 1.442695, %v2436_v42  ;;  %v2447_v36 = vsub.f32 %v4989_v14, %v2409_v30 }
0x3060   : > { %3365 = vpow2.f32 %v2425_v17  ;;  %v2437_v15 = vmul.f32 1.442695, %v2435_v0  ;;  %v2445_v40 = vmul.f32 1.442695, %v2442_v24  ;;  %v2453_v53 = vsub.f32 %v2393_v58, %v2409_v30 }
0x3061   : > { %3367 = vpow2.f32 %v2427_v27  ;;  %v2443_v49 = vmul.f32 1.442695, %v2441_v41  ;;  %v5087_v54 = vmul.f32 0.17677669, %v2569_v16  ;;  %v2451_v35 = vmul.f32 1.442695, %v2448_v28 }
0x3062   : > { %3369 = vpow2.f32 %v2431_v2  ;;  %v2449_v14 = vmul.f32 1.442695, %v2447_v36  ;;  %v2457_v43 = vmul.f32 1.442695, %v2454_v45  ;;  %v2455_v44 = vmul.f32 1.442695, %v2453_v53 }
0x3063   : > { %3371 = vpow2.f32 %v2415_v25  ;;  %v2583_v30 = vmul.f32 %v5025_v51, %v5087_v54  ;;  %v2584_v21 = vmul.f32 %v5023_v5, %v4885_v55  ;;  %v2605_v51 = vmul.f32 %v5029_v57, %v5087_v54 }
0x3064   : > { %3373 = vpow2.f32 %v2413_v11  ;;  %v2606_v5 = vmul.f32 %v5027_v50, %v4885_v55  ;;  %v2627_v57 = vmul.f32 %v5033_v26, %v5087_v54  ;;  %v2628_v50 = vmul.f32 %v5031_v6, %v4885_v55 }
0x3065   : > { %3375 = vpow2.f32 %v2433_v38  ;;  %v2669_v6 = vmul.f32 %v5037_v62, %v5087_v54  ;;  %v2713_v62 = vmul.f32 %v5056_v7, %v5087_v54  ;;  %v5161_v7 = vld [vmem:[%s3994_s11 + $0x18] sm:$0xff] }
0x3066   : > { %3377 = vpow2.f32 %v2439_v47  ;;  %v2691_v47 = vmul.f32 %v5046_v4, %v5087_v54 }
0x3067   : > { %v3362_v63 = vpop.eup %3361  ;;  %3379 = vpow2.f32 %v2437_v15 }
0x3068   : > { %v2478_v29 = vmul.f32 %v3362_v63, %v5070_v12  ;;  %3381 = vpow2.f32 %v2445_v40 }
0x3069   : > { %v3364_v52 = vpop.eup %3363  ;;  %3383 = vpow2.f32 %v2443_v49 }
0x306a   : > { %v3366_v56 = vpop.eup %3365  ;;  %2483 = vrot.lane.b32.xlu1 %v2478_v29, %s3604_s7  ;;  %v2477_v31 = vmul.f32 %v3364_v52, %v5074_v61  ;;  %3385 = vpow2.f32 %v2451_v35  ;;  %v2643_v29 = vmul.f32 %v5087_v54, %v4870_v18  ;;  %v2670_v18 = vmul.f32 %v5035_v22, %v4885_v55 }
0x306b   : > { %v3368_v48 = vpop.eup %3367  ;;  %v2489_v46 = vmul.f32 %v3366_v56, %v5074_v61  ;;  %3387 = vpow2.f32 %v2449_v14  ;;  %v2729_v22 = vmul.f32 %v5087_v54, %v4940_v10 }
0x306c   : > { %2481 = vrot.lane.b32.xlu0 %v2477_v31, %s3604_s7  ;;  %v3370_v23 = vpop.eup %3369  ;;  %v2490_v34 = vmul.f32 %v3368_v48, %v5070_v12  ;;  %3389 = vpow2.f32 %v2457_v43 }
0x306d   : > { %v2501_v20 = vmul.f32 %v3370_v23, %v5074_v61  ;;  %v5093_v58 = vpop.eup %3371  ;;  %3391 = vpow2.f32 %v2455_v44 }
0x306e   : > { %2493 = vrot.lane.b32.xlu1 %v2489_v46, %s3606_s4  ;;  %v5098_v60 = vpop.eup %3373  ;;  %v2460_v59 = vadd.f32 %v5093_v58, %v3362_v63 }
0x306f   : > { %v2459_v33 = vadd.f32 %v5098_v60, %v3364_v52  ;;  %v3376_v8 = vpop.eup %3375 }
0x3070   : > { %2495 = vrot.lane.b32.xlu0 %v2490_v34, %s3606_s4  ;;  %v2462_v37 = vadd.f32 %v3368_v48, %v2460_v59  ;;  %v5108_v2 = vpop.eup %3377  ;;  %v2692_v48 = vmul.f32 %v5041_v32, %v4885_v55  ;;  %v5155_v32 = vld [vmem:[%s3994_s11 + $0x8] sm:$0xff]  ;;  %v2502_v4 = vmul.f32 %v3376_v8, %v5070_v12 }
0x3071   : > { %v2461_v17 = vadd.f32 %v3366_v56, %v2459_v33  ;;  %v5113_v9 = vpop.eup %3379 }
0x3072   : > { %2505 = vrot.lane.b32.xlu1 %v2501_v20, %s3605_s22  ;;  %v2464_v27 = vadd.f32 %v3376_v8, %v2462_v37  ;;  %v3382_v25 = vpop.eup %3381  ;;  %v2475_v37 = vmul.f32 %v5098_v60, %v5074_v61  ;;  %v2516_v60 = vmul.f32 %v5108_v2, %v5161_v7 }
0x3073   : > { %v2463_v1 = vadd.f32 %v3370_v23, %v2461_v17  ;;  %v3384_v42 = vpop.eup %3383  ;;  %v2520_v10 = vmul.f32 %v3382_v25, %v5161_v7 }
0x3074   : > { %2587 = vrot.lane.b32.xlu0 %v2583_v30, %s3605_s22  ;;  %v2466_v3 = vadd.f32 %v5108_v2, %v2464_v27  ;;  %v3386_v0 = vpop.eup %3385 }
0x3075   : > { %v2465_v11 = vadd.f32 %v5113_v9, %v2463_v1  ;;  %v3388_v24 = vpop.eup %3387 }
0x3076   : > { %2589 = vrot.lane.b32.xlu1 %v2584_v21, %s3605_s22  ;;  %v2468_v63 = vadd.f32 %v3382_v25, %v2466_v3  ;;  %v3390_v41 = vpop.eup %3389 }
0x3077   : > { %v2467_v38 = vadd.f32 %v3384_v42, %v2465_v11  ;;  %v3392_v56 = vpop.eup %3391  ;;  %v2544_v36 = vmul.f32 %v3390_v41, %v5161_v7 }
0x3078   : > { %2609 = vrot.lane.b32.xlu0 %v2605_v51, %s3605_s22  ;;  %v2470_v52 = vadd.f32 %v3386_v0, %v2468_v63  ;;  %v2543_v16 = vmul.f32 %v3392_v56, %v5155_v32  ;;  %v2476_v51 = vmul.f32 %v5093_v58, %v5070_v12 }
0x3079   : > { %v2469_v26 = vadd.f32 %v3388_v24, %v2467_v38 }
0x307a   : > { %2611 = vrot.lane.b32.xlu1 %v2606_v5, %s3605_s22  ;;  %v5126_v31 = vadd.f32 %v3390_v41, %v2470_v52 }
0x307b   : > { %v5129_v28 = vadd.f32 %v3392_v56, %v2469_v26 }
0x307c   : > { %2631 = vrot.lane.b32.xlu0 %v2627_v57, %s3605_s22 }
0x307d   : > { %3393 = vrcp.f32 %v5129_v28 }
0x307e   : > { %2633 = vrot.lane.b32.xlu1 %v2628_v50, %s3605_s22  ;;  %3395 = vrcp.f32 %v5126_v31 }
0x3080   : > { %2647 = vrot.lane.b32.xlu0 %v2643_v29, %s3605_s22 }
0x3082   : > { %2649 = vrot.lane.b32.xlu1 %v4909_v19, %s3605_s22  ;;  %v2714_v19 = vmul.f32 %v5052_v13, %v4885_v55  ;;  %v2519_v55 = vmul.f32 %v3384_v42, %v5155_v32  ;;  %v2531_v13 = vmul.f32 %v3388_v24, %v5155_v32 }
0x3084   : > { %2673 = vrot.lane.b32.xlu0 %v2669_v6, %s3605_s22 }
0x3086   : > { %2675 = vrot.lane.b32.xlu1 %v2670_v18, %s3605_s22 }
0x3087   : > { %v3394_v28 = vpop.eup %3393 }
0x3088   : > { %2695 = vrot.lane.b32.xlu0 %v2691_v47, %s3605_s22 }
0x308a   : > { %2697 = vrot.lane.b32.xlu1 %v2692_v48, %s3605_s22 }
0x308c   : > { %2717 = vrot.lane.b32.xlu0 %v2713_v62, %s3605_s22  ;;  %v3396_v62 = vpop.eup %3395 }
0x308e   : > { %2719 = vrot.lane.b32.xlu1 %v2714_v19, %s3605_s22 }
0x3090   : > { %2733 = vrot.lane.b32.xlu0 %v2729_v22, %s3605_s22 }
0x3092   : > { %2735 = vrot.lane.b32.xlu1 %v4972_v39, %s3605_s22  ;;  %v2532_v39 = vmul.f32 %v3386_v0, %v5161_v7  ;;  %v2515_v0 = vmul.f32 %v5113_v9, %v5155_v32 }
0x3094   : > { %2507 = vrot.lane.b32.xlu0 %v2502_v4, %s3605_s22 }
0x3096   : > { %2523 = vrot.lane.b32.xlu1 %v2519_v55, %s3604_s7 }
0x3098   : > { %2525 = vrot.lane.b32.xlu0 %v2520_v10, %s3604_s7 }
0x309a   : > { %2535 = vrot.lane.b32.xlu1 %v2531_v13, %s3606_s4 }
0x309c   : > { %2537 = vrot.lane.b32.xlu0 %v2532_v39, %s3606_s4 }
0x309e   : > { %2547 = vrot.lane.b32.xlu1 %v2543_v16, %s3605_s22 }
0x30a0   : > { %2549 = vrot.lane.b32.xlu0 %v2544_v36, %s3605_s22 }
0x30dc   : > { %v2484_v15 = vpop.permute.xlu1 %2483 }
0x30dd   : > { %v2488_v5 = vadd.f32 %v2484_v15, %v2476_v51 }
0x30de   : > { %v2482_v45 = vpop.permute.xlu0 %2481 }
0x30df   : > { %v2487_v17 = vadd.f32 %v2482_v45, %v2475_v37 }
0x30e0   : > { %v2494_v46 = vpop.permute.xlu1 %2493 }
0x30e1   : > { %v2499_v3 = vadd.f32 %v2494_v46, %v2487_v17 }
0x30e2   : > { %v2496_v40 = vpop.permute.xlu0 %2495 }
0x30e3   : > { %v2500_v25 = vadd.f32 %v2496_v40, %v2488_v5 }
0x30e4   : > { %v2506_v23 = vpop.permute.xlu1 %2505 }
0x30e5   : > { %v2511_v11 = vadd.f32 %v2506_v23, %v2499_v3 }
0x30e6   : > { %v2588_v53 = vpop.permute.xlu0 %2587 }
0x30e7   : > { %v2517_v58 = vadd.f32 %v2515_v0, %v2511_v11  ;;  %v2593_v31 = vsel %vm281_vm0, %v2588_v53, 0.0 }
0x30e8   : > { %v2590_v49 = vpop.permute.xlu1 %2589 }
0x30e9   : > { %v2596_v2 = vsel %vm281_vm0, %v2590_v49, 0.0 }
0x30ea   : > { %v2610_v54 = vpop.permute.xlu0 %2609 }
0x30eb   : > { %v2615_v22 = vsel %vm281_vm0, %v2610_v54, 0.0 }
0x30ec   : > { %v2612_v34 = vpop.permute.xlu1 %2611 }
0x30ed   : > { %v2618_v4 = vsel %vm281_vm0, %v2612_v34, 0.0 }
0x30ee   : > { %v2632_v35 = vpop.permute.xlu0 %2631 }
0x30ef   : > { %v2637_v55 = vsel %vm281_vm0, %v2632_v35, 0.0 }
0x30f0   : > { %v2634_v14 = vpop.permute.xlu1 %2633 }
0x30f1   : > { %v2640_v10 = vsel %vm281_vm0, %v2634_v14, 0.0 }
0x30f2   : > { %v2648_v43 = vpop.permute.xlu0 %2647 }
0x30f3   : > { %v2653_v13 = vsel %vm281_vm0, %v2648_v43, 0.0 }
0x30f4   : > { %v2650_v20 = vpop.permute.xlu1 %2649 }
0x30f5   : > { %v2656_v39 = vsel %vm281_vm0, %v2650_v20, 0.0 }
0x30f6   : > { %v2674_v44 = vpop.permute.xlu0 %2673 }
0x30f7   : > { %v2679_v16 = vsel %vm281_vm0, %v2674_v44, 0.0 }
0x30f8   : > { %v2676_v30 = vpop.permute.xlu1 %2675 }
0x30f9   : > { %v2682_v36 = vsel %vm281_vm0, %v2676_v30, 0.0 }
0x30fa   : > { %v2696_v59 = vpop.permute.xlu0 %2695 }
0x30fb   : > { %v2701_v15 = vsel %vm281_vm0, %v2696_v59, 0.0 }
0x30fc   : > { %v2698_v21 = vpop.permute.xlu1 %2697 }
0x30fd   : > { %v2704_v45 = vsel %vm281_vm0, %v2698_v21, 0.0 }
0x30fe   : > { %v2718_v33 = vpop.permute.xlu0 %2717 }
0x30ff   : > { %v2723_v46 = vsel %vm281_vm0, %v2718_v33, 0.0 }
0x3100   : > { %v2720_v8 = vpop.permute.xlu1 %2719 }
0x3101   : > { %v2726_v40 = vsel %vm281_vm0, %v2720_v8, 0.0 }
0x3102   : > { %v2734_v27 = vpop.permute.xlu0 %2733 }
0x3103   : > { %v2739_v23 = vsel %vm281_vm0, %v2734_v27, 0.0 }
0x3104   : > { %v2736_v1 = vpop.permute.xlu1 %2735 }
0x3105   : > { %v2742_v53 = vsel %vm281_vm0, %v2736_v1, 0.0 }
0x3106   : > { %v2508_v57 = vpop.permute.xlu0 %2507 }
0x3107   : > { %v2512_v42 = vadd.f32 %v2508_v57, %v2500_v25 }
0x3108   : > { %v2524_v63 = vpop.permute.xlu1 %2523 }
0x3109   : > { %v2518_v29 = vadd.f32 %v2516_v60, %v2512_v42  ;;  %v2529_v24 = vadd.f32 %v2524_v63, %v2517_v58 }
0x310a   : > { %v2526_v50 = vpop.permute.xlu0 %2525 }
0x310b   : > { %v2530_v41 = vadd.f32 %v2526_v50, %v2518_v29 }
0x310c   : > { %v2536_v38 = vpop.permute.xlu1 %2535 }
0x310d   : > { %v2541_v26 = vadd.f32 %v2536_v38, %v2529_v24 }
0x310e   : > { %v2538_v52 = vpop.permute.xlu0 %2537 }
0x310f   : > { %v2542_v6 = vadd.f32 %v2538_v52, %v2530_v41 }
0x3110   : > { %v2548_v56 = vpop.permute.xlu1 %2547 }
0x3111   : > { %v2553_v18 = vadd.f32 %v2548_v56, %v2541_v26 }
0x3112   : > { %v2550_v47 = vpop.permute.xlu0 %2549 }
0x3113   : > { %v2557_v48 = vmul.f32 %v3394_v28, %v2553_v18  ;;  %v2554_v9 = vadd.f32 %v2550_v47, %v2542_v6 }
0x3115   : > { %v2558_v19 = vmul.f32 %v3396_v62, %v2554_v9  ;;  %2561 = vrot.lane.b32.xlu1 %v2557_v48, %s3606_s4 }
0x3117   : > { %2563 = vrot.lane.b32.xlu0 %v2558_v19, %s3606_s4 }
0x3136   : > { %2597 = vadd.xlane.f32.xlu0 %v2596_v2 }
0x3139   : > { %2594 = vadd.xlane.f32.xlu1 %v2593_v31 }
0x313a   : > { %2616 = vadd.xlane.f32.xlu0 %v2615_v22 }
0x313d   : > { %2619 = vadd.xlane.f32.xlu1 %v2618_v4 }
0x313e   : > { %2638 = vadd.xlane.f32.xlu0 %v2637_v55 }
0x3141   : > { %2641 = vadd.xlane.f32.xlu1 %v2640_v10 }
0x3142   : > { %2654 = vadd.xlane.f32.xlu0 %v2653_v13 }
0x3145   : > { %2657 = vadd.xlane.f32.xlu1 %v2656_v39 }
0x3146   : > { %2680 = vadd.xlane.f32.xlu0 %v2679_v16 }
0x3149   : > { %2683 = vadd.xlane.f32.xlu1 %v2682_v36 }
0x314a   : > { %2702 = vadd.xlane.f32.xlu0 %v2701_v15 }
0x314d   : > { %2705 = vadd.xlane.f32.xlu1 %v2704_v45 }
0x314e   : > { %2724 = vadd.xlane.f32.xlu0 %v2723_v46 }
0x3151   : > { %2727 = vadd.xlane.f32.xlu1 %v2726_v40 }
0x3152   : > { %2740 = vadd.xlane.f32.xlu0 %v2739_v23 }
0x3155   : > { %2743 = vadd.xlane.f32.xlu1 %v2742_v53 }
0x3187   : > { %v2562_v49 = vpop.permute.xlu1 %2561 }
0x3188   : > { %2567 = vst.msk [vmem:[%s4056_s30 + $0x8] sm:$0xff] %vm1245_vm2, %v2562_v49 }
0x3189   : > { %v2564_v54 = vpop.permute.xlu0 %2563 }
0x318a   : > { %2568 = vst.msk [vmem:[%s4056_s30 + $0x18] sm:$0xff] %vm1245_vm2, %v2564_v54 }
0x31c3   : > { %v2598_v34 = vpop.xlane.xlu0 %2597 }
0x31c6   : > { %v2595_v35 = vpop.xlane.xlu1 %2594 }
0x31c7   : > { %v2617_v14 = vpop.xlane.xlu0 %2616 }
0x31c8   : > { %v2745_v33 = vmax.f32 %v2595_v35, %v2617_v14 }
0x31ca   : > { %v2620_v43 = vpop.xlane.xlu1 %2619 }
0x31cb   : > { %v2639_v20 = vpop.xlane.xlu0 %2638  ;;  %v2746_v51 = vmax.f32 %v2598_v34, %v2620_v43 }
0x31cc   : > { %v2747_v37 = vmax.f32 %v2745_v33, %v2639_v20 }
0x31ce   : > { %v2642_v44 = vpop.xlane.xlu1 %2641 }
0x31cf   : > { %v2655_v30 = vpop.xlane.xlu0 %2654  ;;  %v2748_v5 = vmax.f32 %v2746_v51, %v2642_v44 }
0x31d0   : > { %v2749_v27 = vmax.f32 %v2747_v37, %v2655_v30 }
0x31d2   : > { %v2658_v59 = vpop.xlane.xlu1 %2657 }
0x31d3   : > { %v5208_v21 = vpop.xlane.xlu0 %2680  ;;  %v2750_v25 = vmax.f32 %v2748_v5, %v2658_v59 }
0x31d4   : > { %v2751_v1 = vmax.f32 %v2749_v27, %v5208_v21 }
0x31d6   : > { %v5210_v8 = vpop.xlane.xlu1 %2683 }
0x31d7   : > { %v2703_v17 = vpop.xlane.xlu0 %2702  ;;  %v2752_v42 = vmax.f32 %v2750_v25, %v5210_v8 }
0x31d8   : > { %v2753_v11 = vmax.f32 %v2751_v1, %v2703_v17 }
0x31da   : > { %v2706_v3 = vpop.xlane.xlu1 %2705 }
0x31db   : > { %v2725_v57 = vpop.xlane.xlu0 %2724  ;;  %v2754_v60 = vmax.f32 %v2752_v42, %v2706_v3 }
0x31dc   : > { %v2755_v63 = vmax.f32 %v2753_v11, %v2725_v57 }
0x31de   : > { %v2728_v0 = vpop.xlane.xlu1 %2727 }
0x31df   : > { %v2741_v50 = vpop.xlane.xlu0 %2740  ;;  %v2756_v29 = vmax.f32 %v2754_v60, %v2728_v0 }
0x31e0   : > { %v2757_v58 = vmax.f32 %v2755_v63, %v2741_v50 }
0x31e2   : > { %v2744_v38 = vpop.xlane.xlu1 %2743  ;;  %v2765_v24 = vsub.f32 %v2617_v14, %v2757_v58  ;;  %v2759_v41 = vsub.f32 %v2595_v35, %v2757_v58  ;;  %v2771_v56 = vsub.f32 %v2639_v20, %v2757_v58  ;;  %v2783_v6 = vsub.f32 %v5208_v21, %v2757_v58 }
0x31e3   : > { %v2758_v52 = vmax.f32 %v2756_v29, %v2744_v38  ;;  %v2777_v19 = vsub.f32 %v2655_v30, %v2757_v58  ;;  %v2789_v10 = vsub.f32 %v2703_v17, %v2757_v58  ;;  %v2795_v15 = vsub.f32 %v2725_v57, %v2757_v58 }
0x31e4   : > { %v2767_v26 = vmul.f32 1.442695, %v2765_v24  ;;  %v2773_v62 = vmul.f32 1.442695, %v2771_v56  ;;  %v2761_v36 = vmul.f32 1.442695, %v2759_v41  ;;  %v2801_v35 = vsub.f32 %v2741_v50, %v2757_v58 }
0x31e5   : > { %v2766_v18 = vsub.f32 %v2620_v43, %v2758_v52  ;;  %v2772_v28 = vsub.f32 %v2642_v44, %v2758_v52  ;;  %v2778_v47 = vsub.f32 %v2658_v59, %v2758_v52  ;;  %v2790_v31 = vsub.f32 %v2706_v3, %v2758_v52 }
0x31e6   : > { %3397 = vpow2.f32 %v2767_v26  ;;  %v2760_v22 = vsub.f32 %v2598_v34, %v2758_v52  ;;  %v2784_v4 = vsub.f32 %v5210_v8, %v2758_v52  ;;  %v2779_v55 = vmul.f32 1.442695, %v2777_v19 }
0x31e7   : > { %v2769_v48 = vmul.f32 1.442695, %v2766_v18  ;;  %v2775_v9 = vmul.f32 1.442695, %v2772_v28  ;;  %v2781_v2 = vmul.f32 1.442695, %v2778_v47  ;;  %v2796_v39 = vsub.f32 %v2728_v0, %v2758_v52 }
0x31e8   : > { %v2793_v13 = vmul.f32 1.442695, %v2790_v31  ;;  %v2802_v16 = vsub.f32 %v2744_v38, %v2758_v52  ;;  %v2763_v45 = vmul.f32 1.442695, %v2760_v22  ;;  %v2791_v46 = vmul.f32 1.442695, %v2789_v10 }
0x31e9   : > { %3399 = vpow2.f32 %v2769_v48  ;;  %v2799_v23 = vmul.f32 1.442695, %v2796_v39  ;;  %v2797_v54 = vmul.f32 1.442695, %v2795_v15  ;;  %v2785_v14 = vmul.f32 1.442695, %v2783_v6 }
0x31ea   : > { %3401 = vpow2.f32 %v2775_v9  ;;  %v2805_v53 = vmul.f32 1.442695, %v2802_v16  ;;  %v2787_v44 = vmul.f32 1.442695, %v2784_v4  ;;  %v2803_v33 = vmul.f32 1.442695, %v2801_v35 }
0x31eb   : > { %3403 = vpow2.f32 %v2773_v62 }
0x31ec   : > { %3405 = vpow2.f32 %v2781_v2 }
0x31ed   : > { %3407 = vpow2.f32 %v2779_v55 }
0x31ee   : > { %3409 = vpow2.f32 %v2793_v13 }
0x31ef   : > { %3411 = vpow2.f32 %v2761_v36 }
0x31f0   : > { %v3398_v40 = vpop.eup %3397  ;;  %3413 = vpow2.f32 %v2763_v45 }
0x31f1   : > { %v2825_v49 = vmul.f32 %v3398_v40, %v5074_v61  ;;  %3415 = vpow2.f32 %v2791_v46 }
0x31f2   : > { %3417 = vpow2.f32 %v2799_v23 }
0x31f3   : > { %v3400_v34 = vpop.eup %3399  ;;  %2829 = vrot.lane.b32.xlu0 %v2825_v49, %s3604_s7  ;;  %3419 = vpow2.f32 %v2805_v53 }
0x31f4   : > { %v3402_v43 = vpop.eup %3401  ;;  %v2826_v20 = vmul.f32 %v3400_v34, %v5070_v12  ;;  %3421 = vpow2.f32 %v2797_v54 }
0x31f5   : > { %v3404_v30 = vpop.eup %3403  ;;  %v2838_v59 = vmul.f32 %v3402_v43, %v5070_v12  ;;  %3423 = vpow2.f32 %v2785_v14 }
0x31f6   : > { %v3406_v21 = vpop.eup %3405  ;;  %2831 = vrot.lane.b32.xlu1 %v2826_v20, %s3604_s7  ;;  %v2837_v37 = vmul.f32 %v3404_v30, %v5074_v61  ;;  %3425 = vpow2.f32 %v2787_v44 }
0x31f7   : > { %2843 = vrot.lane.b32.xlu0 %v2838_v59, %s3606_s4  ;;  %v3408_v8 = vpop.eup %3407  ;;  %v2850_v51 = vmul.f32 %v3406_v21, %v5070_v12  ;;  %3427 = vpow2.f32 %v2803_v33 }
0x31f8   : > { %v3410_v17 = vpop.eup %3409  ;;  %v2849_v1 = vmul.f32 %v3408_v8, %v5074_v61 }
0x31f9   : > { %v3412_v27 = vpop.eup %3411  ;;  %v2868_v57 = vmul.f32 %v3410_v17, %v5161_v7 }
0x31fa   : > { %2841 = vrot.lane.b32.xlu1 %v2837_v37, %s3606_s4  ;;  %v3414_v5 = vpop.eup %3413  ;;  %v2807_v3 = vadd.f32 %v3412_v27, %v3398_v40  ;;  %v2823_v39 = vmul.f32 %v3412_v27, %v5074_v61 }
0x31fb   : > { %2855 = vrot.lane.b32.xlu0 %v2850_v51, %s3605_s22  ;;  %v3416_v25 = vpop.eup %3415  ;;  %v2808_v11 = vadd.f32 %v3414_v5, %v3400_v34  ;;  %v2824_v4 = vmul.f32 %v3414_v5, %v5070_v12 }
0x31fc   : > { %v3418_v42 = vpop.eup %3417  ;;  %v2809_v63 = vadd.f32 %v3404_v30, %v2807_v3  ;;  %v2867_v58 = vmul.f32 %v3416_v25, %v5155_v32 }
0x31fd   : > { %v3420_v0 = vpop.eup %3419  ;;  %v2810_v60 = vadd.f32 %v3402_v43, %v2808_v11  ;;  %v2880_v24 = vmul.f32 %v3418_v42, %v5161_v7 }
0x31fe   : > { %2853 = vrot.lane.b32.xlu1 %v2849_v1, %s3605_s22  ;;  %v3422_v50 = vpop.eup %3421  ;;  %v2811_v29 = vadd.f32 %v3408_v8, %v2809_v63  ;;  %v2892_v47 = vmul.f32 %v3420_v0, %v5161_v7 }
0x31ff   : > { %2873 = vrot.lane.b32.xlu0 %v2868_v57, %s3604_s7  ;;  %v3424_v38 = vpop.eup %3423  ;;  %v2812_v52 = vadd.f32 %v3406_v21, %v2810_v60  ;;  %v2879_v6 = vmul.f32 %v3422_v50, %v5155_v32 }
0x3200   : > { %v3426_v41 = vpop.eup %3425  ;;  %v2813_v26 = vadd.f32 %v3424_v38, %v2811_v29  ;;  %v2863_v35 = vmul.f32 %v3424_v38, %v5155_v32 }
0x3201   : > { %v2814_v56 = vadd.f32 %v3426_v41, %v2812_v52  ;;  %v3428_v28 = vpop.eup %3427  ;;  %v2864_v40 = vmul.f32 %v3426_v41, %v5161_v7 }
0x3202   : > { %2871 = vrot.lane.b32.xlu1 %v2867_v58, %s3604_s7  ;;  %v2815_v18 = vadd.f32 %v3416_v25, %v2813_v26  ;;  %v2891_v19 = vmul.f32 %v3428_v28, %v5155_v32 }
0x3203   : > { %2885 = vrot.lane.b32.xlu0 %v2880_v24, %s3606_s4  ;;  %v2816_v48 = vadd.f32 %v3410_v17, %v2814_v56 }
0x3204   : > { %v2817_v9 = vadd.f32 %v3422_v50, %v2815_v18 }
0x3205   : > { %v2818_v62 = vadd.f32 %v3418_v42, %v2816_v48 }
0x3206   : > { %2883 = vrot.lane.b32.xlu1 %v2879_v6, %s3606_s4  ;;  %v2819_v2 = vadd.f32 %v3428_v28, %v2817_v9 }
0x3207   : > { %2897 = vrot.lane.b32.xlu0 %v2892_v47, %s3605_s22  ;;  %v2820_v31 = vadd.f32 %v3420_v0, %v2818_v62 }
0x3209   : > { %3429 = vrcp.f32 %v2820_v31 }
0x320a   : > { %2895 = vrot.lane.b32.xlu1 %v2891_v19, %s3605_s22  ;;  %3431 = vrcp.f32 %v2819_v2 }
0x3213   : > { %v3430_v21 = vpop.eup %3429 }
0x3214   : > { %v3432_v51 = vpop.eup %3431 }
0x3265   : > { %v2830_v22 = vpop.permute.xlu0 %2829 }
0x3266   : > { %v2835_v15 = vadd.f32 %v2830_v22, %v2823_v39 }
0x3268   : > { %v2832_v55 = vpop.permute.xlu1 %2831 }
0x3269   : > { %v2836_v10 = vadd.f32 %v2832_v55, %v2824_v4  ;;  %v2844_v13 = vpop.permute.xlu0 %2843 }
0x326b   : > { %v2848_v16 = vadd.f32 %v2844_v13, %v2836_v10 }
0x326c   : > { %v2842_v36 = vpop.permute.xlu1 %2841 }
0x326d   : > { %v2856_v45 = vpop.permute.xlu0 %2855  ;;  %v2847_v23 = vadd.f32 %v2842_v36, %v2835_v15 }
0x326e   : > { %v2860_v46 = vadd.f32 %v2856_v45, %v2848_v16 }
0x3270   : > { %v2854_v53 = vpop.permute.xlu1 %2853  ;;  %v2866_v49 = vadd.f32 %v2864_v40, %v2860_v46 }
0x3271   : > { %v2859_v54 = vadd.f32 %v2854_v53, %v2847_v23  ;;  %v2874_v34 = vpop.permute.xlu0 %2873 }
0x3272   : > { %v2878_v61 = vadd.f32 %v2874_v34, %v2866_v49 }
0x3273   : > { %v2865_v12 = vadd.f32 %v2863_v35, %v2859_v54 }
0x3274   : > { %v2872_v14 = vpop.permute.xlu1 %2871 }
0x3275   : > { %v2886_v43 = vpop.permute.xlu0 %2885  ;;  %v2877_v30 = vadd.f32 %v2872_v14, %v2865_v12 }
0x3276   : > { %v2890_v20 = vadd.f32 %v2886_v43, %v2878_v61 }
0x3278   : > { %v2884_v44 = vpop.permute.xlu1 %2883 }
0x3279   : > { %v2898_v7 = vpop.permute.xlu0 %2897  ;;  %v2889_v33 = vadd.f32 %v2884_v44, %v2877_v30 }
0x327a   : > { %v2902_v59 = vadd.f32 %v2898_v7, %v2890_v20 }
0x327c   : > { %v2906_v37 = vmul.f32 %v3430_v21, %v2902_v59  ;;  %v2896_v32 = vpop.permute.xlu1 %2895 }
0x327d   : > { %v2901_v8 = vadd.f32 %v2896_v32, %v2889_v33 }
0x327e   : > { %2911 = vrot.lane.b32.xlu0 %v2906_v37, %s3604_s7 }
0x327f   : > { %v2905_v17 = vmul.f32 %v3432_v51, %v2901_v8 }
0x3281   : > { %2909 = vrot.lane.b32.xlu1 %v2905_v17, %s3604_s7 }
0x32f0   : > { %v2912_v27 = vpop.permute.xlu0 %2911 }
0x32f1   : > { %2916 = vst.msk [vmem:[%s4056_s30 + $0x18] sm:$0xff] %vm1594_vm3, %v2912_v27 }
0x32f3   : > { %v2910_v5 = vpop.permute.xlu1 %2909 }
0x32f4   : > { %2915 = vst.msk [vmem:[%s4056_s30 + $0x8] sm:$0xff] %vm1594_vm3, %v2910_v5 }
0x32f5   : > { %3540 = shalt.err (!%p3537_p10)
}
0x32f6   : > { %s3541_s9 = scalar_lea.hbm %s5253_s0, 512  ;;  %s3545_s17 = scalar_lea.hbm %s5304_s3, 1024 }
0x32f7   : > { %p3542_p11 = scmp.ne.s32.totalorder %s5253_s0, %s3541_s9  ;;  %p3546_p5 = scmp.lt.u32.totalorder %s5253_s0, %s5304_s3 }
0x32f8   : > { %p3547_p2 = scmp.lt.u32.totalorder %s3545_s17, %s3541_s9  ;;  %p3549_p13 = scmp.lt.u32.totalorder %s3541_s9, %s5253_s0 }
0x32f9   : > { %p3543_p4 = pnand %p3542_p11, %p5324_p7 }
0x32fa   : > { %p3548_p1 = por %p3547_p2, %p3546_p5 }
0x32fb   : > { %p3544_p3 = pneg %p3543_p4 }
0x32fc   : > { %p3550_p6 = por %p3549_p13, %p3548_p1 }
0x32fe   : > { %p3551_p9 = pnand %p3550_p6, %p3544_p3 }
0x3300   : > { %3554 = shalt.err (!%p3551_p9)
}
0x3301   : > { %s3608_s4 = smov 256   ;;  %s3609_s11 = smov 16  }
0x3302   : > { %3088 = dma.vmem_to_hbm [thread:$0]  (%p5324_p7), %s5255_s5, 512, %s5253_s0, %s2918_s19, %s3608_s4, %s3608_s4, %s3609_s11  }
0x3303 PF: > { %s2947_s30 = sand.u32 1, %s3585_s12   ;;  %p5325_p12 = scmp.ne.s32.totalorder %s5314_s24, 0 }
0x3304   : > { %p5326_p0 = scmp.ge.s32.totalorder %s3597_s15, 2  ;;  %s2948_s6 = scalar_lea.sflag [#allocation4], %s2947_s30 }
0x3306   : > { %p3101_p8 = pnand %p5326_p0, %p5325_p12 }
0x3308   : > { %3580 = dma.done.wait (!%p3101_p8), %s2948_s6, 512  }
0x3309   : > { %3582 = vsyncadd (!%p3101_p8), %s2948_s6, 4294966784  ;;  %p19_p10 = scmp.ge.s32.totalorder %s3655_s18, 4   ;;  %s5327_s12 = smov %s3589_s13 }
0x330a   : > { %s5328_s13 = smov %s3593_s14  ;;  %s5329_s14 = smov %s3667_s21 }
0x330b   : > { %s5330_s15 = smov %s3655_s18  ;;  %21 = sbr.rel (!%p19_p10) target bundleno = 9 (0x9), region = 101 }
0x3312   :  { %2953 = vsyncpa [#allocation3], 1 }
0x3313   :  { %2955 = vsyncpa [#allocation3 + $0x1], 1 }
0x3314   :  { %2956 = vsyncpa [#allocation6], 1 }
0x3315   :  { %2958 = vsyncpa [#allocation6 + $0x1], 1 }
0x3316   :  { %2959 = vsyncpa [#allocation4], 1 }
0x3317   :  { %2961 = vsyncpa [#allocation4 + $0x1], 1 }

</bundles_post_ra>
